<compile_context>
chip_gen: v5e
topology: v5e:2x2
jax: 0.10.0
libtpu: 0.0.40
codegen_flags: <defaults>
</compile_context>

<pallas_src>
import jax
import jax.numpy as jnp
from jax.experimental import pallas as pl
from jax.experimental.pallas import tpu as pltpu

K1 = 1
K2 = 2
NUM_FILTERS = 30
VARIANCE = 0.01
NEG_SLOPE = 0.01     # nn.LeakyReLU() default negative_slope
N_DEG = 6
DEG_PER_STEP = 3     # grid=(2,): one step per TensorCore on v7x


def _leaky(v):
    return jnp.where(v >= 0, v, NEG_SLOPE * v)


# ----------------------------------------------------------------------------
# Pallas kernel: one grid step = DEG_PER_STEP degrees, 3 fused simplicial convs
# ----------------------------------------------------------------------------
def _fused_kernel(lu_ref, x_ref, wp_ref, y_ref):
    # lu_ref : (D, BMp, BMp)  zero-padded block-diag(Lu^T) over the batch
    # x_ref  : (D, C_in, BMp) batch-column-stacked, zero-padded input
    # wp_ref : (D, Fp, W)     packed weights: [w2_cat | w1_cat | w3_cat | b1 b2 b3]
    # y_ref  : (D, C_out, BMp)
    n_per = lu_ref.shape[0]
    c_in = x_ref.shape[1]
    fp = wp_ref.shape[1]
    c_out = y_ref.shape[1]

    for dd in range(n_per):                      # static unroll (3 tiny iterations)
        luT = lu_ref[dd]                         # (BMp, BMp), VMEM-backed MXU operand
        x = x_ref[dd].astype(jnp.float32)        # (C_in, BMp)
        wp = wp_ref[dd]                          # (Fp, W)

        off = 2 * fp
        w2 = wp[:, :2 * fp]                      # (Fp, 2*Fp)  [w2a | w2b]
        w1 = wp[:, off:off + 2 * c_in]           # (Fp, 2*C_in)
        off += 2 * c_in
        w3 = wp[:, off:off + 2 * c_out]          # (Fp, 2*C_out) (pre-transposed)
        off += 2 * c_out
        b1 = wp[:, off:off + 1]                  # (Fp, 1)
        b2 = wp[:, off + 1:off + 2]              # (Fp, 1)
        b3 = wp[:c_out, off + 2:off + 3]         # (C_out, 1)

        # ---- Lu^1 of the input: one MXU push for the whole batch.
        xlu = jnp.dot(x, luT, preferred_element_type=jnp.float32)

        # ---- layer 1 (C_in == colors, tiny): rank-1 outer products on the VPU.
        if c_in == 1:
            o1 = w1[:, 0:1] * x + w1[:, 1:2] * xlu + b1
        else:
            o1 = jnp.dot(w1, jnp.concatenate([x, xlu], axis=0),
                         preferred_element_type=jnp.float32) + b1
        z1 = _leaky(o1)                          # (Fp, BMp)

        # ---- layer 2: single fused (Fp,2Fp) @ (2Fp,BMp) MXU push for all batches.
        z1lu = jnp.dot(z1, luT, preferred_element_type=jnp.float32)
        o2 = jnp.dot(w2, jnp.concatenate([z1, z1lu], axis=0),
                     preferred_element_type=jnp.float32) + b2
        z2 = _leaky(o2)                          # (Fp, BMp)

        # ---- layer 3 (C_out == colors, tiny): sublane reduce instead of MXU pop.
        z2lu = jnp.dot(z2, luT, preferred_element_type=jnp.float32)
        if c_out == 1:
            o3 = (jnp.sum(w3[:, 0:1] * z2 + w3[:, 1:2] * z2lu,
                          axis=0, keepdims=True) + b3)
        else:
            zcat = jnp.concatenate([z2, z2lu], axis=0)                   # (2Fp, BMp)
            wcat = jnp.concatenate([w3[:, :c_out], w3[:, c_out:]], axis=0)
            o3 = jax.lax.dot_general(wcat, zcat, (((0,), (0,)), ((), ())),
                                     preferred_element_type=jnp.float32) + b3

        y_ref[dd] = o3.astype(y_ref.dtype)       # (C_out, BMp) lane-dense store


# ----------------------------------------------------------------------------
# MySCNN2 forward: one pallas_call, grid=(2,), 3 degrees per step
# ----------------------------------------------------------------------------
def myscnn2_forward(params, Lls, Lus, Ds, adDs, xs):
    assert len(xs) == N_DEG
    assert len(Lls) == len(Ds) and len(Lus) == len(Ds)
    Ms = [x.shape[2] for x in xs]
    assert Ms == [D.shape[1] for D in Ds]
    assert Ms == [Ll.shape[1] for Ll in Lls]
    assert Ms == [Lu.shape[1] for Lu in Lus]
    assert [adD.shape[0] for adD in adDs] == [D.shape[1] for D in Ds]
    assert [adD.shape[1] for adD in adDs] == [D.shape[0] for D in Ds]
    # Ds / adDs are unused in the reference forward (asserts only).

    n_deg = N_DEG
    B, c_in, _ = xs[0].shape
    assert all(x.shape[0] == B and x.shape[1] == c_in for x in xs)

    m_pad = max(128, -(-max(Ms) // 128) * 128)   # lane-dense padding
    bmp = B * m_pad

    F = params["C0_1"][0].shape[1]
    c_out = params["C0_3"][0].shape[1]
    fp = -(-F // 8) * 8                          # sublane-aligned filter dim (30 -> 32)

    def pad_to(a, rows, cols):
        a = a.astype(jnp.float32)
        return jnp.pad(a, ((0, rows - a.shape[0]), (0, cols - a.shape[1])))

    eye_b = jnp.eye(B, dtype=jnp.float32)

    lu_s, x_s, w_s = [], [], []
    for d in range(n_deg):
        M = Ms[d]
        # Block-diagonal Lu^T over the batch (pad rows/cols are exactly zero).
        luT = pad_to(Lus[d].T, m_pad, m_pad)
        lu_s.append(jnp.kron(eye_b, luT))                         # (B*Mp, B*Mp)

        # Batch-column-stacked, lane-dense input slab.
        xp = jnp.pad(xs[d].astype(jnp.float32),
                     ((0, 0), (0, 0), (0, m_pad - M)))            # (B, C_in, Mp)
        x_s.append(xp.transpose(1, 0, 2).reshape(c_in, bmp))      # (C_in, B*Mp)

        t1, bb1 = params[f"C{d}_1"]
        t2, bb2 = params[f"C{d}_2"]
        t3, bb3 = params[f"C{d}_3"]
        for t in (t1, t2, t3):
            assert t.shape[0] == K1 + K2 == 3, "kernel assumes K1=1, K2=2"
        # Fold theta[0] (Ll^0 x) and theta[1] (Lu^0 x): both multiply x.
        w1 = jnp.concatenate([pad_to(t1[0] + t1[1], fp, c_in),
                              pad_to(t1[2], fp, c_in)], axis=1)         # (fp, 2*c_in)
        w2 = jnp.concatenate([pad_to(t2[0] + t2[1], fp, fp),
                              pad_to(t2[2], fp, fp)], axis=1)           # (fp, 2*fp)
        w3 = jnp.concatenate([pad_to((t3[0] + t3[1]).T, fp, c_out),
                              pad_to(t3[2].T, fp, c_out)], axis=1)      # (fp, 2*c_out)
        b1 = pad_to(bb1, fp, 1)
        b2 = pad_to(bb2, fp, 1)
        b3 = pad_to(bb3, fp, 1)
        # One packed weight slab per degree -> one DMA instead of six.
        w_s.append(jnp.concatenate([w2, w1, w3, b1, b2, b3], axis=1))

    lu_s = jnp.stack(lu_s)                        # (6, B*Mp, B*Mp)
    x_s = jnp.stack(x_s)                          # (6, C_in, B*Mp)
    w_s = jnp.stack(w_s)                          # (6, fp, 2fp+2c_in+2c_out+3)
    wcols = w_s.shape[2]

    assert n_deg % DEG_PER_STEP == 0
    n_steps = n_deg // DEG_PER_STEP

    out = pl.pallas_call(
        _fused_kernel,
        out_shape=jax.ShapeDtypeStruct((n_deg, c_out, bmp), jnp.float32),
        grid=(n_steps,),
        in_specs=[
            pl.BlockSpec((DEG_PER_STEP, bmp, bmp), lambda g: (g, 0, 0)),    # Lu^T (blkdiag)
            pl.BlockSpec((DEG_PER_STEP, c_in, bmp), lambda g: (g, 0, 0)),   # x slab
            pl.BlockSpec((DEG_PER_STEP, fp, wcols), lambda g: (g, 0, 0)),   # packed weights
        ],
        out_specs=pl.BlockSpec((DEG_PER_STEP, c_out, bmp), lambda g: (g, 0, 0)),
        compiler_params=pltpu.CompilerParams(dimension_semantics=("parallel",)),
    )(lu_s, x_s, w_s)

    outs = []
    for d in range(n_deg):
        o = out[d].reshape(c_out, B, m_pad).transpose(1, 0, 2)[:, :, :Ms[d]]
        outs.append(o.astype(xs[d].dtype))
    return outs


# ----------------------------------------------------------------------------
# Parameter initialization (deterministic, mirrors module __init__ shapes)
# ----------------------------------------------------------------------------
def init_params(key, colors=1):
    num_filters = NUM_FILTERS
    K = K1 + K2
    params = {}
    dims = [
        (colors, num_filters * colors),                 # layer 1
        (num_filters * colors, num_filters * colors),   # layer 2
        (num_filters * colors, colors),                 # layer 3
    ]
    for d in range(N_DEG):
        for layer, (c_in, c_out) in enumerate(dims, start=1):
            key, sub = jax.random.split(key)
            theta = VARIANCE * jax.random.normal(sub, (K, c_out, c_in), jnp.float32)
            bias = jnp.zeros((c_out, 1), jnp.float32)
            params[f"C{d}_{layer}"] = (theta, bias)
    return params


# ----------------------------------------------------------------------------
# Pure-JAX reference (for correctness check)
# ----------------------------------------------------------------------------
def _ref_conv(Ll, Lu, x, theta, bias, apply_leaky):
    if apply_leaky:
        x = jnp.where(x >= 0, x, NEG_SLOPE * x)
    terms = []
    p = x
    for _ in range(K1):
        terms.append(p)
        p = jnp.einsum("mn,bin->bim", Ll, p, precision=jax.lax.Precision.HIGHEST)
    p = x
    for _ in range(K2):
        terms.append(p)
        p = jnp.einsum("mn,bin->bim", Lu, p, precision=jax.lax.Precision.HIGHEST)
    X = jnp.stack(terms, axis=0)  # (K, B, C_in, M)
    y = jnp.einsum("koi,kbim->bom", theta, X, precision=jax.lax.Precision.HIGHEST)
    return y + bias[None]


def _ref_forward(params, Lls, Lus, xs):
    outs = []
    for d in range(N_DEG):
        t1, b1 = params[f"C{d}_1"]
        t2, b2 = params[f"C{d}_2"]
        t3, b3 = params[f"C{d}_3"]
        o1 = _ref_conv(Lls[d], Lus[d], xs[d], t1, b1, False)
        o2 = _ref_conv(Lls[d], Lus[d], o1, t2, b2, True)
        o3 = _ref_conv(Lls[d], Lus[d], o2, t3, b3, True)
        outs.append(o3)
    return outs


# ----------------------------------------------------------------------------
# Main
# ----------------------------------------------------------------------------
if __name__ == "__main__":
    key = jax.random.PRNGKey(0)
    colors = 1
    B = 2
    # number of d-simplices per degree (small synthetic complex)
    Ms = [12, 20, 16, 10, 14, 18]
    # boundary-map row counts (Ds unused in forward, present for signature fidelity)
    Ns = [8, 12, 20, 16, 10, 14]

    params = init_params(key, colors=colors)

    Lls, Lus, Ds, adDs, xs = [], [], [], [], []
    for d, (M, N) in enumerate(zip(Ms, Ns)):
        key, k1, k2, k3, k4 = jax.random.split(key, 5)
        A = jax.random.normal(k1, (M, M), jnp.float32)
        Lls.append(0.1 * (A + A.T))                              # symmetric lower Laplacian
        Bm = jax.random.normal(k2, (M, M), jnp.float32)
        Lus.append(0.1 * (Bm + Bm.T))                            # symmetric upper Laplacian
        D = jax.random.normal(k3, (N, M), jnp.float32)
        Ds.append(D)
        adDs.append(D.T)                                         # adjoint boundary map
        xs.append(jax.random.normal(k4, (B, colors, M), jnp.float32))

    outs = myscnn2_forward(params, Lls, Lus, Ds, adDs, xs)
    outs = [jax.block_until_ready(o) for o in outs]

    refs = _ref_forward(params, Lls, Lus, xs)
    for d, (o, r) in enumerate(zip(outs, refs)):
        assert o.shape == (B, colors, Ms[d]), (o.shape, (B, colors, Ms[d]))
        assert jnp.allclose(o, r, rtol=1e-3, atol=1e-4), f"mismatch at degree {d}"

    print("KERNEL_OK")
</pallas_src>

<mosaic_0001>
module attributes {stable_mosaic.version = 11 : i64} {
  func.func @_fused_kernel(%arg0: i32, %arg1: memref<3x256x256xf32, #tpu.memory_space<vmem>>, %arg2: memref<3x1x256xf32, #tpu.memory_space<vmem>>, %arg3: memref<3x32x71xf32, #tpu.memory_space<vmem>>, %arg4: memref<3x1x256xf32, #tpu.memory_space<vmem>>) attributes {dimension_semantics = [#tpu.dimension_semantics<parallel>], iteration_bounds = array<i64: 2>, scalar_prefetch = 0 : i64, scratch_operands = 0 : i64, tpu.core_type = #tpu.core_type<tc>, window_params = [{transform_indices = @transform_0, window_bounds = array<i64: 3, 256, 256>}, {transform_indices = @transform_1, window_bounds = array<i64: 3, 1, 256>}, {transform_indices = @transform_2, window_bounds = array<i64: 3, 32, 71>}, {transform_indices = @transform_3, window_bounds = array<i64: 3, 1, 256>}]} {
    %c0 = arith.constant 0 : index
    %c0_0 = arith.constant 0 : index
    %c0_1 = arith.constant 0 : index
    %0 = vector.load %arg1[%c0, %c0_0, %c0_1] : memref<3x256x256xf32, #tpu.memory_space<vmem>>, vector<1x256x256xf32>
    %1 = vector.shape_cast %0 : vector<1x256x256xf32> to vector<256x256xf32>
    %c0_2 = arith.constant 0 : index
    %c0_3 = arith.constant 0 : index
    %c0_4 = arith.constant 0 : index
    %2 = vector.load %arg2[%c0_2, %c0_3, %c0_4] : memref<3x1x256xf32, #tpu.memory_space<vmem>>, vector<1x1x256xf32>
    %3 = vector.shape_cast %2 : vector<1x1x256xf32> to vector<1x256xf32>
    %c0_5 = arith.constant 0 : index
    %c0_6 = arith.constant 0 : index
    %c0_7 = arith.constant 0 : index
    %4 = vector.load %arg3[%c0_5, %c0_6, %c0_7] : memref<3x32x71xf32, #tpu.memory_space<vmem>>, vector<1x32x71xf32>
    %5 = vector.shape_cast %4 : vector<1x32x71xf32> to vector<32x71xf32>
    %6 = vector.extract_strided_slice %5 {offsets = [0, 0], sizes = [32, 64], strides = [1, 1]} : vector<32x71xf32> to vector<32x64xf32>
    %7 = vector.extract_strided_slice %5 {offsets = [0, 64], sizes = [32, 2], strides = [1, 1]} : vector<32x71xf32> to vector<32x2xf32>
    %8 = vector.extract_strided_slice %5 {offsets = [0, 66], sizes = [32, 2], strides = [1, 1]} : vector<32x71xf32> to vector<32x2xf32>
    %9 = vector.extract_strided_slice %5 {offsets = [0, 68], sizes = [32, 1], strides = [1, 1]} : vector<32x71xf32> to vector<32x1xf32>
    %10 = vector.extract_strided_slice %5 {offsets = [0, 69], sizes = [32, 1], strides = [1, 1]} : vector<32x71xf32> to vector<32x1xf32>
    %11 = vector.extract_strided_slice %5 {offsets = [0, 70], sizes = [1, 1], strides = [1, 1]} : vector<32x71xf32> to vector<1x1xf32>
    %cst = arith.constant dense<0.000000e+00> : vector<1x256xf32>
    %12 = tpu.matmul %3, %1, %cst {dimension_numbers = #tpu.dot_dimension_numbers<[1], [0], [0], [1], [0, 0, 1, 1], [], []>} : vector<1x256xf32>, vector<256x256xf32>, vector<1x256xf32> -> vector<1x256xf32>
    %13 = vector.extract_strided_slice %7 {offsets = [0, 0], sizes = [32, 1], strides = [1, 1]} : vector<32x2xf32> to vector<32x1xf32>
    %14 = vector.broadcast %13 : vector<32x1xf32> to vector<32x256xf32>
    %15 = vector.broadcast %3 : vector<1x256xf32> to vector<32x256xf32>
    %16 = arith.mulf %14, %15 : vector<32x256xf32>
    %17 = vector.extract_strided_slice %7 {offsets = [0, 1], sizes = [32, 1], strides = [1, 1]} : vector<32x2xf32> to vector<32x1xf32>
    %18 = vector.broadcast %17 : vector<32x1xf32> to vector<32x256xf32>
    %19 = vector.broadcast %12 : vector<1x256xf32> to vector<32x256xf32>
    %20 = arith.mulf %18, %19 : vector<32x256xf32>
    %21 = arith.addf %16, %20 : vector<32x256xf32>
    %22 = vector.broadcast %9 : vector<32x1xf32> to vector<32x256xf32>
    %23 = arith.addf %21, %22 : vector<32x256xf32>
    %cst_8 = arith.constant 0.000000e+00 : f32
    %24 = vector.broadcast %cst_8 : f32 to vector<32x256xf32>
    %25 = arith.cmpf oge, %23, %24 : vector<32x256xf32>
    %cst_9 = arith.constant 0.00999999977 : f32
    %26 = vector.broadcast %cst_9 : f32 to vector<32x256xf32>
    %27 = arith.mulf %26, %23 : vector<32x256xf32>
    %28 = arith.select %25, %23, %27 : vector<32x256xi1>, vector<32x256xf32>
    %cst_10 = arith.constant dense<0.000000e+00> : vector<32x256xf32>
    %29 = tpu.matmul %28, %1, %cst_10 {dimension_numbers = #tpu.dot_dimension_numbers<[1], [0], [0], [1], [0, 0, 1, 1], [], []>} : vector<32x256xf32>, vector<256x256xf32>, vector<32x256xf32> -> vector<32x256xf32>
    %30 = tpu.concatenate %28, %29 in 0 : vector<32x256xf32>, vector<32x256xf32> -> vector<64x256xf32>
    %cst_11 = arith.constant dense<0.000000e+00> : vector<32x256xf32>
    %31 = tpu.matmul %6, %30, %cst_11 {dimension_numbers = #tpu.dot_dimension_numbers<[1], [0], [0], [1], [0, 0, 1, 1], [], []>} : vector<32x64xf32>, vector<64x256xf32>, vector<32x256xf32> -> vector<32x256xf32>
    %32 = vector.broadcast %10 : vector<32x1xf32> to vector<32x256xf32>
    %33 = arith.addf %31, %32 : vector<32x256xf32>
    %cst_12 = arith.constant 0.000000e+00 : f32
    %34 = vector.broadcast %cst_12 : f32 to vector<32x256xf32>
    %35 = arith.cmpf oge, %33, %34 : vector<32x256xf32>
    %cst_13 = arith.constant 0.00999999977 : f32
    %36 = vector.broadcast %cst_13 : f32 to vector<32x256xf32>
    %37 = arith.mulf %36, %33 : vector<32x256xf32>
    %38 = arith.select %35, %33, %37 : vector<32x256xi1>, vector<32x256xf32>
    %cst_14 = arith.constant dense<0.000000e+00> : vector<32x256xf32>
    %39 = tpu.matmul %38, %1, %cst_14 {dimension_numbers = #tpu.dot_dimension_numbers<[1], [0], [0], [1], [0, 0, 1, 1], [], []>} : vector<32x256xf32>, vector<256x256xf32>, vector<32x256xf32> -> vector<32x256xf32>
    %40 = vector.extract_strided_slice %8 {offsets = [0, 0], sizes = [32, 1], strides = [1, 1]} : vector<32x2xf32> to vector<32x1xf32>
    %41 = vector.broadcast %40 : vector<32x1xf32> to vector<32x256xf32>
    %42 = arith.mulf %41, %38 : vector<32x256xf32>
    %43 = vector.extract_strided_slice %8 {offsets = [0, 1], sizes = [32, 1], strides = [1, 1]} : vector<32x2xf32> to vector<32x1xf32>
    %44 = vector.broadcast %43 : vector<32x1xf32> to vector<32x256xf32>
    %45 = arith.mulf %44, %39 : vector<32x256xf32>
    %46 = arith.addf %42, %45 : vector<32x256xf32>
    %cst_15 = arith.constant dense<0.000000e+00> : vector<256xf32>
    %47 = vector.multi_reduction <add>, %46, %cst_15 [0] : vector<32x256xf32> to vector<256xf32>
    %48 = vector.shape_cast %47 : vector<256xf32> to vector<1x256xf32>
    %49 = vector.broadcast %11 : vector<1x1xf32> to vector<1x256xf32>
    %50 = arith.addf %48, %49 : vector<1x256xf32>
    %c0_16 = arith.constant 0 : index
    %c0_17 = arith.constant 0 : index
    %c0_18 = arith.constant 0 : index
    %51 = vector.load %arg4[%c0_16, %c0_17, %c0_18] : memref<3x1x256xf32, #tpu.memory_space<vmem>>, vector<1x1x256xf32>
    %52 = vector.shape_cast %51 : vector<1x1x256xf32> to vector<1x256xf32>
    %53 = vector.shape_cast %50 : vector<1x256xf32> to vector<1x1x256xf32>
    tpu.vector_store %arg4[%c0_16, %c0_17, %c0_18], %53 {strides = array<i32>} : memref<3x1x256xf32, #tpu.memory_space<vmem>>, vector<1x1x256xf32>,
    %c1 = arith.constant 1 : index
    %c0_19 = arith.constant 0 : index
    %c0_20 = arith.constant 0 : index
    %54 = vector.load %arg1[%c1, %c0_19, %c0_20] : memref<3x256x256xf32, #tpu.memory_space<vmem>>, vector<1x256x256xf32>
    %55 = vector.shape_cast %54 : vector<1x256x256xf32> to vector<256x256xf32>
    %c1_21 = arith.constant 1 : index
    %c0_22 = arith.constant 0 : index
    %c0_23 = arith.constant 0 : index
    %56 = vector.load %arg2[%c1_21, %c0_22, %c0_23] : memref<3x1x256xf32, #tpu.memory_space<vmem>>, vector<1x1x256xf32>
    %57 = vector.shape_cast %56 : vector<1x1x256xf32> to vector<1x256xf32>
    %c1_24 = arith.constant 1 : index
    %c0_25 = arith.constant 0 : index
    %c0_26 = arith.constant 0 : index
    %58 = vector.load %arg3[%c1_24, %c0_25, %c0_26] : memref<3x32x71xf32, #tpu.memory_space<vmem>>, vector<1x32x71xf32>
    %59 = vector.shape_cast %58 : vector<1x32x71xf32> to vector<32x71xf32>
    %60 = vector.extract_strided_slice %59 {offsets = [0, 0], sizes = [32, 64], strides = [1, 1]} : vector<32x71xf32> to vector<32x64xf32>
    %61 = vector.extract_strided_slice %59 {offsets = [0, 64], sizes = [32, 2], strides = [1, 1]} : vector<32x71xf32> to vector<32x2xf32>
    %62 = vector.extract_strided_slice %59 {offsets = [0, 66], sizes = [32, 2], strides = [1, 1]} : vector<32x71xf32> to vector<32x2xf32>
    %63 = vector.extract_strided_slice %59 {offsets = [0, 68], sizes = [32, 1], strides = [1, 1]} : vector<32x71xf32> to vector<32x1xf32>
    %64 = vector.extract_strided_slice %59 {offsets = [0, 69], sizes = [32, 1], strides = [1, 1]} : vector<32x71xf32> to vector<32x1xf32>
    %65 = vector.extract_strided_slice %59 {offsets = [0, 70], sizes = [1, 1], strides = [1, 1]} : vector<32x71xf32> to vector<1x1xf32>
    %cst_27 = arith.constant dense<0.000000e+00> : vector<1x256xf32>
    %66 = tpu.matmul %57, %55, %cst_27 {dimension_numbers = #tpu.dot_dimension_numbers<[1], [0], [0], [1], [0, 0, 1, 1], [], []>} : vector<1x256xf32>, vector<256x256xf32>, vector<1x256xf32> -> vector<1x256xf32>
    %67 = vector.extract_strided_slice %61 {offsets = [0, 0], sizes = [32, 1], strides = [1, 1]} : vector<32x2xf32> to vector<32x1xf32>
    %68 = vector.broadcast %67 : vector<32x1xf32> to vector<32x256xf32>
    %69 = vector.broadcast %57 : vector<1x256xf32> to vector<32x256xf32>
    %70 = arith.mulf %68, %69 : vector<32x256xf32>
    %71 = vector.extract_strided_slice %61 {offsets = [0, 1], sizes = [32, 1], strides = [1, 1]} : vector<32x2xf32> to vector<32x1xf32>
    %72 = vector.broadcast %71 : vector<32x1xf32> to vector<32x256xf32>
    %73 = vector.broadcast %66 : vector<1x256xf32> to vector<32x256xf32>
    %74 = arith.mulf %72, %73 : vector<32x256xf32>
    %75 = arith.addf %70, %74 : vector<32x256xf32>
    %76 = vector.broadcast %63 : vector<32x1xf32> to vector<32x256xf32>
    %77 = arith.addf %75, %76 : vector<32x256xf32>
    %cst_28 = arith.constant 0.000000e+00 : f32
    %78 = vector.broadcast %cst_28 : f32 to vector<32x256xf32>
    %79 = arith.cmpf oge, %77, %78 : vector<32x256xf32>
    %cst_29 = arith.constant 0.00999999977 : f32
    %80 = vector.broadcast %cst_29 : f32 to vector<32x256xf32>
    %81 = arith.mulf %80, %77 : vector<32x256xf32>
    %82 = arith.select %79, %77, %81 : vector<32x256xi1>, vector<32x256xf32>
    %cst_30 = arith.constant dense<0.000000e+00> : vector<32x256xf32>
    %83 = tpu.matmul %82, %55, %cst_30 {dimension_numbers = #tpu.dot_dimension_numbers<[1], [0], [0], [1], [0, 0, 1, 1], [], []>} : vector<32x256xf32>, vector<256x256xf32>, vector<32x256xf32> -> vector<32x256xf32>
    %84 = tpu.concatenate %82, %83 in 0 : vector<32x256xf32>, vector<32x256xf32> -> vector<64x256xf32>
    %cst_31 = arith.constant dense<0.000000e+00> : vector<32x256xf32>
    %85 = tpu.matmul %60, %84, %cst_31 {dimension_numbers = #tpu.dot_dimension_numbers<[1], [0], [0], [1], [0, 0, 1, 1], [], []>} : vector<32x64xf32>, vector<64x256xf32>, vector<32x256xf32> -> vector<32x256xf32>
    %86 = vector.broadcast %64 : vector<32x1xf32> to vector<32x256xf32>
    %87 = arith.addf %85, %86 : vector<32x256xf32>
    %cst_32 = arith.constant 0.000000e+00 : f32
    %88 = vector.broadcast %cst_32 : f32 to vector<32x256xf32>
    %89 = arith.cmpf oge, %87, %88 : vector<32x256xf32>
    %cst_33 = arith.constant 0.00999999977 : f32
    %90 = vector.broadcast %cst_33 : f32 to vector<32x256xf32>
    %91 = arith.mulf %90, %87 : vector<32x256xf32>
    %92 = arith.select %89, %87, %91 : vector<32x256xi1>, vector<32x256xf32>
    %cst_34 = arith.constant dense<0.000000e+00> : vector<32x256xf32>
    %93 = tpu.matmul %92, %55, %cst_34 {dimension_numbers = #tpu.dot_dimension_numbers<[1], [0], [0], [1], [0, 0, 1, 1], [], []>} : vector<32x256xf32>, vector<256x256xf32>, vector<32x256xf32> -> vector<32x256xf32>
    %94 = vector.extract_strided_slice %62 {offsets = [0, 0], sizes = [32, 1], strides = [1, 1]} : vector<32x2xf32> to vector<32x1xf32>
    %95 = vector.broadcast %94 : vector<32x1xf32> to vector<32x256xf32>
    %96 = arith.mulf %95, %92 : vector<32x256xf32>
    %97 = vector.extract_strided_slice %62 {offsets = [0, 1], sizes = [32, 1], strides = [1, 1]} : vector<32x2xf32> to vector<32x1xf32>
    %98 = vector.broadcast %97 : vector<32x1xf32> to vector<32x256xf32>
    %99 = arith.mulf %98, %93 : vector<32x256xf32>
    %100 = arith.addf %96, %99 : vector<32x256xf32>
    %cst_35 = arith.constant dense<0.000000e+00> : vector<256xf32>
    %101 = vector.multi_reduction <add>, %100, %cst_35 [0] : vector<32x256xf32> to vector<256xf32>
    %102 = vector.shape_cast %101 : vector<256xf32> to vector<1x256xf32>
    %103 = vector.broadcast %65 : vector<1x1xf32> to vector<1x256xf32>
    %104 = arith.addf %102, %103 : vector<1x256xf32>
    %c1_36 = arith.constant 1 : index
    %c0_37 = arith.constant 0 : index
    %c0_38 = arith.constant 0 : index
    %105 = vector.load %arg4[%c1_36, %c0_37, %c0_38] : memref<3x1x256xf32, #tpu.memory_space<vmem>>, vector<1x1x256xf32>
    %106 = vector.shape_cast %105 : vector<1x1x256xf32> to vector<1x256xf32>
    %107 = vector.shape_cast %104 : vector<1x256xf32> to vector<1x1x256xf32>
    tpu.vector_store %arg4[%c1_36, %c0_37, %c0_38], %107 {strides = array<i32>} : memref<3x1x256xf32, #tpu.memory_space<vmem>>, vector<1x1x256xf32>,
    %c2 = arith.constant 2 : index
    %c0_39 = arith.constant 0 : index
    %c0_40 = arith.constant 0 : index
    %108 = vector.load %arg1[%c2, %c0_39, %c0_40] : memref<3x256x256xf32, #tpu.memory_space<vmem>>, vector<1x256x256xf32>
    %109 = vector.shape_cast %108 : vector<1x256x256xf32> to vector<256x256xf32>
    %c2_41 = arith.constant 2 : index
    %c0_42 = arith.constant 0 : index
    %c0_43 = arith.constant 0 : index
    %110 = vector.load %arg2[%c2_41, %c0_42, %c0_43] : memref<3x1x256xf32, #tpu.memory_space<vmem>>, vector<1x1x256xf32>
    %111 = vector.shape_cast %110 : vector<1x1x256xf32> to vector<1x256xf32>
    %c2_44 = arith.constant 2 : index
    %c0_45 = arith.constant 0 : index
    %c0_46 = arith.constant 0 : index
    %112 = vector.load %arg3[%c2_44, %c0_45, %c0_46] : memref<3x32x71xf32, #tpu.memory_space<vmem>>, vector<1x32x71xf32>
    %113 = vector.shape_cast %112 : vector<1x32x71xf32> to vector<32x71xf32>
    %114 = vector.extract_strided_slice %113 {offsets = [0, 0], sizes = [32, 64], strides = [1, 1]} : vector<32x71xf32> to vector<32x64xf32>
    %115 = vector.extract_strided_slice %113 {offsets = [0, 64], sizes = [32, 2], strides = [1, 1]} : vector<32x71xf32> to vector<32x2xf32>
    %116 = vector.extract_strided_slice %113 {offsets = [0, 66], sizes = [32, 2], strides = [1, 1]} : vector<32x71xf32> to vector<32x2xf32>
    %117 = vector.extract_strided_slice %113 {offsets = [0, 68], sizes = [32, 1], strides = [1, 1]} : vector<32x71xf32> to vector<32x1xf32>
    %118 = vector.extract_strided_slice %113 {offsets = [0, 69], sizes = [32, 1], strides = [1, 1]} : vector<32x71xf32> to vector<32x1xf32>
    %119 = vector.extract_strided_slice %113 {offsets = [0, 70], sizes = [1, 1], strides = [1, 1]} : vector<32x71xf32> to vector<1x1xf32>
    %cst_47 = arith.constant dense<0.000000e+00> : vector<1x256xf32>
    %120 = tpu.matmul %111, %109, %cst_47 {dimension_numbers = #tpu.dot_dimension_numbers<[1], [0], [0], [1], [0, 0, 1, 1], [], []>} : vector<1x256xf32>, vector<256x256xf32>, vector<1x256xf32> -> vector<1x256xf32>
    %121 = vector.extract_strided_slice %115 {offsets = [0, 0], sizes = [32, 1], strides = [1, 1]} : vector<32x2xf32> to vector<32x1xf32>
    %122 = vector.broadcast %121 : vector<32x1xf32> to vector<32x256xf32>
    %123 = vector.broadcast %111 : vector<1x256xf32> to vector<32x256xf32>
    %124 = arith.mulf %122, %123 : vector<32x256xf32>
    %125 = vector.extract_strided_slice %115 {offsets = [0, 1], sizes = [32, 1], strides = [1, 1]} : vector<32x2xf32> to vector<32x1xf32>
    %126 = vector.broadcast %125 : vector<32x1xf32> to vector<32x256xf32>
    %127 = vector.broadcast %120 : vector<1x256xf32> to vector<32x256xf32>
    %128 = arith.mulf %126, %127 : vector<32x256xf32>
    %129 = arith.addf %124, %128 : vector<32x256xf32>
    %130 = vector.broadcast %117 : vector<32x1xf32> to vector<32x256xf32>
    %131 = arith.addf %129, %130 : vector<32x256xf32>
    %cst_48 = arith.constant 0.000000e+00 : f32
    %132 = vector.broadcast %cst_48 : f32 to vector<32x256xf32>
    %133 = arith.cmpf oge, %131, %132 : vector<32x256xf32>
    %cst_49 = arith.constant 0.00999999977 : f32
    %134 = vector.broadcast %cst_49 : f32 to vector<32x256xf32>
    %135 = arith.mulf %134, %131 : vector<32x256xf32>
    %136 = arith.select %133, %131, %135 : vector<32x256xi1>, vector<32x256xf32>
    %cst_50 = arith.constant dense<0.000000e+00> : vector<32x256xf32>
    %137 = tpu.matmul %136, %109, %cst_50 {dimension_numbers = #tpu.dot_dimension_numbers<[1], [0], [0], [1], [0, 0, 1, 1], [], []>} : vector<32x256xf32>, vector<256x256xf32>, vector<32x256xf32> -> vector<32x256xf32>
    %138 = tpu.concatenate %136, %137 in 0 : vector<32x256xf32>, vector<32x256xf32> -> vector<64x256xf32>
    %cst_51 = arith.constant dense<0.000000e+00> : vector<32x256xf32>
    %139 = tpu.matmul %114, %138, %cst_51 {dimension_numbers = #tpu.dot_dimension_numbers<[1], [0], [0], [1], [0, 0, 1, 1], [], []>} : vector<32x64xf32>, vector<64x256xf32>, vector<32x256xf32> -> vector<32x256xf32>
    %140 = vector.broadcast %118 : vector<32x1xf32> to vector<32x256xf32>
    %141 = arith.addf %139, %140 : vector<32x256xf32>
    %cst_52 = arith.constant 0.000000e+00 : f32
    %142 = vector.broadcast %cst_52 : f32 to vector<32x256xf32>
    %143 = arith.cmpf oge, %141, %142 : vector<32x256xf32>
    %cst_53 = arith.constant 0.00999999977 : f32
    %144 = vector.broadcast %cst_53 : f32 to vector<32x256xf32>
    %145 = arith.mulf %144, %141 : vector<32x256xf32>
    %146 = arith.select %143, %141, %145 : vector<32x256xi1>, vector<32x256xf32>
    %cst_54 = arith.constant dense<0.000000e+00> : vector<32x256xf32>
    %147 = tpu.matmul %146, %109, %cst_54 {dimension_numbers = #tpu.dot_dimension_numbers<[1], [0], [0], [1], [0, 0, 1, 1], [], []>} : vector<32x256xf32>, vector<256x256xf32>, vector<32x256xf32> -> vector<32x256xf32>
    %148 = vector.extract_strided_slice %116 {offsets = [0, 0], sizes = [32, 1], strides = [1, 1]} : vector<32x2xf32> to vector<32x1xf32>
    %149 = vector.broadcast %148 : vector<32x1xf32> to vector<32x256xf32>
    %150 = arith.mulf %149, %146 : vector<32x256xf32>
    %151 = vector.extract_strided_slice %116 {offsets = [0, 1], sizes = [32, 1], strides = [1, 1]} : vector<32x2xf32> to vector<32x1xf32>
    %152 = vector.broadcast %151 : vector<32x1xf32> to vector<32x256xf32>
    %153 = arith.mulf %152, %147 : vector<32x256xf32>
    %154 = arith.addf %150, %153 : vector<32x256xf32>
    %cst_55 = arith.constant dense<0.000000e+00> : vector<256xf32>
    %155 = vector.multi_reduction <add>, %154, %cst_55 [0] : vector<32x256xf32> to vector<256xf32>
    %156 = vector.shape_cast %155 : vector<256xf32> to vector<1x256xf32>
    %157 = vector.broadcast %119 : vector<1x1xf32> to vector<1x256xf32>
    %158 = arith.addf %156, %157 : vector<1x256xf32>
    %c2_56 = arith.constant 2 : index
    %c0_57 = arith.constant 0 : index
    %c0_58 = arith.constant 0 : index
    %159 = vector.load %arg4[%c2_56, %c0_57, %c0_58] : memref<3x1x256xf32, #tpu.memory_space<vmem>>, vector<1x1x256xf32>
    %160 = vector.shape_cast %159 : vector<1x1x256xf32> to vector<1x256xf32>
    %161 = vector.shape_cast %158 : vector<1x256xf32> to vector<1x1x256xf32>
    tpu.vector_store %arg4[%c2_56, %c0_57, %c0_58], %161 {strides = array<i32>} : memref<3x1x256xf32, #tpu.memory_space<vmem>>, vector<1x1x256xf32>,
    return
  }
  func.func @transform_0(%arg0: i32) -> (i32, i32, i32) {
    %c0_i32 = arith.constant 0 : i32
    %c0_i32_0 = arith.constant 0 : i32
    %c0_i32_1 = arith.constant 0 : i32
    return %arg0, %c0_i32, %c0_i32_0 : i32, i32, i32
  }
  func.func @transform_1(%arg0: i32) -> (i32, i32, i32) {
    %c0_i32 = arith.constant 0 : i32
    %c0_i32_0 = arith.constant 0 : i32
    %c0_i32_1 = arith.constant 0 : i32
    return %arg0, %c0_i32, %c0_i32_0 : i32, i32, i32
  }
  func.func @transform_2(%arg0: i32) -> (i32, i32, i32) {
    %c0_i32 = arith.constant 0 : i32
    %c0_i32_0 = arith.constant 0 : i32
    %c0_i32_1 = arith.constant 0 : i32
    return %arg0, %c0_i32, %c0_i32_0 : i32, i32, i32
  }
  func.func @transform_3(%arg0: i32) -> (i32, i32, i32) {
    %c0_i32 = arith.constant 0 : i32
    %c0_i32_0 = arith.constant 0 : i32
    %c0_i32_1 = arith.constant 0 : i32
    return %arg0, %c0_i32, %c0_i32_0 : i32, i32, i32
  }
}

</mosaic_0001>

<bundles_post_ra>
// kernel: tpu_custom_call.1
= control target key start
LH: loop header
LB: loop body
LE: loop exit
PB: predicated region body
PF: predicated region fallthrough
CT: control target
= control target key end

     0   :  { %s5040_s0 = inlined_call_operand.hbm [shape: f32[6,256,256], index: 0, kind: input, shape index: {}]   ;;  %s5041_s1 = inlined_call_operand.hbm [shape: f32[6,1,256], index: 1, kind: input, shape index: {}]   ;;  %s5042_s2 = inlined_call_operand.hbm [shape: f32[6,32,71], index: 2, kind: input, shape index: {}]   ;;  %s5043_s3 = inlined_call_operand.hbm [shape: f32[6,1,256], index: 3, kind: output, shape index: {}]  }
   0x1   :  { %5175 = sst [smem:[#allocation52_spill]] %s5041_s1 }
   0x2   :  { %8 = vsyncpa [#allocation3], 0 }
   0x3   :  { %10 = vsyncpa [#allocation3 + $0x1], 0 }
   0x4   :  { %11 = vsyncpa [#allocation6], 0 }
   0x5   :  { %13 = vsyncpa [#allocation6 + $0x1], 0 }
   0x6   :  { %14 = vsyncpa [#allocation4], 0 }
   0x7   :  { %16 = vsyncpa [#allocation4 + $0x1], 0  ;;  %s3055_s12 = smov 0   ;;  %s3057_s13 = smov 0  }
   0x8   :  { %s3059_s14 = smov 0   ;;  %s3061_s15 = smov 0  }
   0x9 LB: > { %5176 = sst [smem:[#allocation12_spill]] %s3014_s14  ;;  %s3076_s16 = sadd.s32 4294967295, %s3018_s15   ;;  %s3018_s15 = sphi %s3061_s15, %s5362_s15   ;;  %s3014_s14 = sphi %s3059_s14, %s5359_s14   ;;  %s3010_s13 = sphi %s3057_s13, %s5361_s13   ;;  %s3006_s12 = sphi %s3055_s12, %s5360_s12  }
   0xa   : > { %s2488_s17 = sadd.s32 4294967294, %s3018_s15   ;;  %s3080_s18 = sadd.s32 1, %s3018_s15  }
   0xb   : > { %s29_s19 = sadd.s32 1, %s3014_s14  ;;  %s26_s20 = ssub.s32 %s3018_s15, %s3080_s18 }
   0xc   : > { %p36_p0 = scmp.ne.s32.totalorder %s3014_s14, %s3010_s13  ;;  %p27_p1 = scmp.eq.s32.totalorder %s26_s20, 0 }
   0xd   : > { %p37_p2 = scmp.eq.s32.totalorder %s3018_s15, 0  ;;  %p42_p3 = scmp.ne.s32.totalorder %s3010_s13, %s3006_s12 }
   0xe   : > { %p43_p4 = scmp.eq.s32.totalorder %s3076_s16, 0  ;;  %p118_p7 = scmp.eq.s32.totalorder %s3076_s16, 1 }
   0xf   : > { %s3092_s21 = scalar_select %p27_p1, %s3014_s14, %s29_s19  }
  0x10   : > { %p38_p5 = por %p37_p2, %p36_p0  ;;  %p3094_p6 = por %p43_p4, %p42_p3 }
  0x11   : > { %5177 = sst [smem:[#allocation13_spill]] %s3092_s21  ;;  %p124_p8 = scmp.eq.s32.totalorder %s2488_s17, 1 }
  0x12   : > { %p2490_p9 = scmp.ge.s32.totalorder %s3018_s15, 2  ;;  %p2732_p10 = scmp.lt.s32.totalorder %s3018_s15, 2 }
  0x13   : > { %p3101_p11 = por %p118_p7, %p36_p0  ;;  %p3105_p12 = por %p124_p8, %p42_p3 }
  0x14   : > { %s3110_s25 = sand.u32 1, %s3014_s14   ;;  %p3112_p13 = pnand %p2732_p10, %p38_p5 }
  0x15   : > { %s167_s27 = sand.u32 1, %s3018_s15   ;;  %s2705_s28 = smul.u32 6, %s3110_s25 }
  0x16   : > { %s2666_s29 = smul.u32 6, %s3018_s15  ;;  %s5182_s1 = sld [smem:[#allocation52_spill]] }
  0x17   : > { %s171_s30 = scalar_lea.vmem [#allocation5], %s2705_s28  ;;  %p2496_p0 = scmp.ge.s32.totalorder %s3018_s15, 1 }
  0x18   : > { %s179_s4 = sshll.u32 %s171_s30, 4  ;;  %s3123_s9 = scalar_lea.sflag [#allocation6], %s167_s27  ;;  %s180_s4 = int_to_ptr.vmem [resolvable:$true] %s179_s4 }
  0x19   : > { %p2862_p2 = pneg %p3112_p13 }
  0x1c   : > { %s176_s7 = scalar_lea.hbm %s5182_s1, %s2666_s29  ;;  %s2865_s20 = scalar_lea.hbm %s5182_s1, 12 }
  0x1d   : > { %s177_s8 = sshll.u32 %s176_s7, 4  ;;  %s178_s8 = int_to_ptr.hbm [resolvable:$true] %s177_s8 }
  0x1e   : > { %s2858_s10 = sshra.s32 %s178_s8, 4  ;;  %s2859_s10 = int_to_ptr.hbm [resolvable:$true] %s2858_s10 }
  0x1f   : > { %s2860_s11 = scalar_lea.hbm %s2859_s10, 6  ;;  %p2866_p5 = scmp.lt.s32.totalorder %s2859_s10, %s5182_s1 }
  0x20   : > { %p2861_p1 = scmp.ne.s32.totalorder %s2859_s10, %s2860_s11  ;;  %p2867_p7 = scmp.lt.s32.totalorder %s2865_s20, %s2860_s11 }
  0x22   : > { %p2863_p3 = pnand %p2862_p2, %p2861_p1  ;;  %p2868_p8 = por %p2867_p7, %p2866_p5 }
  0x24   : > { %p2864_p4 = pneg %p2863_p3 }
  0x26   : > { %p2869_p10 = pnand %p2868_p8, %p2864_p4 }
  0x28   : > { %2872 = shalt.err (!%p2869_p10)
}
  0x29   : > { %s3020_s27 = smov 32   ;;  %s3021_s30 = smov 2  }
  0x2a   : > { %2724 = dma.hbm_to_vmem [thread:$0]  (!%p3112_p13), %s178_s8, 96, %s180_s4, %s3123_s9, %s3020_s27, %s3020_s27, %s3021_s30  }
  0x2b   : > { %p210_p1 = scmp.lt.s32.totalorder %s3018_s15, 3  ;;  %s2704_s5 = smul.u32 1536, %s3110_s25 }
  0x2c   : > { %s2670_s7 = smul.u32 1536, %s3018_s15  ;;  %s145_s4 = scalar_lea.sflag [#allocation3], %s3110_s25 }
  0x2d   : > { %p3143_p3 = pnand %p2496_p0, %p210_p1  ;;  %s148_s19 = scalar_lea.vmem [#allocation2], %s2704_s5 }
  0x2e   : > { %s154_s17 = scalar_lea.hbm %s5040_s0, %s2670_s7  ;;  %s157_s20 = sshll.u32 %s148_s19, 4  ;;  %s158_s20 = int_to_ptr.vmem [resolvable:$true] %s157_s20 }
  0x2f   : > { %s155_s28 = sshll.u32 %s154_s17, 4  ;;  %s2706_s29 = smul.u32 96, %s3110_s25  ;;  %s156_s28 = int_to_ptr.hbm [resolvable:$true] %s155_s28 }
  0x30   : > { %s2888_s8 = sshra.s32 %s156_s28, 4  ;;  %s2895_s10 = scalar_lea.hbm %s5040_s0, 3072  ;;  %s2889_s8 = int_to_ptr.hbm [resolvable:$true] %s2888_s8 }
  0x31   : > { %s2890_s27 = scalar_lea.hbm %s2889_s8, 1536  ;;  %p2896_p7 = scmp.lt.s32.totalorder %s2889_s8, %s5040_s0 }
  0x32   : > { %p2891_p4 = scmp.ne.s32.totalorder %s2889_s8, %s2890_s27  ;;  %p2897_p8 = scmp.lt.s32.totalorder %s2895_s10, %s2890_s27 }
  0x34   : > { %p2893_p0 = pnand %p2891_p4, %p2862_p2  ;;  %p2898_p10 = por %p2897_p8, %p2896_p7 }
  0x36   : > { %p2894_p5 = pneg %p2893_p0 }
  0x38   : > { %p2899_p1 = pnand %p2898_p10, %p2894_p5 }
  0x3a   : > { %2902 = shalt.err (!%p2899_p1)
}
  0x3b   : > { %s3022_s25 = smov 256   ;;  %s3023_s11 = smov 16  }
  0x3c   : > { %2721 = dma.hbm_to_vmem [thread:$0]  (!%p3112_p13), %s156_s28, 24576, %s158_s20, %s145_s4, %s3022_s25, %s3022_s25, %s3023_s11  }
  0x3d   : > { %s2671_s17 = smul.u32 96, %s3018_s15  ;;  %s193_s19 = scalar_lea.vmem [#allocation7], %s2706_s29 }
  0x3e   : > { %s202_s21 = sshll.u32 %s193_s19, 4  ;;  %s2925_s28 = scalar_lea.hbm %s5042_s2, 192  ;;  %s203_s21 = int_to_ptr.vmem [resolvable:$true] %s202_s21 }
  0x3f   : > { %s199_s14 = scalar_lea.hbm %s5042_s2, %s2671_s17 }
  0x40   : > { %s200_s8 = sshll.u32 %s199_s14, 4  ;;  %s201_s8 = int_to_ptr.hbm [resolvable:$true] %s200_s8 }
  0x41   : > { %s2918_s27 = sshra.s32 %s201_s8, 4  ;;  %s2919_s27 = int_to_ptr.hbm [resolvable:$true] %s2918_s27 }
  0x42   : > { %s2920_s10 = scalar_lea.hbm %s2919_s27, 96  ;;  %p2926_p7 = scmp.lt.s32.totalorder %s2919_s27, %s5042_s2 }
  0x43   : > { %p2921_p4 = scmp.ne.s32.totalorder %s2919_s27, %s2920_s10  ;;  %p2927_p8 = scmp.lt.s32.totalorder %s2925_s28, %s2920_s10 }
  0x45   : > { %p2923_p0 = pnand %p2921_p4, %p2862_p2  ;;  %p2928_p10 = por %p2927_p8, %p2926_p7 }
  0x47   : > { %p2924_p5 = pneg %p2923_p0 }
  0x49   : > { %p2929_p1 = pnand %p2928_p10, %p2924_p5 }
  0x4b   : > { %2932 = shalt.err (!%p2929_p1)
}
  0x4c   : > { %s3024_s14 = smov 128   ;;  %s3025_s5 = smov 8  }
  0x4d   : > { %2727 = dma.hbm_to_vmem [thread:$0]  (!%p3112_p13), %s201_s8, 1536, %s203_s21, %s3123_s9, %s3024_s14, %s3024_s14, %s3025_s5  }
  0x4e   : > { %214 = sbr.rel (%p3143_p3) target bundleno = 1747 (0x6d3), region = 32 }
  0x53   : > { %s3183_s25 = sand.u32 1, %s3010_s13  }
  0x54   : > { %s2707_s11 = smul.u32 1536, %s3183_s25  ;;  %s217_s17 = scalar_lea.sflag [#allocation3], %s3183_s25 }
  0x56   : > { %s3187_s19 = scalar_lea.vmem [#allocation2], %s2707_s11 }
  0x57   : > { %2993 = dma.done.wait (%p3094_p6), %s217_s17, 24576  }
  0x58   : > { %2995 = vsyncadd (%p3094_p6), %s217_s17, 4294942720  ;;  %s226_s21 = sand.u32 1, %s3076_s16   ;;  %s2708_s26 = smul.u32 6, %s3183_s25 }
  0x59   : > { %s227_s9 = scalar_lea.sflag [#allocation6], %s226_s21 }
  0x5a   : > { %s3197_s6 = scalar_lea.vmem [#allocation5], %s2708_s26 }
  0x5b   : > { %2997 = dma.done.wait (%p3094_p6), %s227_s9, 1632  }
  0x5c   : > { %2999 = vsyncadd (%p3094_p6), %s227_s9, 4294965664  ;;  %v5045_v0 = vmov 68   ;;  %v5055_v1 = vmov 64   ;;  %v3206_v2 = vld [vmem:[%s3187_s19 + $0xf0] sm:$0xff]  ;;  %v3212_v4 = vld [vmem:[%s3187_s19 + $0xf8] sm:$0xff]  ;;  %s2709_s22 = smul.u32 96, %s3183_s25 }
  0x5d   : > { %2783 = vset.pattern.permute.xlu1 %v5045_v0  ;;  %2781 = vset.pattern.permute.xlu0 %v5055_v1  ;;  %v3209_v3 = vld [vmem:[%s3187_s19 + $0x1f0] sm:$0xff]  ;;  %5184 = vst [vmem:[#allocation14_spill] sm:$0xff] %v3212_v4  ;;  %v3217_v5 = vld [vmem:[%s3187_s19 + $0x1f8] sm:$0xff]  ;;  %v3220_v6 = vld [vmem:[%s3187_s19 + $0xe0] sm:$0xff]  ;;  %vm674_vm8 = vcmask 523264   ;;  %s4348_s30 = scalar_lea.vmem [#allocation8], %s2708_s26 }
  0x5e   : > { %352 = vmatpush.msra.mxu0 %v3206_v2  ;;  %372 = vmatpush.msra.mxu1 %v3209_v3  ;;  %v3223_v7 = vld [vmem:[%s3187_s19 + $0x1e0] sm:$0xff]  ;;  %v3228_v8 = vld [vmem:[%s3187_s19 + $0xe8] sm:$0xff]  ;;  %v3234_v10 = vld [vmem:[%s3187_s19 + $0xd0] sm:$0xff]  ;;  %s3362_s1 = scalar_lea.vmem [#allocation7], %s2709_s22  ;;  %s2669_s8 = smul.u32 6, %s3076_s16 }
  0x5f   : > { %392 = vmatpush.msra.mxu2 %v3212_v4  ;;  %412 = vmatpush.msra.mxu3 %v3217_v5  ;;  %5185 = vst [vmem:[#allocation15_spill] sm:$0xff] %v3228_v8  ;;  %v3231_v9 = vld [vmem:[%s3187_s19 + $0x1e8] sm:$0xff]  ;;  %v3239_v11 = vld [vmem:[%s3187_s19 + $0x1d0] sm:$0xff]  ;;  %v3242_v12 = vld [vmem:[%s3187_s19 + $0xd8] sm:$0xff]  ;;  %s2369_s20 = sshll.u32 %s4348_s30, 4  ;;  %s2357_s16 = scalar_lea.sflag [#allocation4], %s3183_s25  ;;  %s2370_s20 = int_to_ptr.vmem [resolvable:$true] %s2369_s20 }
  0x60   : > { %353 = vmatpush.msra.mxu0 %v3220_v6  ;;  %373 = vmatpush.msra.mxu1 %v3223_v7  ;;  %v3245_v13 = vld [vmem:[%s3187_s19 + $0x1d8] sm:$0xff]  ;;  %v3250_v14 = vld [vmem:[%s3187_s19 + $0xc0] sm:$0xff]  ;;  %v3258_v16 = vld [vmem:[%s3187_s19 + $0xc8] sm:$0xff]  ;;  %s2368_s7 = scalar_lea.hbm %s5043_s3, %s2669_s8  ;;  %s2968_s11 = scalar_lea.hbm %s5043_s3, 12 }
  0x61   : > { %393 = vmatpush.msra.mxu2 %v3228_v8  ;;  %413 = vmatpush.msra.mxu3 %v3231_v9  ;;  %v3253_v15 = vld [vmem:[%s3187_s19 + $0x1c0] sm:$0xff]  ;;  %v3261_v17 = vld [vmem:[%s3187_s19 + $0x1c8] sm:$0xff]  ;;  %v3266_v18 = vld [vmem:[%s3187_s19 + $0xb0] sm:$0xff]  ;;  %s2371_s28 = sshll.u32 %s2368_s7, 4  ;;  %s2372_s28 = int_to_ptr.hbm [resolvable:$true] %s2371_s28 }
  0x62   : > { %354 = vmatpush.msra.mxu0 %v3234_v10  ;;  %374 = vmatpush.msra.mxu1 %v3239_v11  ;;  %v3269_v19 = vld [vmem:[%s3187_s19 + $0x1b0] sm:$0xff]  ;;  %v3274_v20 = vld [vmem:[%s3187_s19 + $0xb8] sm:$0xff]  ;;  %v3282_v22 = vld [vmem:[%s3187_s19 + $0xa0] sm:$0xff]  ;;  %s2962_s29 = sshra.s32 %s2372_s28, 4  ;;  %s2963_s29 = int_to_ptr.hbm [resolvable:$true] %s2962_s29 }
  0x63   : > { %394 = vmatpush.msra.mxu2 %v3242_v12  ;;  %414 = vmatpush.msra.mxu3 %v3245_v13  ;;  %v3277_v21 = vld [vmem:[%s3187_s19 + $0x1b8] sm:$0xff]  ;;  %v3285_v23 = vld [vmem:[%s3187_s19 + $0x1a0] sm:$0xff]  ;;  %v3290_v24 = vld [vmem:[%s3187_s19 + $0xa8] sm:$0xff]  ;;  %s2964_s4 = scalar_lea.hbm %s2963_s29, 6  ;;  %p2969_p3 = scmp.lt.s32.totalorder %s2963_s29, %s5043_s3 }
  0x64   : > { %355 = vmatpush.msra.mxu0 %v3250_v14  ;;  %375 = vmatpush.msra.mxu1 %v3253_v15  ;;  %v3293_v25 = vld [vmem:[%s3187_s19 + $0x1a8] sm:$0xff]  ;;  %v3298_v26 = vld [vmem:[%s3187_s19 + $0x90] sm:$0xff]  ;;  %v3306_v28 = vld [vmem:[%s3187_s19 + $0x98] sm:$0xff]  ;;  %p2965_p6 = scmp.ne.s32.totalorder %s2963_s29, %s2964_s4  ;;  %p2970_p4 = scmp.lt.s32.totalorder %s2968_s11, %s2964_s4 }
  0x65   : > { %395 = vmatpush.msra.mxu2 %v3258_v16  ;;  %415 = vmatpush.msra.mxu3 %v3261_v17  ;;  %v3301_v27 = vld [vmem:[%s3187_s19 + $0x190] sm:$0xff]  ;;  %v3309_v29 = vld [vmem:[%s3187_s19 + $0x198] sm:$0xff]  ;;  %v3315_v30 = vld [vmem:[%s3187_s19 + $0x80] sm:$0xff] }
  0x66   : > { %356 = vmatpush.msra.mxu0 %v3266_v18  ;;  %376 = vmatpush.msra.mxu1 %v3269_v19  ;;  %v3318_v31 = vld [vmem:[%s3187_s19 + $0x180] sm:$0xff]  ;;  %v3323_v32 = vld [vmem:[%s3187_s19 + $0x88] sm:$0xff]  ;;  %v3331_v34 = vld [vmem:[%s3187_s19 + $0x70] sm:$0xff]  ;;  %p2966_p13 = pnand %p2965_p6, %p3101_p11  ;;  %p2971_p0 = por %p2970_p4, %p2969_p3 }
  0x67   : > { %396 = vmatpush.msra.mxu2 %v3274_v20  ;;  %416 = vmatpush.msra.mxu3 %v3277_v21  ;;  %v3326_v33 = vld [vmem:[%s3187_s19 + $0x188] sm:$0xff]  ;;  %v3334_v35 = vld [vmem:[%s3187_s19 + $0x170] sm:$0xff]  ;;  %v3339_v36 = vld [vmem:[%s3187_s19 + $0x78] sm:$0xff] }
  0x68   : > { %357 = vmatpush.msra.mxu0 %v3282_v22  ;;  %377 = vmatpush.msra.mxu1 %v3285_v23  ;;  %v3342_v37 = vld [vmem:[%s3187_s19 + $0x178] sm:$0xff]  ;;  %v3347_v38 = vld [vmem:[%s3187_s19 + $0x60] sm:$0xff]  ;;  %v3355_v40 = vld [vmem:[%s3187_s19 + $0x68] sm:$0xff]  ;;  %p2967_p2 = pneg %p2966_p13 }
  0x69   : > { %397 = vmatpush.msra.mxu2 %v3290_v24  ;;  %417 = vmatpush.msra.mxu3 %v3293_v25  ;;  %v3350_v39 = vld [vmem:[%s3187_s19 + $0x160] sm:$0xff]  ;;  %v3358_v41 = vld [vmem:[%s3187_s19 + $0x168] sm:$0xff]  ;;  %v3368_v43 = vld [vmem:[%s3187_s19 + $0x50] sm:$0xff] }
  0x6a   : > { %358 = vmatpush.msra.mxu0 %v3298_v26  ;;  %378 = vmatpush.msra.mxu1 %v3301_v27  ;;  %5186 = vst [vmem:[#allocation16_spill] sm:$0xff] %v3358_v41  ;;  %v3365_v42 = vld [vmem:[%s3362_s1] sm:$0xff]  ;;  %v3376_v45 = vld [vmem:[%s3187_s19 + $0x58] sm:$0xff]  ;;  %v3384_v47 = vld [vmem:[%s3187_s19 + $0x40] sm:$0xff]  ;;  %p2972_p5 = pnand %p2971_p0, %p2967_p2 }
  0x6b   : > { %398 = vmatpush.msra.mxu2 %v3306_v28  ;;  %418 = vmatpush.msra.mxu3 %v3309_v29  ;;  %v3373_v44 = vld [vmem:[%s3187_s19 + $0x150] sm:$0xff]  ;;  %v3381_v46 = vld [vmem:[%s3187_s19 + $0x158] sm:$0xff]  ;;  %v3389_v48 = vld [vmem:[%s3187_s19 + $0x140] sm:$0xff] }
  0x6c   : > { %359 = vmatpush.msra.mxu0 %v3315_v30  ;;  %379 = vmatpush.msra.mxu1 %v3318_v31  ;;  %5187 = vst [vmem:[#allocation17_spill] sm:$0xff] %v3381_v46  ;;  %v3392_v49 = vld [vmem:[%s3187_s19 + $0x48] sm:$0xff]  ;;  %v3400_v51 = vld [vmem:[%s3187_s19 + $0x30] sm:$0xff]  ;;  %v3408_v53 = vld [vmem:[%s3187_s19 + $0x38] sm:$0xff] }
  0x6d   : > { %399 = vmatpush.msra.mxu2 %v3323_v32  ;;  %419 = vmatpush.msra.mxu3 %v3326_v33  ;;  %v3397_v50 = vld [vmem:[%s3187_s19 + $0x148] sm:$0xff]  ;;  %v3405_v52 = vld [vmem:[%s3187_s19 + $0x130] sm:$0xff]  ;;  %5190 = vst [vmem:[#allocation20_spill] sm:$0xff] %v3408_v53  ;;  %v3413_v54 = vld [vmem:[%s3187_s19 + $0x138] sm:$0xff] }
  0x6e   : > { %360 = vmatpush.msra.mxu0 %v3331_v34  ;;  %380 = vmatpush.msra.mxu1 %v3334_v35  ;;  %5188 = vst [vmem:[#allocation18_spill] sm:$0xff] %v3397_v50  ;;  %v3416_v55 = vld [vmem:[%s3187_s19 + $0x20] sm:$0xff]  ;;  %v3424_v57 = vld [vmem:[%s3187_s19 + $0x28] sm:$0xff]  ;;  %v3434_v59 = vld [vmem:[%s3187_s19 + $0x10] sm:$0xff] }
  0x6f   : > { %400 = vmatpush.msra.mxu2 %v3339_v36  ;;  %420 = vmatpush.msra.mxu3 %v3342_v37  ;;  %5189 = vst [vmem:[#allocation19_spill] sm:$0xff] %v3405_v52  ;;  %v3421_v56 = vld [vmem:[%s3187_s19 + $0x120] sm:$0xff]  ;;  %v3429_v58 = vld [vmem:[%s3187_s19 + $0x128] sm:$0xff]  ;;  %v3437_v60 = vld [vmem:[%s3187_s19 + $0x110] sm:$0xff] }
  0x70   : > { %361 = vmatpush.msra.mxu0 %v3347_v38  ;;  %381 = vmatpush.msra.mxu1 %v3350_v39  ;;  %5191 = vst [vmem:[#allocation21_spill] sm:$0xff] %v3413_v54  ;;  %v342_v61 = vld [vmem:[%s3197_s6] sm:$0x3]  ;;  %v3443_v62 = vld [vmem:[%s3187_s19 + $0x18] sm:$0xff] }
  0x71   : > { %401 = vmatpush.msra.mxu2 %v3355_v40  ;;  %421 = vmatpush.msra.mxu3 %v3358_v41  ;;  %5192 = vst [vmem:[#allocation22_spill] sm:$0xff] %v3421_v56  ;;  %v3446_v63 = vld [vmem:[%s3187_s19 + $0x118] sm:$0xff] }
  0x72   : > { %495 = vperm.xlu1 %2783, %v3365_v42   ;;  %362 = vmatpush.msra.mxu0 %v3368_v43  ;;  %5193 = vst [vmem:[#allocation23_spill] sm:$0xff] %v3424_v57  ;;  %v3451_v0 = vld [vmem:[%s3362_s1 + $0x8] sm:$0xff] }
  0x73   : > { %382 = vmatpush.msra.mxu1 %v3373_v44  ;;  %402 = vmatpush.msra.mxu2 %v3376_v45  ;;  %5194 = vst [vmem:[#allocation24_spill] sm:$0xff] %v3429_v58 }
  0x74   : > { %422 = vmatpush.msra.mxu3 %v3381_v46  ;;  %363 = vmatpush.msra.mxu0 %v3384_v47  ;;  %5195 = vst [vmem:[#allocation25_spill] sm:$0xff] %v3443_v62 }
  0x75   : > { %383 = vmatpush.msra.mxu1 %v3389_v48  ;;  %403 = vmatpush.msra.mxu2 %v3392_v49  ;;  %5196 = vst [vmem:[#allocation26_spill] sm:$0xff] %v3446_v63 }
  0x76   : > { %423 = vmatpush.msra.mxu3 %v3397_v50  ;;  %364 = vmatpush.msra.mxu0 %v3400_v51  ;;  %v3464_v50 = vperm.slane %v342_v61, 0 }
  0x77   : > { %384 = vmatpush.msra.mxu1 %v3405_v52  ;;  %404 = vmatpush.msra.mxu2 %v3408_v53  ;;  %v3459_v52 = vld [vmem:[%s3187_s19 + $0x100] sm:$0xff] }
  0x78   : > { %424 = vmatpush.msra.mxu3 %v3413_v54  ;;  %365 = vmatpush.msra.mxu0 %v3416_v55  ;;  %v3454_v54 = vld [vmem:[%s3187_s19] sm:$0xff] }
  0x79   : > { %385 = vmatpush.msra.mxu1 %v3421_v56  ;;  %405 = vmatpush.msra.mxu2 %v3424_v57  ;;  %v3462_v56 = vld [vmem:[%s3187_s19 + $0x8] sm:$0xff] }
  0x7a   : > { %425 = vmatpush.msra.mxu3 %v3429_v58  ;;  %2784 = vset.pattern.permute.xlu1 %v5055_v1  ;;  %v3469_v1 = vld [vmem:[%s3187_s19 + $0x108] sm:$0xff]  ;;  %v3471_v58 = vperm.slane %v342_v61, 1  ;;  %v3484_v61 = vld [vmem:[%s3362_s1 + $0x10] sm:$0xff] }
  0x7b   : > { %366 = vmatpush.msra.mxu0 %v3434_v59  ;;  %386 = vmatpush.msra.mxu1 %v3437_v60  ;;  %5197 = vst [vmem:[#allocation27_spill] sm:$0xff] %v3469_v1 }
  0x7c   : > { %406 = vmatpush.msra.mxu2 %v3443_v62  ;;  %426 = vmatpush.msra.mxu3 %v3446_v63  ;;  %v5063_v63 = vmov 65  }
  0x7d   : > { %439 = vperm.xlu1 %2784, %v3451_v0   ;;  %367 = vmatpush.msra.mxu0 %v3454_v54 }
  0x7e   : > { %387 = vmatpush.msra.mxu1 %v3459_v52  ;;  %407 = vmatpush.msra.mxu2 %v3462_v56 }
  0x7f   : > { %427 = vmatpush.msra.mxu3 %v3469_v1  ;;  %368 = vmatmul.f32.vlgmr.msra.gmra.mxu0 %v3464_v50 }
  0x80   : > { %388 = vmatmul.f32.vlgmr.msra.gmra.mxu1 %v3471_v58  ;;  %408 = vmatmul.f32.vlgmr.msra.gmra.mxu2 %v3464_v50 }
  0x81   : > { %428 = vmatmul.f32.vlgmr.msra.gmra.mxu3 %v3471_v58  ;;  %434 = vperm.xlu0 %2781, %v3365_v42  }
  0x82   : > { %2785 = vset.pattern.permute.xlu2 %v5063_v63  ;;  %542 = vmatpush.msrb.mxu0 %v3206_v2 }
  0x83   : > { %465 = vperm.xlu2 %2785, %v3451_v0   ;;  %600 = vmatpush.msrb.mxu2 %v3212_v4  ;;  %v3503_v4 = vld [vmem:[%s3362_s1 + $0x18] sm:$0xff] }
  0x84   : > { %543 = vmatpush.msrb.mxu0 %v3220_v6  ;;  %571 = vmatpush.msrb.mxu1 %v3209_v3 }
  0x85   : > { %444 = vperm.xlu1 %2784, %v3484_v61   ;;  %601 = vmatpush.msrb.mxu2 %v3228_v8  ;;  %v5198_v8 = vmov 68  }
  0x86   : > { %544 = vmatpush.msrb.mxu0 %v3234_v10  ;;  %629 = vmatpush.msrb.mxu3 %v3217_v5 }
  0x87   : > { %602 = vmatpush.msrb.mxu2 %v3242_v12  ;;  %572 = vmatpush.msrb.mxu1 %v3223_v7 }
  0x88   : > { %545 = vmatpush.msrb.mxu0 %v3250_v14  ;;  %630 = vmatpush.msrb.mxu3 %v3231_v9 }
  0x89   : > { %2782 = vset.pattern.permute.xlu0 %v5063_v63  ;;  %603 = vmatpush.msrb.mxu2 %v3258_v16 }
  0x8a   : > { %461 = vperm.xlu0 %2782, %v3365_v42   ;;  %546 = vmatpush.msrb.mxu0 %v3266_v18 }
  0x8b   : > { %2786 = vset.pattern.permute.xlu2 %v5198_v8  ;;  %604 = vmatpush.msrb.mxu2 %v3274_v20 }
  0x8c   : > { %499 = vperm.xlu2 %2786, %v3451_v0   ;;  %547 = vmatpush.msrb.mxu0 %v3282_v22 }
  0x8d   : > { %449 = vperm.xlu1 %2784, %v3503_v4   ;;  %573 = vmatpush.msrb.mxu1 %v3239_v11 }
  0x8e   : > { %605 = vmatpush.msrb.mxu2 %v3290_v24  ;;  %631 = vmatpush.msrb.mxu3 %v3245_v13 }
  0x8f   : > { %548 = vmatpush.msrb.mxu0 %v3298_v26  ;;  %574 = vmatpush.msrb.mxu1 %v3253_v15 }
  0x90   : > { %606 = vmatpush.msrb.mxu2 %v3306_v28  ;;  %632 = vmatpush.msrb.mxu3 %v3261_v17 }
  0x91   : > { %549 = vmatpush.msrb.mxu0 %v3315_v30  ;;  %575 = vmatpush.msrb.mxu1 %v3269_v19 }
  0x92   : > { %2788 = vset.pattern.permute.xlu0 %v5198_v8  ;;  %607 = vmatpush.msrb.mxu2 %v3323_v32 }
  0x93   : > { %503 = vperm.xlu0 %2788, %v3484_v61   ;;  %633 = vmatpush.msrb.mxu3 %v3277_v21 }
  0x94   : > { %2787 = vset.pattern.permute.xlu2 %v5063_v63  ;;  %550 = vmatpush.msrb.mxu0 %v3331_v34  ;;  %v5199_v63 = vld [vmem:[#allocation18_spill] sm:$0xff] }
  0x95   : > { %2789 = vset.pattern.permute.xlu1 %v5198_v8  ;;  %469 = vperm.xlu2 %2787, %v3484_v61  }
  0x96   : > { %507 = vperm.xlu1 %2789, %v3503_v4   ;;  %576 = vmatpush.msrb.mxu1 %v3285_v23 }
  0x97   : > { %608 = vmatpush.msrb.mxu2 %v3339_v36  ;;  %634 = vmatpush.msrb.mxu3 %v3293_v25 }
  0x98   : > { %551 = vmatpush.msrb.mxu0 %v3347_v38  ;;  %577 = vmatpush.msrb.mxu1 %v3301_v27 }
  0x99   : > { %609 = vmatpush.msrb.mxu2 %v3355_v40  ;;  %635 = vmatpush.msrb.mxu3 %v3309_v29 }
  0x9a   : > { %552 = vmatpush.msrb.mxu0 %v3368_v43  ;;  %578 = vmatpush.msrb.mxu1 %v3318_v31 }
  0x9b   : > { %610 = vmatpush.msrb.mxu2 %v3376_v45  ;;  %636 = vmatpush.msrb.mxu3 %v3326_v33 }
  0x9c   : > { %553 = vmatpush.msrb.mxu0 %v3384_v47  ;;  %579 = vmatpush.msrb.mxu1 %v3334_v35 }
  0x9d   : > { %473 = vperm.xlu2 %2787, %v3503_v4   ;;  %611 = vmatpush.msrb.mxu2 %v3392_v49 }
  0x9e   : > { %637 = vmatpush.msrb.mxu3 %v3342_v37  ;;  %554 = vmatpush.msrb.mxu0 %v3400_v51 }
  0x9f   : > { %580 = vmatpush.msrb.mxu1 %v3350_v39  ;;  %612 = vmatpush.msrb.mxu2 %v3408_v53  ;;  %v5200_v53 = vld [vmem:[#allocation19_spill] sm:$0xff] }
  0xa0   : > { %638 = vmatpush.msrb.mxu3 %v3358_v41  ;;  %555 = vmatpush.msrb.mxu0 %v3416_v55  ;;  %v5201_v41 = vld [vmem:[#allocation21_spill] sm:$0xff] }
  0xa1   : > { %581 = vmatpush.msrb.mxu1 %v3373_v44  ;;  %613 = vmatpush.msrb.mxu2 %v3424_v57  ;;  %v5202_v57 = vld [vmem:[#allocation22_spill] sm:$0xff] }
  0xa2   : > { %639 = vmatpush.msrb.mxu3 %v3381_v46  ;;  %556 = vmatpush.msrb.mxu0 %v3434_v59  ;;  %v5203_v46 = vld [vmem:[#allocation24_spill] sm:$0xff] }
  0xa3   : > { %582 = vmatpush.msrb.mxu1 %v3389_v48  ;;  %614 = vmatpush.msrb.mxu2 %v3443_v62  ;;  %v5204_v62 = vld [vmem:[#allocation26_spill] sm:$0xff] }
  0xa4   : > { %640 = vmatpush.msrb.mxu3 %v5199_v63  ;;  %557 = vmatpush.msrb.mxu0 %v3454_v54 }
  0xa5   : > { %583 = vmatpush.msrb.mxu1 %v5200_v53  ;;  %615 = vmatpush.msrb.mxu2 %v3462_v56 }
  0xa6   : > { %641 = vmatpush.msrb.mxu3 %v5201_v41 }
  0xa7   : > { %765 = vmatpush.msra.mxu2 %v3206_v2  ;;  %584 = vmatpush.msrb.mxu1 %v5202_v57 }
  0xa8   : > { %642 = vmatpush.msrb.mxu3 %v5203_v46 }
  0xa9   : > { %766 = vmatpush.msra.mxu2 %v3220_v6  ;;  %585 = vmatpush.msrb.mxu1 %v3437_v60 }
  0xaa   : > { %643 = vmatpush.msrb.mxu3 %v5204_v62 }
  0xab   : > { %767 = vmatpush.msra.mxu2 %v3234_v10  ;;  %586 = vmatpush.msrb.mxu1 %v3459_v52 }
  0xac   : > { %644 = vmatpush.msrb.mxu3 %v3469_v1  ;;  %v5081_v1 = vmov 66  }
  0xad   : > { %768 = vmatpush.msra.mxu2 %v3250_v14 }
  0xae   : > { %794 = vmatpush.msra.mxu3 %v3209_v3 }
  0xaf   : > { %769 = vmatpush.msra.mxu2 %v3266_v18 }
  0xb0   : > { %795 = vmatpush.msra.mxu3 %v3223_v7 }
  0xb1   : > { %770 = vmatpush.msra.mxu2 %v3282_v22 }
  0xb2   : > { %796 = vmatpush.msra.mxu3 %v3239_v11 }
  0xb3   : > { %771 = vmatpush.msra.mxu2 %v3298_v26 }
  0xb4   : > { %797 = vmatpush.msra.mxu3 %v3253_v15 }
  0xb5   : > { %772 = vmatpush.msra.mxu2 %v3315_v30 }
  0xb6   : > { %798 = vmatpush.msra.mxu3 %v3269_v19 }
  0xb7   : > { %773 = vmatpush.msra.mxu2 %v3331_v34 }
  0xb8   : > { %799 = vmatpush.msra.mxu3 %v3285_v23 }
  0xb9   : > { %774 = vmatpush.msra.mxu2 %v3347_v38 }
  0xba   : > { %800 = vmatpush.msra.mxu3 %v3301_v27 }
  0xbb   : > { %775 = vmatpush.msra.mxu2 %v3368_v43 }
  0xbc   : > { %801 = vmatpush.msra.mxu3 %v3318_v31 }
  0xbd   : > { %776 = vmatpush.msra.mxu2 %v3384_v47 }
  0xbe   : > { %802 = vmatpush.msra.mxu3 %v3334_v35 }
  0xbf   : > { %777 = vmatpush.msra.mxu2 %v3400_v51 }
  0xc0   : > { %803 = vmatpush.msra.mxu3 %v3350_v39 }
  0xc1   : > { %778 = vmatpush.msra.mxu2 %v3416_v55 }
  0xc2   : > { %804 = vmatpush.msra.mxu3 %v3373_v44 }
  0xc3   : > { %779 = vmatpush.msra.mxu2 %v3434_v59 }
  0xc4   : > { %805 = vmatpush.msra.mxu3 %v3389_v48 }
  0xc5   : > { %780 = vmatpush.msra.mxu2 %v3454_v54 }
  0xc6   : > { %806 = vmatpush.msra.mxu3 %v5200_v53 }
  0xc8   : > { %807 = vmatpush.msra.mxu3 %v5202_v57 }
  0xca   : > { %808 = vmatpush.msra.mxu3 %v3437_v60 }
  0xcc   : > { %809 = vmatpush.msra.mxu3 %v3459_v52 }
  0xdd   : > { %v466_v3 = vpop.permute.xlu2 %465 }
  0xe4   : > { %v496_v2 = vpop.permute.xlu1 %495 }
  0xe6   : > { %v500_v10 = vpop.permute.xlu2 %499 }
  0xef   : > { %v440_v7 = vpop.permute.xlu1 %439  ;;  %v470_v38 = vpop.permute.xlu2 %469 }
  0xf0   : > { %v454_v22 = vmul.f32 %v440_v7, %v3464_v50  ;;  %v455_v51 = vmul.f32 %v440_v7, %v3471_v58 }
  0xf3   : > { %v435_v6 = vpop.permute.xlu0 %434 }
  0xf4   : > { %v452_v23 = vmul.f32 %v435_v6, %v3464_v50  ;;  %v453_v53 = vmul.f32 %v435_v6, %v3471_v58 }
  0xf7   : > { %v445_v30 = vpop.permute.xlu1 %444  ;;  %v474_v6 = vpop.permute.xlu2 %473 }
  0xf8   : > { %v456_v52 = vmul.f32 %v445_v30, %v3464_v50 }
  0xfc   : > { %v369_v11 = vpop.f32.mrf.mxu0  ;;  %v462_v18 = vpop.permute.xlu0 %461 }
  0xfd   : > { %v389_v14 = vpop.f32.mrf.mxu1 }
  0xfe   : > { %v390_v15 = vadd.f32 %v389_v14, %v369_v11 }
  0xff   : > { %v450_v14 = vpop.permute.xlu1 %449 }
 0x100   : > { %v476_v19 = vperm.slane %v390_v15, 0 }
 0x102   : > { %v478_v26 = vmul.f32 %v476_v19, %v462_v18  ;;  %v480_v27 = vmul.f32 %v476_v19, %v466_v3  ;;  %v482_v55 = vmul.f32 %v476_v19, %v470_v38 }
 0x103   : > { %v409_v31 = vpop.f32.mrf.mxu2 }
 0x104   : > { %v486_v34 = vadd.f32 %v478_v26, %v452_v23  ;;  %v429_v35 = vpop.f32.mrf.mxu3  ;;  %v488_v44 = vadd.f32 %v480_v27, %v454_v22  ;;  %v5074_v23 = vmov 69   ;;  %v490_v7 = vadd.f32 %v482_v55, %v456_v52 }
 0x105   : > { %v430_v39 = vadd.f32 %v429_v35, %v409_v31  ;;  %2792 = vset.pattern.permute.xlu1 %v5074_v23  ;;  %2790 = vset.pattern.permute.xlu2 %v5074_v23  ;;  %v458_v27 = vmul.f32 %v450_v14, %v3464_v50  ;;  %v459_v52 = vmul.f32 %v450_v14, %v3471_v58 }
 0x106   : > { %v510_v43 = vadd.f32 %v496_v2, %v486_v34  ;;  %v512_v59 = vadd.f32 %v500_v10, %v488_v44  ;;  %667 = vperm.xlu1 %2792, %v3484_v61   ;;  %659 = vperm.xlu2 %2790, %v3365_v42  }
 0x107   : > { %v477_v47 = vperm.slane %v430_v39, 0  ;;  %2791 = vset.pattern.permute.xlu0 %v5074_v23  ;;  %v484_v39 = vmul.f32 %v476_v19, %v474_v6 }
 0x108   : > { %vm518_vm0 = vcmp.ge.f32.partialorder %v510_v43, 0.0  ;;  %v526_v48 = vmul.f32 0.01, %v510_v43  ;;  %v528_v26 = vmul.f32 0.01, %v512_v59  ;;  %vm520_vm2 = vcmp.ge.f32.partialorder %v512_v59, 0.0  ;;  %663 = vperm.xlu0 %2791, %v3451_v0   ;;  %v508_v19 = vpop.permute.xlu1 %507 }
 0x109   : > { %v479_v54 = vmul.f32 %v477_v47, %v462_v18  ;;  %v481_v60 = vmul.f32 %v477_v47, %v466_v3  ;;  %v504_v18 = vpop.permute.xlu0 %503  ;;  %v483_v31 = vmul.f32 %v477_v47, %v470_v38  ;;  %v492_v38 = vadd.f32 %v484_v39, %v458_v27  ;;  %v3690_v27 = vld [vmem:[%s3362_s1 + $0x40] sm:$0xff] }
 0x10a   : > { %v3605_v57 = vsel %vm518_vm0, %v510_v43, %v526_v48  ;;  %v514_v43 = vadd.f32 %v504_v18, %v490_v7  ;;  %v3621_v44 = vsel %vm520_vm2, %v512_v59, %v528_v26  ;;  %5210 = vst [vmem:[#allocation22_spill] sm:$0xff] %v3690_v27 }
 0x10b   : > { %558 = vmatmul.f32.vlgmr.msrb.gmra.mxu0 %v3605_v57  ;;  %616 = vmatmul.f32.vlgmr.msrb.gmra.mxu2 %v3605_v57  ;;  %v487_v11 = vadd.f32 %v479_v54, %v453_v53  ;;  %v489_v22 = vadd.f32 %v481_v60, %v455_v51  ;;  %v485_v53 = vmul.f32 %v477_v47, %v474_v6  ;;  %v3658_v6 = vld [vmem:[%s3362_s1 + $0x30] sm:$0xff] }
 0x10c   : > { %v530_v51 = vmul.f32 0.01, %v514_v43  ;;  %vm522_vm4 = vcmp.ge.f32.partialorder %v514_v43, 0.0  ;;  %v516_v59 = vadd.f32 %v508_v19, %v492_v38  ;;  %5208 = vst [vmem:[#allocation19_spill] sm:$0xff] %v3658_v6 }
 0x10d   : > { %v511_v15 = vadd.f32 %v496_v2, %v487_v11  ;;  %v457_v2 = vmul.f32 %v445_v30, %v3471_v58  ;;  %v513_v35 = vadd.f32 %v500_v10, %v489_v22  ;;  %v3626_v30 = vld [vmem:[%s3362_s1 + $0x20] sm:$0xff]  ;;  %v5206_v10 = vmov 64   ;;  %v3643_v11 = vld [vmem:[%s3362_s1 + $0x28] sm:$0xff] }
 0x10e   : > { %5205 = vst [vmem:[#allocation18_spill] sm:$0xff] %v3626_v30  ;;  %2793 = vset.pattern.permute.xlu1 %v5206_v10  ;;  %671 = vperm.xlu2 %2790, %v3503_v4   ;;  %v3638_v60 = vsel %vm522_vm4, %v514_v43, %v530_v51  ;;  %v493_v58 = vadd.f32 %v485_v53, %v459_v52  ;;  %v532_v14 = vmul.f32 0.01, %v516_v59  ;;  %vm524_vm6 = vcmp.ge.f32.partialorder %v516_v59, 0.0 }
 0x10f   : > { %vm519_vm1 = vcmp.ge.f32.partialorder %v511_v15, 0.0  ;;  %v527_v3 = vmul.f32 0.01, %v511_v15  ;;  %v491_v48 = vadd.f32 %v483_v31, %v457_v2  ;;  %v529_v50 = vmul.f32 0.01, %v513_v35  ;;  %1131 = vperm.xlu1 %2793, %v3626_v30   ;;  %v3675_v2 = vld [vmem:[%s3362_s1 + $0x38] sm:$0xff] }
 0x110   : > { %vm521_vm3 = vcmp.ge.f32.partialorder %v513_v35, 0.0  ;;  %2795 = vset.pattern.permute.xlu0 %v5198_v8  ;;  %v517_v22 = vadd.f32 %v508_v19, %v493_v58  ;;  %v3653_v26 = vsel %vm524_vm6, %v516_v59, %v532_v14  ;;  %5209 = vst [vmem:[#allocation21_spill] sm:$0xff] %v3675_v2  ;;  %v3696_v31 = vld [vmem:[%s3362_s1 + $0x48] sm:$0xff]  ;;  %v5070_v53 = vmov 67  }
 0x111   : > { %v3617_v34 = vsel %vm519_vm1, %v511_v15, %v527_v3  ;;  %v515_v54 = vadd.f32 %v504_v18, %v491_v48  ;;  %v3633_v55 = vsel %vm521_vm3, %v513_v35, %v529_v50  ;;  %1192 = vperm.xlu0 %2795, %v3626_v30   ;;  %v5207_v15 = vmov 65   ;;  %v3699_v35 = vld [vmem:[%s3362_s1 + $0x50] sm:$0xff]  ;;  %v3709_v50 = vld [vmem:[%s3362_s1 + $0x58] sm:$0xff] }
 0x112   : > { %587 = vmatmul.f32.vlgmr.msrb.gmra.mxu1 %v3617_v34  ;;  %645 = vmatmul.f32.vlgmr.msrb.gmra.mxu3 %v3617_v34  ;;  %v533_v18 = vmul.f32 0.01, %v517_v22  ;;  %vm525_vm7 = vcmp.ge.f32.partialorder %v517_v22, 0.0  ;;  %5211 = vst [vmem:[#allocation24_spill] sm:$0xff] %v3699_v35  ;;  %vm964_vm3 = vcmask 1040384  }
 0x113   : > { %561 = vmatmul.f32.gmra.mxu0 %v3621_v44  ;;  %619 = vmatmul.f32.gmra.mxu2 %v3621_v44  ;;  %v531_v47 = vmul.f32 0.01, %v515_v54  ;;  %vm523_vm5 = vcmp.ge.f32.partialorder %v515_v54, 0.0  ;;  %5212 = vst [vmem:[#allocation26_spill] sm:$0xff] %v3709_v50 }
 0x114   : > { %v3664_v3 = vsel %vm525_vm7, %v517_v22, %v533_v18 }
 0x115   : > { %v3648_v7 = vsel %vm523_vm5, %v515_v54, %v531_v47 }
 0x116   : > { %2794 = vset.pattern.permute.xlu2 %v5207_v15 }
 0x117   : > { %1136 = vperm.xlu1 %2793, %v3643_v11   ;;  %1158 = vperm.xlu2 %2794, %v3626_v30  }
 0x119   : > { %2798 = vset.pattern.permute.xlu0 %v5207_v15 }
 0x11a   : > { %590 = vmatmul.f32.gmra.mxu1 %v3633_v55  ;;  %648 = vmatmul.f32.gmra.mxu3 %v3633_v55 }
 0x11b   : > { %564 = vmatmul.f32.gmra.mxu0 %v3638_v60  ;;  %622 = vmatmul.f32.gmra.mxu2 %v3638_v60 }
 0x11c   : > { %1166 = vperm.xlu0 %2798, %v3658_v6  }
 0x11f   : > { %2796 = vset.pattern.permute.xlu1 %v5198_v8  ;;  %1162 = vperm.xlu2 %2794, %v3643_v11  }
 0x120   : > { %1196 = vperm.xlu1 %2796, %v3643_v11  }
 0x122   : > { %593 = vmatmul.f32.gmra.mxu1 %v3648_v7  ;;  %651 = vmatmul.f32.gmra.mxu3 %v3648_v7 }
 0x123   : > { %567 = vmatmul.f32.gmra.mxu0 %v3653_v26  ;;  %625 = vmatmul.f32.gmra.mxu2 %v3653_v26 }
 0x124   : > { %2801 = vset.pattern.permute.xlu0 %v5074_v23 }
 0x125   : > { %1356 = vperm.xlu0 %2801, %v3626_v30  }
 0x127   : > { %2797 = vset.pattern.permute.xlu2 %v5206_v10 }
 0x128   : > { %1200 = vperm.xlu1 %2796, %v3658_v6   ;;  %1141 = vperm.xlu2 %2797, %v3658_v6  }
 0x12a   : > { %596 = vmatmul.f32.gmra.mxu1 %v3664_v3  ;;  %654 = vmatmul.f32.gmra.mxu3 %v3664_v3 }
 0x12d   : > { %2805 = vset.pattern.permute.xlu0 %v5207_v15 }
 0x12e   : > { %1850 = vperm.xlu0 %2805, %v3690_v27  }
 0x130   : > { %2799 = vset.pattern.permute.xlu1 %v5207_v15  ;;  %1146 = vperm.xlu2 %2797, %v3675_v2  }
 0x131   : > { %1170 = vperm.xlu1 %2799, %v3675_v2  }
 0x136   : > { %2809 = vset.pattern.permute.xlu0 %v5206_v10 }
 0x137   : > { %1833 = vperm.xlu0 %2809, %v3699_v35  }
 0x138   : > { %2800 = vset.pattern.permute.xlu2 %v5198_v8 }
 0x139   : > { %2802 = vset.pattern.permute.xlu1 %v5074_v23  ;;  %1204 = vperm.xlu2 %2800, %v3675_v2  }
 0x13a   : > { %1360 = vperm.xlu1 %2802, %v3643_v11  }
 0x13f   : > { %2812 = vset.pattern.permute.xlu0 %v5198_v8 }
 0x140   : > { %1896 = vperm.xlu0 %2812, %v3709_v50  }
 0x141   : > { %2803 = vset.pattern.permute.xlu2 %v5074_v23 }
 0x142   : > { %1368 = vperm.xlu1 %2802, %v3675_v2   ;;  %1364 = vperm.xlu2 %2803, %v3658_v6  }
 0x148   : > { %2818 = vset.pattern.permute.xlu0 %v5070_v53 }
 0x149   : > { %910 = vperm.xlu0 %2818, %v3451_v0  }
 0x14a   : > { %2806 = vset.pattern.permute.xlu1 %v5198_v8  ;;  %2804 = vset.pattern.permute.xlu2 %v5206_v10 }
 0x14b   : > { %1884 = vperm.xlu1 %2806, %v3690_v27   ;;  %1823 = vperm.xlu2 %2804, %v3690_v27  }
 0x151   : > { %1610 = vperm.xlu0 %2818, %v3658_v6  }
 0x153   : > { %2807 = vset.pattern.permute.xlu1 %v5207_v15  ;;  %1828 = vperm.xlu2 %2804, %v3696_v31  }
 0x154   : > { %1854 = vperm.xlu1 %2807, %v3696_v31  }
 0x159   : > { %2825 = vset.pattern.permute.xlu0 %v5081_v1 }
 0x15a   : > { %882 = vperm.xlu0 %2825, %v3365_v42  }
 0x15b   : > { %2808 = vset.pattern.permute.xlu2 %v5198_v8 }
 0x15c   : > { %1858 = vperm.xlu1 %2807, %v3699_v35   ;;  %1888 = vperm.xlu2 %2808, %v3696_v31  }
 0x162   : > { %1582 = vperm.xlu0 %2825, %v3643_v11  }
 0x164   : > { %2810 = vset.pattern.permute.xlu1 %v5206_v10  ;;  %1892 = vperm.xlu2 %2808, %v3699_v35  }
 0x165   : > { %1838 = vperm.xlu1 %2810, %v3709_v50  }
 0x16a   : > { %2278 = vperm.xlu0 %2825, %v3699_v35  }
 0x16c   : > { %2811 = vset.pattern.permute.xlu2 %v5207_v15  ;;  %v5213_v15 = vmov 69  }
 0x16d   : > { %2813 = vset.pattern.permute.xlu1 %v5074_v23  ;;  %1862 = vperm.xlu2 %2811, %v3709_v50  }
 0x16e   : > { %2048 = vperm.xlu1 %2813, %v3690_v27  }
 0x175   : > { %2814 = vset.pattern.permute.xlu2 %v5213_v15  ;;  %v3983_v15 = vld [vmem:[%s3187_s19 + $0x258] sm:$0xff] }
 0x176   : > { %2056 = vperm.xlu1 %2813, %v3699_v35   ;;  %2052 = vperm.xlu2 %2814, %v3696_v31   ;;  %v4038_v35 = vld [vmem:[%s3187_s19 + $0x228] sm:$0xff] }
 0x177   : > { %5237 = vst [vmem:[#allocation31_spill] sm:$0xff] %v4038_v35 }
 0x17e   : > { %2815 = vset.pattern.permute.xlu1 %v5081_v1  ;;  %2060 = vperm.xlu2 %2814, %v3709_v50  }
 0x17f   : > { %886 = vperm.xlu1 %2815, %v3451_v0  }
 0x186   : > { %2816 = vset.pattern.permute.xlu2 %v5081_v1 }
 0x187   : > { %894 = vperm.xlu1 %2815, %v3503_v4   ;;  %890 = vperm.xlu2 %2816, %v3484_v61  }
 0x188   : > { %v559_v39 = vpop.f32.mrf.mxu0 }
 0x18e   : > { %v617_v48 = vpop.f32.mrf.mxu2 }
 0x18f   : > { %v588_v43 = vpop.f32.mrf.mxu1 }
 0x190   : > { %v562_v38 = vpop.f32.mrf.mxu0  ;;  %v589_v27 = vadd.f32 %v588_v43, %v559_v39  ;;  %v3932_v39 = vld [vmem:[%s3187_s19 + $0x288] sm:$0xff]  ;;  %v3934_v43 = vpop.permute.xlu1 %667 }
 0x195   : > { %v646_v51 = vpop.f32.mrf.mxu3 }
 0x196   : > { %v620_v52 = vpop.f32.mrf.mxu2 }
 0x197   : > { %v591_v19 = vpop.f32.mrf.mxu1 }
 0x198   : > { %v565_v54 = vpop.f32.mrf.mxu0  ;;  %v592_v53 = vadd.f32 %v591_v19, %v562_v38  ;;  %v647_v19 = vadd.f32 %v646_v51, %v617_v48  ;;  %v3939_v48 = vld [vmem:[%s3187_s19 + $0x388] sm:$0xff]  ;;  %v3944_v51 = vld [vmem:[%s3187_s19 + $0x270] sm:$0xff] }
 0x19d   : > { %v649_v59 = vpop.f32.mrf.mxu3 }
 0x19e   : > { %v623_v8 = vpop.f32.mrf.mxu2  ;;  %v650_v38 = vadd.f32 %v649_v59, %v620_v52  ;;  %v3947_v52 = vld [vmem:[%s3187_s19 + $0x370] sm:$0xff]  ;;  %v3960_v59 = vld [vmem:[%s3187_s19 + $0x260] sm:$0xff] }
 0x19f   : > { %v594_v58 = vpop.f32.mrf.mxu1 }
 0x1a0   : > { %v568_v47 = vpop.f32.mrf.mxu0  ;;  %v595_v18 = vadd.f32 %v594_v58, %v565_v54  ;;  %v3955_v54 = vld [vmem:[%s3187_s19 + $0x378] sm:$0xff]  ;;  %v3963_v58 = vld [vmem:[%s3187_s19 + $0x360] sm:$0xff] }
 0x1a5   : > { %v652_v10 = vpop.f32.mrf.mxu3 }
 0x1a6   : > { %v626_v2 = vpop.f32.mrf.mxu2  ;;  %v653_v30 = vadd.f32 %v652_v10, %v623_v8  ;;  %v3966_v8 = vld [vmem:[%s3187_s19 + $0x268] sm:$0xff] }
 0x1a7   : > { %v597_v14 = vpop.f32.mrf.mxu1 }
 0x1a8   : > { %v598_v22 = vadd.f32 %v597_v14, %v568_v47  ;;  %v3971_v47 = vld [vmem:[%s3187_s19 + $0x368] sm:$0xff]  ;;  %v3974_v14 = vld [vmem:[%s3187_s19 + $0x250] sm:$0xff] }
 0x1aa   : > { %691 = vmatpush.msra.mxu0 %v598_v22  ;;  %v3977_v22 = vld [vmem:[%s3187_s19 + $0x350] sm:$0xff] }
 0x1ac   : > { %692 = vmatpush.msra.mxu0 %v595_v18 }
 0x1ad   : > { %v655_v23 = vpop.f32.mrf.mxu3 }
 0x1ae   : > { %v656_v6 = vadd.f32 %v655_v23, %v626_v2  ;;  %693 = vmatpush.msra.mxu0 %v592_v53  ;;  %v5214_v23 = vld [vmem:[#allocation14_spill] sm:$0xff] }
 0x1af   : > { %v3950_v53 = vld [vmem:[%s3187_s19 + $0x278] sm:$0xff]  ;;  %5225 = vst [vmem:[#allocation14_spill] sm:$0xff] %v3966_v8 }
 0x1b0   : > { %694 = vmatpush.msra.mxu0 %v589_v27  ;;  %720 = vmatpush.msra.mxu1 %v656_v6  ;;  %v3914_v6 = vld [vmem:[%s3187_s19 + $0x298] sm:$0xff]  ;;  %v3926_v27 = vld [vmem:[%s3187_s19 + $0x280] sm:$0xff] }
 0x1b2   : > { %695 = vmatpush.msra.mxu0 %v3653_v26  ;;  %721 = vmatpush.msra.mxu1 %v653_v30  ;;  %v3892_v30 = vld [vmem:[%s3187_s19 + $0x2a0] sm:$0xff]  ;;  %v3911_v26 = vld [vmem:[%s3187_s19 + $0x390] sm:$0xff] }
 0x1b4   : > { %696 = vmatpush.msra.mxu0 %v3638_v60  ;;  %722 = vmatpush.msra.mxu1 %v650_v38  ;;  %v3898_v60 = vld [vmem:[%s3187_s19 + $0x2a8] sm:$0xff]  ;;  %v3986_v38 = vld [vmem:[%s3187_s19 + $0x358] sm:$0xff] }
 0x1b6   : > { %697 = vmatpush.msra.mxu0 %v3621_v44  ;;  %723 = vmatpush.msra.mxu1 %v647_v19  ;;  %v5215_v44 = vld [vmem:[#allocation15_spill] sm:$0xff] }
 0x1b7   : > { %5226 = vst [vmem:[#allocation15_spill] sm:$0xff] %v3983_v15  ;;  %v3989_v19 = vld [vmem:[%s3187_s19 + $0x240] sm:$0xff] }
 0x1b8   : > { %698 = vmatpush.msra.mxu0 %v3605_v57  ;;  %724 = vmatpush.msra.mxu1 %v3664_v3  ;;  %v3882_v57 = vld [vmem:[%s3187_s19 + $0x2b8] sm:$0xff] }
 0x1b9   : > { %2497 = vmatmul.msk.f32.vlgmr.msra.gmra.mxu0 %vm674_vm8, %v3365_v42  ;;  %v3919_v3 = vld [vmem:[%s3187_s19 + $0x398] sm:$0xff] }
 0x1ba   : > { %725 = vmatpush.msra.mxu1 %v3648_v7  ;;  %823 = vmatpush.msrb.mxu0 %v5214_v23  ;;  %v3908_v7 = vld [vmem:[%s3187_s19 + $0x290] sm:$0xff]  ;;  %v3994_v23 = vld [vmem:[%s3187_s19 + $0x340] sm:$0xff] }
 0x1bc   : > { %726 = vmatpush.msra.mxu1 %v3633_v55  ;;  %824 = vmatpush.msrb.mxu0 %v5215_v44  ;;  %v3895_v55 = vld [vmem:[%s3187_s19 + $0x3a0] sm:$0xff]  ;;  %v3997_v44 = vld [vmem:[%s3187_s19 + $0x248] sm:$0xff] }
 0x1be   : > { %727 = vmatpush.msra.mxu1 %v3617_v34  ;;  %825 = vmatpush.msrb.mxu0 %v3242_v12  ;;  %v5219_v12 = vld [vmem:[#allocation23_spill] sm:$0xff]  ;;  %v3885_v34 = vld [vmem:[%s3187_s19 + $0x3b8] sm:$0xff] }
 0x1bf   : > { %2501 = vmatmul.msk.f32.vlgmr.msra.gmra.mxu1 %vm674_vm8, %v3365_v42 }
 0x1c0   : > { %826 = vmatpush.msrb.mxu0 %v3258_v16  ;;  %852 = vmatpush.msrb.mxu1 %v3217_v5  ;;  %v5216_v5 = vmov 67   ;;  %v5221_v16 = vld [vmem:[#allocation25_spill] sm:$0xff] }
 0x1c1   : > { %2498 = vmatmul.msk.f32.gmra.mxu0 %vm674_vm8, %v3451_v0  ;;  %2819 = vset.pattern.permute.xlu1 %v5216_v5 }
 0x1c2   : > { %827 = vmatpush.msrb.mxu0 %v3274_v20  ;;  %853 = vmatpush.msrb.mxu1 %v3231_v9  ;;  %v5218_v9 = vld [vmem:[#allocation16_spill] sm:$0xff]  ;;  %v5223_v20 = vld [vmem:[#allocation27_spill] sm:$0xff] }
 0x1c3   : > { %914 = vperm.xlu1 %2819, %v3484_v61   ;;  %2817 = vset.pattern.permute.xlu2 %v5216_v5  ;;  %5228 = vst [vmem:[#allocation16_spill] sm:$0xff] %v3997_v44 }
 0x1c4   : > { %828 = vmatpush.msrb.mxu0 %v3290_v24  ;;  %854 = vmatpush.msrb.mxu1 %v3245_v13  ;;  %v5220_v13 = vld [vmem:[#allocation17_spill] sm:$0xff] }
 0x1c5   : > { %906 = vperm.xlu2 %2817, %v3365_v42   ;;  %v3813_v24 = vld [vmem:[%s3187_s19 + $0x3f0] sm:$0xff]  ;;  %v3850_v42 = vld [vmem:[%s3187_s19 + $0x2d8] sm:$0xff] }
 0x1c6   : > { %829 = vmatpush.msrb.mxu0 %v3306_v28  ;;  %855 = vmatpush.msrb.mxu1 %v3261_v17  ;;  %v5222_v17 = vld [vmem:[#allocation18_spill] sm:$0xff] }
 0x1c7   : > { %2502 = vmatmul.msk.f32.gmra.mxu1 %vm674_vm8, %v3451_v0  ;;  %v5217_v0 = vld [vmem:[#allocation20_spill] sm:$0xff]  ;;  %1069 = vmatpush.msrb.mxu3 %v3813_v24  ;;  %v3821_v28 = vld [vmem:[%s3187_s19 + $0x3f8] sm:$0xff] }
 0x1c8   : > { %830 = vmatpush.msrb.mxu0 %v3323_v32  ;;  %856 = vmatpush.msrb.mxu1 %v3277_v21  ;;  %v3810_v21 = vld [vmem:[%s3187_s19 + $0x2f0] sm:$0xff]  ;;  %v3829_v32 = vld [vmem:[%s3187_s19 + $0x3e0] sm:$0xff]  ;;  %5227 = vst [vmem:[#allocation20_spill] sm:$0xff] %v3989_v19 }
 0x1c9   : > { %2499 = vmatmul.msk.f32.gmra.mxu0 %vm674_vm8, %v3484_v61  ;;  %1049 = vmatpush.msrb.mxu2 %v3810_v21 }
 0x1ca   : > { %831 = vmatpush.msrb.mxu0 %v3339_v36  ;;  %857 = vmatpush.msrb.mxu1 %v3293_v25  ;;  %v3816_v25 = vld [vmem:[%s3187_s19 + $0x2f8] sm:$0xff]  ;;  %v3837_v36 = vld [vmem:[%s3187_s19 + $0x3e8] sm:$0xff] }
 0x1cb   : > { %1070 = vmatpush.msrb.mxu3 %v3829_v32 }
 0x1cc   : > { %832 = vmatpush.msrb.mxu0 %v3355_v40  ;;  %858 = vmatpush.msrb.mxu1 %v3309_v29  ;;  %v3826_v29 = vld [vmem:[%s3187_s19 + $0x2e0] sm:$0xff]  ;;  %v3844_v40 = vld [vmem:[%s3187_s19 + $0x2d0] sm:$0xff] }
 0x1cd   : > { %918 = vperm.xlu2 %2817, %v3503_v4   ;;  %1050 = vmatpush.msrb.mxu2 %v3826_v29 }
 0x1ce   : > { %833 = vmatpush.msrb.mxu0 %v3376_v45  ;;  %859 = vmatpush.msrb.mxu1 %v3326_v33  ;;  %v3832_v33 = vld [vmem:[%s3187_s19 + $0x2e8] sm:$0xff]  ;;  %v3855_v45 = vld [vmem:[%s3187_s19 + $0x3d8] sm:$0xff] }
 0x1cf   : > { %2503 = vmatmul.msk.f32.gmra.mxu1 %vm674_vm8, %v3484_v61  ;;  %1051 = vmatpush.msrb.mxu2 %v3844_v40  ;;  %v3877_v61 = vld [vmem:[%s3187_s19 + $0x3b0] sm:$0xff] }
 0x1d0   : > { %834 = vmatpush.msrb.mxu0 %v3392_v49  ;;  %860 = vmatpush.msrb.mxu1 %v3342_v37  ;;  %v3839_v37 = vpop.permute.xlu2 %659  ;;  %v3863_v49 = vld [vmem:[%s3187_s19 + $0x3c0] sm:$0xff] }
 0x1d1   : > { %2500 = vmatmul.msk.f32.gmra.mxu0 %vm674_vm8, %v3503_v4 }
 0x1d2   : > { %835 = vmatpush.msrb.mxu0 %v5217_v0  ;;  %861 = vmatpush.msrb.mxu1 %v5218_v9  ;;  %v4000_v0 = vld [vmem:[%s3187_s19 + $0x348] sm:$0xff] }
 0x1d3   : > { %5229 = vst [vmem:[#allocation23_spill] sm:$0xff] %v4000_v0 }
 0x1d4   : > { %836 = vmatpush.msrb.mxu0 %v5219_v12  ;;  %862 = vmatpush.msrb.mxu1 %v5220_v13  ;;  %v4007_v12 = vld [vmem:[%s3187_s19 + $0x230] sm:$0xff] }
 0x1d5   : > { %2821 = vset.pattern.permute.xlu2 %v5081_v1  ;;  %5230 = vst [vmem:[#allocation17_spill] sm:$0xff] %v4007_v12  ;;  %v4010_v13 = vld [vmem:[%s3187_s19 + $0x330] sm:$0xff] }
 0x1d6   : > { %837 = vmatpush.msrb.mxu0 %v5221_v16  ;;  %863 = vmatpush.msrb.mxu1 %v5199_v63  ;;  %v3874_v63 = vld [vmem:[%s3187_s19 + $0x2b0] sm:$0xff] }
 0x1d7   : > { %2504 = vmatmul.msk.f32.gmra.mxu1 %vm674_vm8, %v3503_v4  ;;  %1578 = vperm.xlu2 %2821, %v5222_v17   ;;  %v5224_v4 = vld [vmem:[#allocation21_spill] sm:$0xff] }
 0x1d8   : > { %838 = vmatpush.msrb.mxu0 %v3462_v56  ;;  %864 = vmatpush.msrb.mxu1 %v5201_v41  ;;  %v3847_v41 = vld [vmem:[%s3187_s19 + $0x3d0] sm:$0xff]  ;;  %v3866_v56 = vld [vmem:[%s3187_s19 + $0x2c8] sm:$0xff]  ;;  %v3921_v2 = vpop.permute.xlu2 %671 }
 0x1d9   : > { %1071 = vmatpush.msrb.mxu3 %v3847_v41 }
 0x1da   : > { %865 = vmatpush.msrb.mxu1 %v5203_v46  ;;  %1089 = vmatpush.msra.mxu0 %v3816_v25  ;;  %v3860_v46 = vld [vmem:[%s3187_s19 + $0x2c0] sm:$0xff] }
 0x1db   : > { %1052 = vmatpush.msrb.mxu2 %v3860_v46  ;;  %1072 = vmatpush.msrb.mxu3 %v3863_v49 }
 0x1dc   : > { %866 = vmatpush.msrb.mxu1 %v5204_v62  ;;  %1090 = vmatpush.msra.mxu0 %v3832_v33  ;;  %v3871_v62 = vld [vmem:[%s3187_s19 + $0x3c8] sm:$0xff] }
 0x1dd   : > { %1053 = vmatpush.msrb.mxu2 %v3874_v63  ;;  %1073 = vmatpush.msrb.mxu3 %v3877_v61 }
 0x1de   : > { %867 = vmatpush.msrb.mxu1 %v5223_v20  ;;  %1091 = vmatpush.msra.mxu0 %v3850_v42 }
 0x1df   : > { %1590 = vperm.xlu2 %2821, %v5224_v4   ;;  %1054 = vmatpush.msrb.mxu2 %v3892_v30 }
 0x1e0   : > { %1109 = vmatpush.msra.mxu1 %v3821_v28  ;;  %1092 = vmatpush.msra.mxu0 %v3866_v56  ;;  %v4012_v16 = vpop.permute.xlu2 %1158 }
 0x1e1   : > { %1074 = vmatpush.msrb.mxu3 %v3895_v55  ;;  %1055 = vmatpush.msrb.mxu2 %v3908_v7  ;;  %5231 = vst [vmem:[#allocation25_spill] sm:$0xff] %v4012_v16  ;;  %v4029_v16 = vld [vmem:[%s3187_s19 + $0x220] sm:$0xff] }
 0x1e2   : > { %1110 = vmatpush.msra.mxu1 %v3837_v36  ;;  %1093 = vmatpush.msra.mxu0 %v3882_v57  ;;  %5236 = vst [vmem:[#allocation30_spill] sm:$0xff] %v4029_v16 }
 0x1e3   : > { %1075 = vmatpush.msrb.mxu3 %v3911_v26  ;;  %1056 = vmatpush.msrb.mxu2 %v3926_v27 }
 0x1e4   : > { %1111 = vmatpush.msra.mxu1 %v3855_v45  ;;  %1094 = vmatpush.msra.mxu0 %v3898_v60 }
 0x1e5   : > { %1057 = vmatpush.msrb.mxu2 %v3944_v51 }
 0x1e6   : > { %1112 = vmatpush.msra.mxu1 %v3871_v62  ;;  %1095 = vmatpush.msra.mxu0 %v3914_v6 }
 0x1e7   : > { %2824 = vset.pattern.permute.xlu2 %v5216_v5  ;;  %1058 = vmatpush.msrb.mxu2 %v3960_v59 }
 0x1e8   : > { %1606 = vperm.xlu2 %2824, %v3643_v11   ;;  %1113 = vmatpush.msra.mxu1 %v3885_v34  ;;  %v3903_v11 = vld [vmem:[%s3187_s19 + $0x3a8] sm:$0xff] }
 0x1e9   : > { %1096 = vmatpush.msra.mxu0 %v3932_v39  ;;  %1059 = vmatpush.msrb.mxu2 %v3974_v14 }
 0x1ea   : > { %1114 = vmatpush.msra.mxu1 %v3903_v11 }
 0x1eb   : > { %1097 = vmatpush.msra.mxu0 %v3950_v53  ;;  %1060 = vmatpush.msrb.mxu2 %v3989_v19 }
 0x1ec   : > { %1115 = vmatpush.msra.mxu1 %v3919_v3 }
 0x1ed   : > { %1098 = vmatpush.msra.mxu0 %v3966_v8  ;;  %1061 = vmatpush.msrb.mxu2 %v4007_v12  ;;  %v4059_v12 = vld [vmem:[%s3187_s19 + $0x318] sm:$0xff] }
 0x1ee   : > { %1116 = vmatpush.msra.mxu1 %v3939_v48  ;;  %5242 = vst [vmem:[#allocation36_spill] sm:$0xff] %v4059_v12 }
 0x1ef   : > { %1099 = vmatpush.msra.mxu0 %v3983_v15  ;;  %1062 = vmatpush.msrb.mxu2 %v4029_v16  ;;  %v4071_v16 = vld [vmem:[%s3187_s19 + $0x300] sm:$0xff]  ;;  %v5115_v15 = vmov 70  }
 0x1f0   : > { %2827 = vset.pattern.permute.xlu2 %v5081_v1  ;;  %1117 = vmatpush.msra.mxu1 %v3955_v54  ;;  %v4024_v1 = vpop.permute.xlu1 %1131 }
 0x1f1   : > { %2274 = vperm.xlu2 %2827, %v3696_v31   ;;  %1100 = vmatpush.msra.mxu0 %v3997_v44  ;;  %5235 = vst [vmem:[#allocation29_spill] sm:$0xff] %v4024_v1  ;;  %v4041_v1 = vld [vmem:[%s3187_s19 + $0x328] sm:$0xff]  ;;  %v4049_v44 = vld [vmem:[%s3187_s19 + $0x310] sm:$0xff] }
 0x1f2   : > { %1118 = vmatpush.msra.mxu1 %v3971_v47  ;;  %5238 = vst [vmem:[#allocation32_spill] sm:$0xff] %v4041_v1  ;;  %2820 = vset.pattern.permute.xlu1 %v5115_v15  ;;  %v5253_v15 = vld [vmem:[#allocation30_spill] sm:$0xff] }
 0x1f3   : > { %5240 = vst [vmem:[#allocation34_spill] sm:$0xff] %v4049_v44 }
 0x1f4   : > { %1119 = vmatpush.msra.mxu1 %v3986_v38 }
 0x1f6   : > { %1120 = vmatpush.msra.mxu1 %v4000_v0 }
 0x1f9   : > { %2829 = vset.pattern.permute.xlu2 %v5216_v5  ;;  %v664_v5 = vpop.permute.xlu0 %663 }
 0x1fa   : > { %2298 = vperm.xlu2 %2829, %v3696_v31   ;;  %v3929_v31 = vld [vmem:[%s3187_s19 + $0x380] sm:$0xff] }
 0x1fb   : > { %1076 = vmatpush.msrb.mxu3 %v3929_v31 }
 0x1fd   : > { %1077 = vmatpush.msrb.mxu3 %v3947_v52 }
 0x1ff   : > { %1078 = vmatpush.msrb.mxu3 %v3963_v58 }
 0x201   : > { %1079 = vmatpush.msrb.mxu3 %v3977_v22 }
 0x202   : > { %1614 = vperm.xlu2 %2829, %v5224_v4   ;;  %v4019_v4 = vld [vmem:[%s3187_s19 + $0x238] sm:$0xff] }
 0x203   : > { %1080 = vmatpush.msrb.mxu3 %v3994_v23  ;;  %5233 = vst [vmem:[#allocation21_spill] sm:$0xff] %v4019_v4  ;;  %1101 = vmatpush.msra.mxu0 %v4019_v4  ;;  %v4056_v4 = vld [vmem:[%s3187_s19 + $0x218] sm:$0xff] }
 0x204   : > { %5241 = vst [vmem:[#allocation35_spill] sm:$0xff] %v4056_v4 }
 0x205   : > { %1081 = vmatpush.msrb.mxu3 %v4010_v13  ;;  %1102 = vmatpush.msra.mxu0 %v4038_v35  ;;  %v4068_v35 = vld [vmem:[%s3187_s19 + $0x200] sm:$0xff] }
 0x207   : > { %1103 = vmatpush.msra.mxu0 %v4056_v4 }
 0x20a   : > { %2306 = vperm.xlu2 %2829, %v3709_v50  }
 0x236   : > { %v700_v10 = vpop.f32.mrf.mxu0 }
 0x237   : > { %v701_v18 = vadd.f32 %v700_v10, %v3839_v37  ;;  %v4022_v10 = vld [vmem:[%s3187_s19 + $0x338] sm:$0xff] }
 0x238   : > { %5234 = vst [vmem:[#allocation28_spill] sm:$0xff] %v4022_v10  ;;  %1121 = vmatpush.msra.mxu1 %v4022_v10 }
 0x239   : > { %v749_v9 = vmul.f32 0.01, %v701_v18  ;;  %vm741_vm9 = vcmp.ge.f32.partialorder %v701_v18, 0.0 }
 0x23a   : > { %1122 = vmatpush.msra.mxu1 %v4041_v1 }
 0x23b   : > { %v4014_v20 = vsel %vm741_vm9, %v701_v18, %v749_v9  ;;  %v4032_v18 = vld [vmem:[%s3187_s19 + $0x320] sm:$0xff] }
 0x23c   : > { %5232 = vst [vmem:[#allocation27_spill] sm:$0xff] %v4014_v20  ;;  %v729_v50 = vpop.f32.mrf.mxu1  ;;  %781 = vmatmul.f32.vlgmr.msra.gmra.mxu2 %v4014_v20  ;;  %839 = vmatmul.f32.vlgmr.msrb.gmra.mxu0 %v4014_v20  ;;  %v4046_v20 = vld [vmem:[%s3187_s19 + $0x210] sm:$0xff] }
 0x23d   : > { %v730_v9 = vadd.f32 %v729_v50, %v3839_v37  ;;  %5239 = vst [vmem:[#allocation33_spill] sm:$0xff] %v4046_v20  ;;  %1082 = vmatpush.msrb.mxu3 %v4032_v18  ;;  %1063 = vmatpush.msrb.mxu2 %v4046_v20 }
 0x23e   : > { %v703_v17 = vpop.f32.mrf.mxu0  ;;  %1123 = vmatpush.msra.mxu1 %v4059_v12 }
 0x23f   : > { %v750_v50 = vmul.f32 0.01, %v730_v9  ;;  %v704_v37 = vadd.f32 %v703_v17, %v664_v5  ;;  %vm742_vm10 = vcmp.ge.f32.partialorder %v730_v9, 0.0  ;;  %1083 = vmatpush.msrb.mxu3 %v4049_v44  ;;  %1064 = vmatpush.msrb.mxu2 %v4068_v35 }
 0x241   : > { %v4061_v19 = vsel %vm742_vm10, %v730_v9, %v750_v50  ;;  %vm743_vm11 = vcmp.ge.f32.partialorder %v704_v37, 0.0  ;;  %v751_v17 = vmul.f32 0.01, %v704_v37  ;;  %v4078_v9 = vld [vmem:[%s3187_s19 + $0x208] sm:$0xff]  ;;  %1084 = vmatpush.msrb.mxu3 %v4071_v16  ;;  %1239 = vmatpush.msra.mxu2 %v3810_v21 }
 0x242   : > { %5243 = vst [vmem:[#allocation37_spill] sm:$0xff] %v4061_v19  ;;  %810 = vmatmul.f32.vlgmr.msra.gmra.mxu3 %v4061_v19  ;;  %868 = vmatmul.f32.vlgmr.msrb.gmra.mxu1 %v4061_v19  ;;  %v4081_v50 = vld [vmem:[%s3187_s19 + $0x308] sm:$0xff]  ;;  %v4085_v19 = vpop.permute.xlu2 %1162 }
 0x243   : > { %v4073_v1 = vsel %vm743_vm11, %v704_v37, %v751_v17  ;;  %v4089_v37 = vpop.permute.xlu1 %1136  ;;  %1104 = vmatpush.msra.mxu0 %v4078_v9  ;;  %1124 = vmatpush.msra.mxu1 %v4081_v50 }
 0x244   : > { %v732_v20 = vpop.f32.mrf.mxu1  ;;  %784 = vmatmul.f32.gmra.mxu2 %v4073_v1  ;;  %842 = vmatmul.f32.gmra.mxu0 %v4073_v1  ;;  %5244 = vst [vmem:[#allocation38_spill] sm:$0xff] %v4089_v37 }
 0x245   : > { %v733_v44 = vadd.f32 %v732_v20, %v664_v5  ;;  %1268 = vmatpush.msra.mxu3 %v3813_v24  ;;  %v2833_v5 = vld [vmem:[%s3362_s1] sm:$0xff]  ;;  %1326 = vmatpush.msrb.mxu1 %v3821_v28 }
 0x246   : > { %v706_v17 = vpop.f32.mrf.mxu0  ;;  %956 = vperm.xlu1 %2820, %v2833_v5   ;;  %1297 = vmatpush.msrb.mxu0 %v3816_v25 }
 0x247   : > { %v752_v4 = vmul.f32 0.01, %v733_v44  ;;  %v707_v12 = vadd.f32 %v706_v17, %v3934_v43  ;;  %vm744_vm12 = vcmp.ge.f32.partialorder %v733_v44, 0.0  ;;  %1269 = vmatpush.msra.mxu3 %v3829_v32  ;;  %1327 = vmatpush.msrb.mxu1 %v3837_v36 }
 0x248   : > { %1240 = vmatpush.msra.mxu2 %v3826_v29  ;;  %1298 = vmatpush.msrb.mxu0 %v3832_v33 }
 0x249   : > { %v4098_v20 = vsel %vm744_vm12, %v733_v44, %v752_v4  ;;  %vm745_vm13 = vcmp.ge.f32.partialorder %v707_v12, 0.0  ;;  %v753_v37 = vmul.f32 0.01, %v707_v12  ;;  %1270 = vmatpush.msra.mxu3 %v3847_v41  ;;  %1328 = vmatpush.msrb.mxu1 %v3855_v45 }
 0x24a   : > { %813 = vmatmul.f32.gmra.mxu3 %v4098_v20  ;;  %871 = vmatmul.f32.gmra.mxu1 %v4098_v20 }
 0x24b   : > { %v4104_v17 = vsel %vm745_vm13, %v707_v12, %v753_v37  ;;  %1271 = vmatpush.msra.mxu3 %v3863_v49  ;;  %v4115_v12 = vpop.permute.xlu2 %1141  ;;  %1329 = vmatpush.msrb.mxu1 %v3871_v62  ;;  %v2569_v37 = vld [vmem:[%s3197_s6 + $0x2] sm:$0x3] }
 0x24c   : > { %v735_v5 = vpop.f32.mrf.mxu1  ;;  %787 = vmatmul.f32.gmra.mxu2 %v4104_v17  ;;  %845 = vmatmul.f32.gmra.mxu0 %v4104_v17 }
 0x24d   : > { %v736_v28 = vadd.f32 %v735_v5, %v3934_v43  ;;  %1272 = vmatpush.msra.mxu3 %v3877_v61  ;;  %v4120_v43 = vpop.permute.xlu1 %1196  ;;  %1241 = vmatpush.msra.mxu2 %v3844_v40  ;;  %v4144_v5 = vperm.slane %v2569_v37, 0 }
 0x24e   : > { %v709_v44 = vpop.f32.mrf.mxu0  ;;  %1330 = vmatpush.msrb.mxu1 %v3885_v34  ;;  %1299 = vmatpush.msrb.mxu0 %v3850_v42 }
 0x24f   : > { %v754_v36 = vmul.f32 0.01, %v736_v28  ;;  %v710_v4 = vadd.f32 %v709_v44, %v3921_v2  ;;  %vm746_vm14 = vcmp.ge.f32.partialorder %v736_v28, 0.0  ;;  %1273 = vmatpush.msra.mxu3 %v3895_v55  ;;  %1242 = vmatpush.msra.mxu2 %v3860_v46  ;;  %v5245_v44 = vld [vmem:[#allocation15_spill] sm:$0xff] }
 0x250   : > { %1331 = vmatpush.msrb.mxu1 %v3903_v11  ;;  %1300 = vmatpush.msrb.mxu0 %v3866_v56 }
 0x251   : > { %v755_v25 = vmul.f32 0.01, %v710_v4  ;;  %v4124_v45 = vsel %vm746_vm14, %v736_v28, %v754_v36  ;;  %vm747_vm15 = vcmp.ge.f32.partialorder %v710_v4, 0.0  ;;  %1274 = vmatpush.msra.mxu3 %v3911_v26  ;;  %1243 = vmatpush.msra.mxu2 %v3874_v63  ;;  %v5246_v36 = vld [vmem:[#allocation32_spill] sm:$0xff] }
 0x252   : > { %816 = vmatmul.f32.gmra.mxu3 %v4124_v45  ;;  %874 = vmatmul.f32.gmra.mxu1 %v4124_v45 }
 0x253   : > { %v4130_v62 = vsel %vm747_vm15, %v710_v4, %v755_v25  ;;  %1332 = vmatpush.msrb.mxu1 %v3919_v3  ;;  %1275 = vmatpush.msra.mxu3 %v3929_v31  ;;  %v5247_v4 = vld [vmem:[#allocation20_spill] sm:$0xff]  ;;  %v5248_v25 = vld [vmem:[#allocation34_spill] sm:$0xff] }
 0x254   : > { %v738_v33 = vpop.f32.mrf.mxu1  ;;  %790 = vmatmul.f32.gmra.mxu2 %v4130_v62  ;;  %848 = vmatmul.f32.gmra.mxu0 %v4130_v62 }
 0x255   : > { %v739_v34 = vadd.f32 %v738_v33, %v3921_v2  ;;  %1301 = vmatpush.msrb.mxu0 %v3882_v57  ;;  %1333 = vmatpush.msrb.mxu1 %v3939_v48  ;;  %v4148_v2 = vpop.permute.xlu2 %1146  ;;  %v4154_v56 = vpop.permute.xlu1 %1200  ;;  %v4164_v57 = vperm.slane %v2569_v37, 1  ;;  %v5249_v33 = vld [vmem:[#allocation16_spill] sm:$0xff] }
 0x256   : > { %1244 = vmatpush.msra.mxu2 %v3892_v30  ;;  %1276 = vmatpush.msra.mxu3 %v3947_v52  ;;  %v5250_v37 = vld [vmem:[#allocation36_spill] sm:$0xff] }
 0x257   : > { %vm748_vm0 = vcmp.ge.f32.partialorder %v739_v34, 0.0  ;;  %v756_v42 = vmul.f32 0.01, %v739_v34  ;;  %1302 = vmatpush.msrb.mxu0 %v3898_v60  ;;  %1334 = vmatpush.msrb.mxu1 %v3955_v54 }
 0x258   : > { %1245 = vmatpush.msra.mxu2 %v3908_v7  ;;  %1277 = vmatpush.msra.mxu3 %v3963_v58 }
 0x259   : > { %v4150_v28 = vsel %vm748_vm0, %v739_v34, %v756_v42  ;;  %1303 = vmatpush.msrb.mxu0 %v3914_v6  ;;  %1335 = vmatpush.msrb.mxu1 %v3971_v47  ;;  %v5251_v34 = vld [vmem:[#allocation17_spill] sm:$0xff] }
 0x25a   : > { %819 = vmatmul.f32.gmra.mxu3 %v4150_v28  ;;  %877 = vmatmul.f32.gmra.mxu1 %v4150_v28  ;;  %v5252_v42 = vld [vmem:[#allocation21_spill] sm:$0xff] }
 0x25b   : > { %1246 = vmatpush.msra.mxu2 %v3926_v27  ;;  %1278 = vmatpush.msra.mxu3 %v3977_v22 }
 0x25c   : > { %1065 = vmatmul.f32.vlgmr.msrb.gmra.mxu2 %v4144_v5  ;;  %1105 = vmatmul.f32.vlgmr.msra.gmra.mxu0 %v4144_v5 }
 0x25d   : > { %1304 = vmatpush.msrb.mxu0 %v3932_v39  ;;  %1336 = vmatpush.msrb.mxu1 %v3986_v38  ;;  %v4176_v60 = vpop.permute.xlu2 %1204  ;;  %v4180_v6 = vpop.permute.xlu1 %1170 }
 0x25e   : > { %1247 = vmatpush.msra.mxu2 %v3944_v51  ;;  %1279 = vmatpush.msra.mxu3 %v3994_v23 }
 0x25f   : > { %1305 = vmatpush.msrb.mxu0 %v3950_v53  ;;  %1337 = vmatpush.msrb.mxu1 %v4000_v0  ;;  %v5260_v0 = vld [vmem:[#allocation35_spill] sm:$0xff] }
 0x260   : > { %1248 = vmatpush.msra.mxu2 %v3960_v59  ;;  %1280 = vmatpush.msra.mxu3 %v4010_v13 }
 0x261   : > { %1306 = vmatpush.msrb.mxu0 %v3966_v8  ;;  %1338 = vmatpush.msrb.mxu1 %v4022_v10  ;;  %v5256_v10 = vld [vmem:[#allocation31_spill] sm:$0xff] }
 0x262   : > { %1085 = vmatmul.f32.vlgmr.msrb.gmra.mxu3 %v4164_v57  ;;  %1125 = vmatmul.f32.vlgmr.msra.gmra.mxu1 %v4164_v57  ;;  %v5257_v8 = vld [vmem:[#allocation19_spill] sm:$0xff] }
 0x263   : > { %1249 = vmatpush.msra.mxu2 %v3974_v14  ;;  %1281 = vmatpush.msra.mxu3 %v4032_v18 }
 0x264   : > { %1307 = vmatpush.msrb.mxu0 %v5245_v44  ;;  %1339 = vmatpush.msrb.mxu1 %v5246_v36  ;;  %v5254_v44 = vmov 66  }
 0x265   : > { %1250 = vmatpush.msra.mxu2 %v5247_v4  ;;  %1282 = vmatpush.msra.mxu3 %v5248_v25  ;;  %v4200_v36 = vpop.permute.xlu2 %1364 }
 0x266   : > { %1308 = vmatpush.msrb.mxu0 %v5249_v33  ;;  %1340 = vmatpush.msrb.mxu1 %v5250_v37  ;;  %5255 = vst [vmem:[#allocation20_spill] sm:$0xff] %v4200_v36  ;;  %v4204_v33 = vpop.permute.xlu1 %1360  ;;  %v5259_v37 = vld [vmem:[#allocation33_spill] sm:$0xff]  ;;  %v5262_v36 = vld [vmem:[#allocation18_spill] sm:$0xff] }
 0x267   : > { %1251 = vmatpush.msra.mxu2 %v5251_v34  ;;  %1283 = vmatpush.msra.mxu3 %v4071_v16  ;;  %5258 = vst [vmem:[#allocation34_spill] sm:$0xff] %v4204_v33 }
 0x268   : > { %1309 = vmatpush.msrb.mxu0 %v5252_v42  ;;  %1341 = vmatpush.msrb.mxu1 %v4081_v50  ;;  %v5261_v42 = vmov 70  }
 0x269   : > { %1252 = vmatpush.msra.mxu2 %v5253_v15  ;;  %2822 = vset.pattern.permute.xlu1 %v5254_v44 }
 0x26a   : > { %1310 = vmatpush.msrb.mxu0 %v5256_v10  ;;  %1586 = vperm.xlu1 %2822, %v5257_v8  }
 0x26b   : > { %1253 = vmatpush.msra.mxu2 %v5259_v37  ;;  %1490 = vmatpush.msra.mxu1 %v3813_v24  ;;  %v5263_v24 = vmov 67  }
 0x26c   : > { %1311 = vmatpush.msrb.mxu0 %v5260_v0  ;;  %2831 = vset.pattern.permute.xlu0 %v5261_v42 }
 0x26d   : > { %1254 = vmatpush.msra.mxu2 %v4068_v35  ;;  %1491 = vmatpush.msra.mxu1 %v3829_v32  ;;  %v4221_v8 = vpop.permute.xlu2 %1823  ;;  %v4224_v32 = vpop.permute.xlu0 %1192 }
 0x26e   : > { %1312 = vmatpush.msrb.mxu0 %v4078_v9  ;;  %1652 = vperm.xlu0 %2831, %v5262_v36   ;;  %5264 = vst [vmem:[#allocation17_spill] sm:$0xff] %v4221_v8  ;;  %v4226_v33 = vpop.permute.xlu1 %1368 }
 0x26f   : > { %1492 = vmatpush.msra.mxu1 %v3847_v41 }
 0x270   : > { %1461 = vmatpush.msra.mxu0 %v3810_v21 }
 0x271   : > { %1493 = vmatpush.msra.mxu1 %v3863_v49 }
 0x272   : > { %1462 = vmatpush.msra.mxu0 %v3826_v29  ;;  %2823 = vset.pattern.permute.xlu1 %v5263_v24  ;;  %v5266_v29 = vld [vmem:[#allocation22_spill] sm:$0xff] }
 0x273   : > { %1494 = vmatpush.msra.mxu1 %v3877_v61  ;;  %1602 = vperm.xlu1 %2823, %v5262_v36   ;;  %v5270_v61 = vld [vmem:[#allocation24_spill] sm:$0xff] }
 0x274   : > { %1463 = vmatpush.msra.mxu0 %v3844_v40 }
 0x275   : > { %1495 = vmatpush.msra.mxu1 %v3895_v55  ;;  %v4239_v21 = vpop.permute.xlu2 %1828  ;;  %v4242_v40 = vpop.permute.xlu0 %1166 }
 0x276   : > { %1464 = vmatpush.msra.mxu0 %v3860_v46  ;;  %5265 = vst [vmem:[#allocation30_spill] sm:$0xff] %v4239_v21  ;;  %v4244_v41 = vpop.permute.xlu1 %1884  ;;  %v5285_v21 = vld [vmem:[#allocation27_spill] sm:$0xff] }
 0x277   : > { %1496 = vmatpush.msra.mxu1 %v3911_v26  ;;  %5267 = vst [vmem:[#allocation31_spill] sm:$0xff] %v4244_v41  ;;  %v5274_v26 = vld [vmem:[#allocation26_spill] sm:$0xff] }
 0x278   : > { %1465 = vmatpush.msra.mxu0 %v3874_v63 }
 0x279   : > { %1497 = vmatpush.msra.mxu1 %v3929_v31 }
 0x27a   : > { %1466 = vmatpush.msra.mxu0 %v3892_v30 }
 0x27b   : > { %1498 = vmatpush.msra.mxu1 %v3947_v52  ;;  %2826 = vset.pattern.permute.xlu1 %v5254_v44 }
 0x27c   : > { %1467 = vmatpush.msra.mxu0 %v3908_v7  ;;  %2270 = vperm.xlu1 %2826, %v5266_v29  }
 0x27d   : > { %1499 = vmatpush.msra.mxu1 %v3963_v58  ;;  %v4257_v46 = vpop.permute.xlu2 %1888  ;;  %v4260_v49 = vpop.permute.xlu0 %1356 }
 0x27e   : > { %1468 = vmatpush.msra.mxu0 %v3926_v27  ;;  %5268 = vst [vmem:[#allocation19_spill] sm:$0xff] %v4257_v46  ;;  %v4262_v63 = vpop.permute.xlu1 %1854 }
 0x27f   : > { %1500 = vmatpush.msra.mxu1 %v3977_v22  ;;  %5269 = vst [vmem:[#allocation33_spill] sm:$0xff] %v4262_v63 }
 0x280   : > { %1469 = vmatpush.msra.mxu0 %v3944_v51 }
 0x281   : > { %1501 = vmatpush.msra.mxu1 %v3994_v23 }
 0x282   : > { %1470 = vmatpush.msra.mxu0 %v3960_v59 }
 0x283   : > { %1502 = vmatpush.msra.mxu1 %v4010_v13 }
 0x284   : > { %1471 = vmatpush.msra.mxu0 %v3974_v14  ;;  %2828 = vset.pattern.permute.xlu1 %v5263_v24 }
 0x285   : > { %1503 = vmatpush.msra.mxu1 %v4032_v18  ;;  %2294 = vperm.xlu1 %2828, %v5266_v29   ;;  %v4269_v30 = vpop.permute.xlu2 %1892  ;;  %v4271_v55 = vpop.permute.xlu0 %1850 }
 0x286   : > { %1472 = vmatpush.msra.mxu0 %v5247_v4  ;;  %5271 = vst [vmem:[#allocation35_spill] sm:$0xff] %v4269_v30  ;;  %v4273_v7 = vpop.permute.xlu1 %1858 }
 0x287   : > { %1504 = vmatpush.msra.mxu1 %v5248_v25  ;;  %5272 = vst [vmem:[#allocation18_spill] sm:$0xff] %v4271_v55 }
 0x288   : > { %1473 = vmatpush.msra.mxu0 %v5251_v34  ;;  %5273 = vst [vmem:[#allocation22_spill] sm:$0xff] %v4273_v7 }
 0x289   : > { %1505 = vmatpush.msra.mxu1 %v4071_v16 }
 0x28a   : > { %1474 = vmatpush.msra.mxu0 %v5253_v15 }
 0x28c   : > { %1475 = vmatpush.msra.mxu0 %v5259_v37 }
 0x28d   : > { %2302 = vperm.xlu1 %2828, %v5270_v61   ;;  %v4277_v27 = vpop.permute.xlu2 %1862  ;;  %v4279_v31 = vpop.permute.xlu0 %1833 }
 0x28e   : > { %1476 = vmatpush.msra.mxu0 %v4068_v35  ;;  %5275 = vst [vmem:[#allocation24_spill] sm:$0xff] %v4277_v27  ;;  %v4281_v51 = vpop.permute.xlu1 %1838 }
 0x28f   : > { %5276 = vst [vmem:[#allocation26_spill] sm:$0xff] %v4279_v31 }
 0x290   : > { %5277 = vst [vmem:[#allocation39_spill] sm:$0xff] %v4281_v51 }
 0x295   : > { %2830 = vset.pattern.permute.xlu1 %v5254_v44  ;;  %v4285_v35 = vpop.permute.xlu2 %2052  ;;  %v4287_v52 = vpop.permute.xlu0 %1896 }
 0x296   : > { %2282 = vperm.xlu1 %2830, %v5274_v26   ;;  %5278 = vst [vmem:[#allocation40_spill] sm:$0xff] %v4285_v35  ;;  %v4289_v59 = vpop.permute.xlu1 %2048 }
 0x297   : > { %5279 = vst [vmem:[#allocation41_spill] sm:$0xff] %v4287_v52 }
 0x298   : > { %5280 = vst [vmem:[#allocation42_spill] sm:$0xff] %v4289_v59 }
 0x29d   : > { %v4291_v58 = vpop.permute.xlu2 %2060  ;;  %v911_v14 = vpop.permute.xlu0 %910 }
 0x29e   : > { %2832 = vset.pattern.permute.xlu1 %v5261_v42  ;;  %5281 = vst [vmem:[#allocation43_spill] sm:$0xff] %v4291_v58  ;;  %v4293_v22 = vpop.permute.xlu1 %2056  ;;  %v5284_v58 = vld [vmem:[#allocation37_spill] sm:$0xff] }
 0x29f   : > { %2344 = vperm.xlu1 %2832, %v5266_v29   ;;  %5282 = vst [vmem:[#allocation44_spill] sm:$0xff] %v4293_v22 }
 0x2a5   : > { %v891_v23 = vpop.permute.xlu2 %890  ;;  %v4295_v13 = vpop.permute.xlu0 %1610 }
 0x2a6   : > { %5283 = vst [vmem:[#allocation45_spill] sm:$0xff] %v4295_v13  ;;  %v887_v16 = vpop.permute.xlu1 %886  ;;  %v4642_v13 = vld [vmem:[%s3187_s19 + $0x528] sm:$0xff] }
 0x2a7   : > { %v900_v22 = vmul.f32 %v887_v16, %v4098_v20  ;;  %v902_v20 = vmul.f32 %v891_v23, %v4124_v45  ;;  %5315 = vst [vmem:[#allocation47_spill] sm:$0xff] %v4642_v13 }
 0x2ad   : > { %v907_v25 = vpop.permute.xlu2 %906  ;;  %v883_v26 = vpop.permute.xlu0 %882 }
 0x2ae   : > { %v895_v34 = vpop.permute.xlu1 %894  ;;  %v898_v35 = vmul.f32 %v883_v26, %v5284_v58  ;;  %v897_v63 = vmul.f32 %v883_v26, %v5285_v21  ;;  %v901_v21 = vmul.f32 %v891_v23, %v4104_v17 }
 0x2b6   : > { %v915_v41 = vpop.permute.xlu1 %914 }
 0x2b9   : > { %v840_v15 = vpop.f32.mrf.mxu0 }
 0x2bf   : > { %v782_v18 = vpop.f32.mrf.mxu2  ;;  %v869_v44 = vpop.f32.mrf.mxu1 }
 0x2c0   : > { %v870_v4 = vadd.f32 %v869_v44, %v840_v15 }
 0x2c1   : > { %v843_v36 = vpop.f32.mrf.mxu0 }
 0x2c2   : > { %v922_v29 = vmul.f32 %v907_v25, %v870_v4 }
 0x2c4   : > { %v930_v27 = vadd.f32 %v922_v29, %v898_v35 }
 0x2c5   : > { %v811_v37 = vpop.f32.mrf.mxu3 }
 0x2c6   : > { %v812_v59 = vadd.f32 %v811_v37, %v782_v18 }
 0x2c7   : > { %v785_v42 = vpop.f32.mrf.mxu2  ;;  %v872_v24 = vpop.f32.mrf.mxu1 }
 0x2c8   : > { %v873_v61 = vadd.f32 %v872_v24, %v843_v36  ;;  %v921_v7 = vmul.f32 %v907_v25, %v812_v59  ;;  %v899_v36 = vmul.f32 %v887_v16, %v4073_v1  ;;  %v919_v25 = vpop.permute.xlu2 %918 }
 0x2c9   : > { %v846_v30 = vpop.f32.mrf.mxu0 }
 0x2ca   : > { %v924_v52 = vmul.f32 %v911_v14, %v873_v61  ;;  %v929_v18 = vadd.f32 %v921_v7, %v897_v63 }
 0x2cc   : > { %v932_v51 = vadd.f32 %v924_v52, %v900_v22 }
 0x2cd   : > { %v814_v46 = vpop.f32.mrf.mxu3 }
 0x2ce   : > { %v946_v15 = vadd.f32 %v932_v51, %v930_v27  ;;  %v815_v44 = vadd.f32 %v814_v46, %v785_v42 }
 0x2cf   : > { %v875_v31 = vpop.f32.mrf.mxu1  ;;  %v788_v58 = vpop.f32.mrf.mxu2 }
 0x2d0   : > { %v923_v4 = vmul.f32 %v911_v14, %v815_v44  ;;  %v876_v24 = vadd.f32 %v875_v31, %v846_v30  ;;  %v904_v30 = vmul.f32 %v895_v34, %v4150_v28  ;;  %v5286_v28 = vld [vmem:[#allocation29_spill] sm:$0xff] }
 0x2d1   : > { %v849_v22 = vpop.f32.mrf.mxu0 }
 0x2d2   : > { %v931_v37 = vadd.f32 %v923_v4, %v899_v36  ;;  %v926_v61 = vmul.f32 %v915_v41, %v876_v24 }
 0x2d4   : > { %v937_v35 = vadd.f32 %v931_v37, %v929_v18  ;;  %v934_v52 = vadd.f32 %v926_v61, %v902_v20  ;;  %v1150_v18 = vmul.f32 %v5286_v28, %v4164_v57  ;;  %v5287_v61 = vld [vmem:[#allocation25_spill] sm:$0xff] }
 0x2d5   : > { %v817_v59 = vpop.f32.mrf.mxu3 }
 0x2d6   : > { %v947_v27 = vadd.f32 %v946_v15, %v934_v52  ;;  %v818_v46 = vadd.f32 %v817_v59, %v788_v58  ;;  %v903_v15 = vmul.f32 %v895_v34, %v4130_v62  ;;  %v5288_v34 = vld [vmem:[#allocation38_spill] sm:$0xff] }
 0x2d7   : > { %v878_v51 = vpop.f32.mrf.mxu1  ;;  %v791_v45 = vpop.f32.mrf.mxu2 }
 0x2d8   : > { %v925_v42 = vmul.f32 %v915_v41, %v818_v46  ;;  %v879_v1 = vadd.f32 %v878_v51, %v849_v22  ;;  %v1152_v51 = vmul.f32 %v5288_v34, %v4164_v57 }
 0x2d9   : > { %v1106_v29 = vpop.f32.mrf.mxu0 }
 0x2da   : > { %v933_v31 = vadd.f32 %v925_v42, %v901_v21  ;;  %v928_v14 = vmul.f32 %v919_v25, %v879_v1 }
 0x2dc   : > { %v938_v63 = vadd.f32 %v937_v35, %v933_v31  ;;  %v936_v7 = vadd.f32 %v928_v14, %v904_v30  ;;  %v1149_v14 = vmul.f32 %v5286_v28, %v4144_v5 }
 0x2dd   : > { %v820_v16 = vpop.f32.mrf.mxu3 }
 0x2de   : > { %v948_v26 = vadd.f32 %v947_v27, %v936_v7  ;;  %v821_v44 = vadd.f32 %v820_v16, %v791_v45 }
 0x2df   : > { %v1126_v36 = vpop.f32.mrf.mxu1  ;;  %v1066_v20 = vpop.f32.mrf.mxu2 }
 0x2e0   : > { %v949_v4 = vrot.slane %v948_v26, 4  ;;  %v927_v24 = vmul.f32 %v919_v25, %v821_v44  ;;  %v1127_v58 = vadd.f32 %v1126_v36, %v1106_v29  ;;  %v1154_v44 = vmul.f32 %v4115_v12, %v4164_v57  ;;  %v957_v36 = vpop.permute.xlu1 %956 }
 0x2e2   : > { %v935_v17 = vadd.f32 %v927_v24, %v903_v15  ;;  %v1174_v41 = vperm.slane %v1127_v58, 0  ;;  %v950_v23 = vadd.f32 %v949_v4, %v948_v26  ;;  %v1151_v26 = vmul.f32 %v5288_v34, %v4144_v5 }
 0x2e3   : > { %v1156_v34 = vmul.f32 %v4148_v2, %v4164_v57 }
 0x2e4   : > { %v939_v37 = vadd.f32 %v938_v63, %v935_v17  ;;  %v1176_v35 = vmul.f32 %v1174_v41, %v5287_v61  ;;  %v1178_v52 = vmul.f32 %v1174_v41, %v4085_v19  ;;  %v951_v59 = vrot.slane %v950_v23, 2 }
 0x2e5   : > { %v1086_v22 = vpop.f32.mrf.mxu3  ;;  %v1180_v4 = vmul.f32 %v1174_v41, %v4242_v40 }
 0x2e6   : > { %v1087_v27 = vadd.f32 %v1086_v22, %v1066_v20  ;;  %v940_v46 = vrot.slane %v939_v37, 4  ;;  %v1184_v62 = vadd.f32 %v1176_v35, %v1150_v18  ;;  %v952_v25 = vadd.f32 %v951_v59, %v950_v23 }
 0x2e7   : > { %v1186_v31 = vadd.f32 %v1178_v52, %v1152_v51  ;;  %v967_v20 = vlaneseq  ;;  %v1188_v22 = vadd.f32 %v1180_v4, %v1154_v44 }
 0x2e8   : > { %v1173_v21 = vperm.slane %v1087_v27, 0  ;;  %v941_v42 = vadd.f32 %v940_v46, %v939_v37  ;;  %v1208_v1 = vadd.f32 %v4224_v32, %v1184_v62  ;;  %v953_v30 = vrot.slane %v952_v25, 1 }
 0x2e9   : > { %v1210_v17 = vadd.f32 %v4120_v43, %v1186_v31  ;;  %v1153_v37 = vmul.f32 %v4115_v12, %v4144_v5  ;;  %vm4333_vm5 = vcmp.lt.s32.totalorder %v967_v20, 256  ;;  %v5289_v46 = vmov 0 }
 0x2ea   : > { %v1175_v45 = vmul.f32 %v1173_v21, %v5287_v61  ;;  %v1177_v63 = vmul.f32 %v1173_v21, %v4085_v19  ;;  %v942_v7 = vrot.slane %v941_v42, 2  ;;  %v954_v16 = vadd.f32 %v953_v30, %v952_v25 }
 0x2eb   : > { %vm1216_vm1 = vcmp.ge.f32.partialorder %v1208_v1, 0.0  ;;  %v1224_v29 = vmul.f32 0.01, %v1208_v1  ;;  %v1226_v52 = vmul.f32 0.01, %v1210_v17  ;;  %v1179_v59 = vmul.f32 %v1173_v21, %v4242_v40 }
 0x2ec   : > { %v1183_v15 = vadd.f32 %v1175_v45, %v1149_v14  ;;  %v943_v24 = vadd.f32 %v942_v7, %v941_v42  ;;  %v1185_v23 = vadd.f32 %v1177_v63, %v1151_v26  ;;  %v960_v18 = vadd.f32 %v957_v36, %v954_v16 }
 0x2ed   : > { %v4321_v58 = vsel %vm1216_vm1, %v1208_v1, %v1224_v29  ;;  %vm1218_vm4 = vcmp.ge.f32.partialorder %v1210_v17, 0.0  ;;  %v5290_v46 = vsel %vm4333_vm5, 4294967295, %v5289_v46  ;;  %v1182_v40 = vmul.f32 %v1174_v41, %v4180_v6 }
 0x2ee   : > { %1284 = vmatmul.f32.vlgmr.msra.gmra.mxu3 %v4321_v58  ;;  %1342 = vmatmul.f32.vlgmr.msrb.gmra.mxu1 %v4321_v58  ;;  %v1207_v19 = vadd.f32 %v4224_v32, %v1183_v15  ;;  %v944_v28 = vrot.slane %v943_v24, 1  ;;  %v1209_v32 = vadd.f32 %v4120_v43, %v1185_v23  ;;  %5291 = vst [vmem:[#allocation37_spill] sm:$0xff] %v5290_v46  ;;  %v963_v12 = vrot.slane %v960_v18, 7  ;;  %v4630_v46 = vld [vmem:[%s3187_s19 + $0x520] sm:$0xff] }
 0x2ef   : > { %v4343_v25 = vsel %vm1218_vm4, %v1210_v17, %v1226_v52  ;;  %v1212_v43 = vadd.f32 %v4154_v56, %v1188_v22  ;;  %v1187_v42 = vadd.f32 %v1179_v59, %v1153_v37  ;;  %v1155_v41 = vmul.f32 %v4148_v2, %v4144_v5 }
 0x2f0   : > { %vm1215_vm2 = vcmp.ge.f32.partialorder %v1207_v19, 0.0  ;;  %v1223_v61 = vmul.f32 0.01, %v1207_v19  ;;  %v945_v35 = vadd.f32 %v944_v28, %v943_v24  ;;  %v1225_v57 = vmul.f32 0.01, %v1209_v32 }
 0x2f1   : > { %vm1217_vm6 = vcmp.ge.f32.partialorder %v1209_v32, 0.0  ;;  %v1228_v1 = vmul.f32 0.01, %v1212_v43  ;;  %v1190_v30 = vadd.f32 %v1182_v40, %v1156_v34  ;;  %v1181_v31 = vmul.f32 %v1173_v21, %v4180_v6 }
 0x2f2   : > { %v4330_v27 = vsel %vm1215_vm2, %v1207_v19, %v1223_v61  ;;  %v959_v62 = vadd.f32 %v957_v36, %v945_v35  ;;  %v4358_v14 = vsel %vm1217_vm6, %v1209_v32, %v1225_v57  ;;  %vm1220_vm7 = vcmp.ge.f32.partialorder %v1212_v43, 0.0  ;;  %v2835_v57 = vld [vmem:[%s3187_s19 + $0x3f8] sm:$0xff] }
 0x2f3   : > { %1255 = vmatmul.f32.vlgmr.msra.gmra.mxu2 %v4330_v27  ;;  %1313 = vmatmul.f32.vlgmr.msrb.gmra.mxu0 %v4330_v27  ;;  %v1211_v45 = vadd.f32 %v4154_v56, %v1187_v42  ;;  %v1236_v63 = vsel %vm1220_vm7, %v1212_v43, %v1228_v1  ;;  %v1214_v7 = vadd.f32 %v4176_v60, %v1190_v30  ;;  %v2834_v43 = vld [vmem:[%s3362_s1 + $0x20] sm:$0xff]  ;;  %v2840_v1 = vld [vmem:[%s3362_s1 + $0x28] sm:$0xff] }
 0x2f4   : > { %v965_v51 = vsel %vm964_vm3, %v959_v62, %v963_v12  ;;  %v1189_v5 = vadd.f32 %v1181_v31, %v1155_v41  ;;  %v2836_v42 = vld [vmem:[%s3187_s19 + $0x3e8] sm:$0xff]  ;;  %v2842_v31 = vld [vmem:[%s3187_s19 + $0x3b8] sm:$0xff] }
 0x2f5   : > { %971 = vst.msk [vmem:[%s4348_s30] sm:$0x3] %vm4333_vm5, %v965_v51  ;;  %v1227_v16 = vmul.f32 0.01, %v1211_v45  ;;  %vm1219_vm9 = vcmp.ge.f32.partialorder %v1211_v45, 0.0  ;;  %vm1222_vm10 = vcmp.ge.f32.partialorder %v1214_v7, 0.0 }
 0x2f6   : > { %1287 = vmatmul.f32.gmra.mxu3 %v4343_v25  ;;  %1345 = vmatmul.f32.gmra.mxu1 %v4343_v25  ;;  %v1230_v2 = vmul.f32 0.01, %v1214_v7  ;;  %v1213_v6 = vadd.f32 %v4176_v60, %v1189_v5  ;;  %v2839_v41 = vld [vmem:[%s3187_s19 + $0x3c8] sm:$0xff]  ;;  %v5299_v5 = vld [vmem:[#allocation21_spill] sm:$0xff] }
 0x2f7   : > { %v1235_v29 = vsel %vm1219_vm9, %v1211_v45, %v1227_v16  ;;  %v2841_v30 = vld [vmem:[%s3187_s19 + $0x2e8] sm:$0xff]  ;;  %v2845_v45 = vld [vmem:[%s3187_s19 + $0x2b8] sm:$0xff]  ;;  %5312 = vst [vmem:[#allocation21_spill] sm:$0xff] %v4630_v46 }
 0x2f8   : > { %v1238_v56 = vsel %vm1222_vm10, %v1214_v7, %v1230_v2  ;;  %v1229_v21 = vmul.f32 0.01, %v1213_v6  ;;  %vm1221_vm11 = vcmp.ge.f32.partialorder %v1213_v6, 0.0  ;;  %v2847_v7 = vld [vmem:[%s3187_s19 + $0x2a8] sm:$0xff]  ;;  %v2848_v16 = vld [vmem:[%s3187_s19 + $0x298] sm:$0xff]  ;;  %v4414_v2 = vld [vmem:[%s3187_s19 + $0x4f0] sm:$0xff] }
 0x2f9   : > { %1741 = vmatpush.msrb.mxu0 %v4414_v2 }
 0x2fa   : > { %v1237_v26 = vsel %vm1221_vm11, %v1213_v6, %v1229_v21  ;;  %v4420_v6 = vld [vmem:[%s3187_s19 + $0x4f8] sm:$0xff]  ;;  %v4446_v21 = vld [vmem:[%s3187_s19 + $0x4d0] sm:$0xff] }
 0x2fb   : > { %1258 = vmatmul.f32.gmra.mxu2 %v4358_v14  ;;  %1316 = vmatmul.f32.gmra.mxu0 %v4358_v14 }
 0x2fe   : > { %1290 = vmatmul.f32.gmra.mxu3 %v1236_v63  ;;  %1348 = vmatmul.f32.gmra.mxu1 %v1236_v63 }
 0x303   : > { %1261 = vmatmul.f32.gmra.mxu2 %v1235_v29  ;;  %1319 = vmatmul.f32.gmra.mxu0 %v1235_v29 }
 0x306   : > { %1293 = vmatmul.f32.gmra.mxu3 %v1238_v56  ;;  %1351 = vmatmul.f32.gmra.mxu1 %v1238_v56 }
 0x30b   : > { %1264 = vmatmul.f32.gmra.mxu2 %v1237_v26  ;;  %1322 = vmatmul.f32.gmra.mxu0 %v1237_v26 }
 0x36b   : > { %v1343_v44 = vpop.f32.mrf.mxu1 }
 0x370   : > { %v1314_v36 = vpop.f32.mrf.mxu0 }
 0x371   : > { %v1285_v15 = vpop.f32.mrf.mxu3  ;;  %v1344_v62 = vadd.f32 %v1343_v44, %v1314_v36  ;;  %v4452_v44 = vld [vmem:[%s3187_s19 + $0x4d8] sm:$0xff] }
 0x372   : > { %v4457_v36 = vld [vmem:[%s3187_s19 + $0x5d8] sm:$0xff] }
 0x373   : > { %v1346_v4 = vpop.f32.mrf.mxu1 }
 0x376   : > { %v1256_v24 = vpop.f32.mrf.mxu2 }
 0x377   : > { %v1286_v51 = vadd.f32 %v1285_v15, %v1256_v24  ;;  %v4460_v15 = vld [vmem:[%s3187_s19 + $0x4c0] sm:$0xff]  ;;  %v4468_v24 = vld [vmem:[%s3187_s19 + $0x4c8] sm:$0xff] }
 0x378   : > { %v1317_v17 = vpop.f32.mrf.mxu0 }
 0x379   : > { %v1288_v19 = vpop.f32.mrf.mxu3  ;;  %v1347_v22 = vadd.f32 %v1346_v4, %v1317_v17  ;;  %v4463_v4 = vld [vmem:[%s3187_s19 + $0x5c0] sm:$0xff]  ;;  %v4471_v17 = vld [vmem:[%s3187_s19 + $0x5c8] sm:$0xff] }
 0x37b   : > { %v1349_v23 = vpop.f32.mrf.mxu1 }
 0x37e   : > { %v1259_v20 = vpop.f32.mrf.mxu2 }
 0x37f   : > { %v1289_v40 = vadd.f32 %v1288_v19, %v1259_v20  ;;  %v4474_v19 = vld [vmem:[%s3187_s19 + $0x4b0] sm:$0xff]  ;;  %v4482_v20 = vld [vmem:[%s3187_s19 + $0x4b8] sm:$0xff] }
 0x380   : > { %v1320_v60 = vpop.f32.mrf.mxu0 }
 0x381   : > { %v1291_v28 = vpop.f32.mrf.mxu3  ;;  %v1350_v52 = vadd.f32 %v1349_v23, %v1320_v60  ;;  %v4479_v23 = vld [vmem:[%s3187_s19 + $0x5b0] sm:$0xff]  ;;  %v4485_v60 = vld [vmem:[%s3187_s19 + $0x5b8] sm:$0xff] }
 0x383   : > { %v1352_v37 = vpop.f32.mrf.mxu1 }
 0x386   : > { %v1262_v18 = vpop.f32.mrf.mxu2 }
 0x387   : > { %v1292_v34 = vadd.f32 %v1291_v28, %v1262_v18  ;;  %v4492_v28 = vld [vmem:[%s3187_s19 + $0x4a0] sm:$0xff] }
 0x388   : > { %v1323_v61 = vpop.f32.mrf.mxu0  ;;  %v4495_v18 = vld [vmem:[%s3187_s19 + $0x5a0] sm:$0xff] }
 0x389   : > { %v1353_v35 = vadd.f32 %v1352_v37, %v1323_v61  ;;  %v1294_v59 = vpop.f32.mrf.mxu3  ;;  %v4498_v37 = vld [vmem:[%s3187_s19 + $0x4a8] sm:$0xff] }
 0x38a   : > { %v4503_v61 = vld [vmem:[%s3187_s19 + $0x5a8] sm:$0xff] }
 0x38b   : > { %1416 = vmatpush.msrb.mxu3 %v1353_v35  ;;  %v4510_v35 = vld [vmem:[%s3187_s19 + $0x490] sm:$0xff] }
 0x38d   : > { %1417 = vmatpush.msrb.mxu3 %v1350_v52  ;;  %v4513_v52 = vld [vmem:[%s3187_s19 + $0x590] sm:$0xff] }
 0x38e   : > { %v1265_v32 = vpop.f32.mrf.mxu2 }
 0x38f   : > { %v1295_v12 = vadd.f32 %v1294_v59, %v1265_v32  ;;  %1418 = vmatpush.msrb.mxu3 %v1347_v22  ;;  %v4516_v22 = vld [vmem:[%s3187_s19 + $0x498] sm:$0xff]  ;;  %v4524_v32 = vld [vmem:[%s3187_s19 + $0x480] sm:$0xff] }
 0x390   : > { %v4521_v59 = vld [vmem:[%s3187_s19 + $0x598] sm:$0xff] }
 0x391   : > { %1387 = vmatpush.msrb.mxu2 %v1295_v12  ;;  %1419 = vmatpush.msrb.mxu3 %v1344_v62  ;;  %v4527_v62 = vld [vmem:[%s3187_s19 + $0x580] sm:$0xff]  ;;  %v4532_v12 = vld [vmem:[%s3187_s19 + $0x488] sm:$0xff] }
 0x393   : > { %1388 = vmatpush.msrb.mxu2 %v1292_v34  ;;  %1420 = vmatpush.msrb.mxu3 %v1238_v56  ;;  %v4441_v56 = vld [vmem:[%s3187_s19 + $0x5e8] sm:$0xff] }
 0x394   : > { %v4535_v34 = vld [vmem:[%s3187_s19 + $0x588] sm:$0xff] }
 0x395   : > { %1389 = vmatpush.msrb.mxu2 %v1289_v40  ;;  %1421 = vmatpush.msrb.mxu3 %v1236_v63  ;;  %v2846_v63 = vld [vmem:[%s3362_s1 + $0x30] sm:$0xff]  ;;  %v4538_v40 = vld [vmem:[%s3187_s19 + $0x470] sm:$0xff] }
 0x397   : > { %1390 = vmatpush.msrb.mxu2 %v1286_v51  ;;  %1422 = vmatpush.msrb.mxu3 %v4343_v25  ;;  %v2837_v25 = vld [vmem:[%s3187_s19 + $0x3d8] sm:$0xff]  ;;  %v4543_v51 = vld [vmem:[%s3187_s19 + $0x570] sm:$0xff] }
 0x399   : > { %1391 = vmatpush.msrb.mxu2 %v1237_v26  ;;  %1423 = vmatpush.msrb.mxu3 %v4321_v58  ;;  %v2838_v58 = vld [vmem:[%s3187_s19 + $0x2f8] sm:$0xff]  ;;  %v4449_v26 = vld [vmem:[%s3187_s19 + $0x5d0] sm:$0xff] }
 0x39a   : > { %2578 = vmatmul.msk.f32.vlgmr.msrb.gmra.mxu3 %vm674_vm8, %v2834_v43 }
 0x39b   : > { %1392 = vmatpush.msrb.mxu2 %v1235_v29  ;;  %1548 = vmatpush.msra.mxu3 %v2835_v57  ;;  %v4417_v29 = vld [vmem:[%s3187_s19 + $0x5f0] sm:$0xff]  ;;  %v4549_v57 = vld [vmem:[%s3187_s19 + $0x578] sm:$0xff] }
 0x39c   : > { %1761 = vmatpush.msrb.mxu1 %v4417_v29  ;;  %5301 = vst [vmem:[#allocation29_spill] sm:$0xff] %v4549_v57 }
 0x39d   : > { %1393 = vmatpush.msrb.mxu2 %v4358_v14  ;;  %1549 = vmatpush.msra.mxu3 %v2836_v42  ;;  %v2844_v14 = vld [vmem:[%s3187_s19 + $0x2c8] sm:$0xff] }
 0x39f   : > { %1394 = vmatpush.msrb.mxu2 %v4330_v27  ;;  %1550 = vmatpush.msra.mxu3 %v2837_v25  ;;  %v2843_v27 = vld [vmem:[%s3187_s19 + $0x2d8] sm:$0xff] }
 0x3a0   : > { %2574 = vmatmul.msk.f32.vlgmr.msrb.gmra.mxu2 %vm674_vm8, %v2834_v43  ;;  %v4546_v43 = vld [vmem:[%s3187_s19 + $0x478] sm:$0xff] }
 0x3a1   : > { %1519 = vmatpush.msra.mxu2 %v2838_v58  ;;  %1551 = vmatpush.msra.mxu3 %v2839_v41  ;;  %v4557_v58 = vld [vmem:[%s3187_s19 + $0x460] sm:$0xff] }
 0x3a2   : > { %2579 = vmatmul.msk.f32.gmra.mxu3 %vm674_vm8, %v2840_v1  ;;  %v4560_v41 = vld [vmem:[%s3187_s19 + $0x560] sm:$0xff] }
 0x3a3   : > { %1520 = vmatpush.msra.mxu2 %v2841_v30  ;;  %1552 = vmatpush.msra.mxu3 %v2842_v31  ;;  %v4568_v30 = vld [vmem:[%s3187_s19 + $0x568] sm:$0xff]  ;;  %v4571_v31 = vld [vmem:[%s3187_s19 + $0x450] sm:$0xff] }
 0x3a4   : > { %5302 = vst [vmem:[#allocation25_spill] sm:$0xff] %v4568_v30 }
 0x3a5   : > { %1521 = vmatpush.msra.mxu2 %v2843_v27  ;;  %1553 = vmatpush.msra.mxu3 %v3903_v11  ;;  %v5292_v11 = vld [vmem:[#allocation23_spill] sm:$0xff]  ;;  %v4574_v27 = vld [vmem:[%s3187_s19 + $0x550] sm:$0xff] }
 0x3a7   : > { %1522 = vmatpush.msra.mxu2 %v2844_v14  ;;  %1554 = vmatpush.msra.mxu3 %v3919_v3  ;;  %v2849_v3 = vld [vmem:[%s3362_s1 + $0x38] sm:$0xff] }
 0x3a8   : > { %2575 = vmatmul.msk.f32.gmra.mxu2 %vm674_vm8, %v2840_v1  ;;  %v4563_v1 = vld [vmem:[%s3187_s19 + $0x468] sm:$0xff] }
 0x3a9   : > { %1523 = vmatpush.msra.mxu2 %v2845_v45  ;;  %1555 = vmatpush.msra.mxu3 %v3939_v48  ;;  %v5293_v48 = vld [vmem:[#allocation14_spill] sm:$0xff] }
 0x3aa   : > { %2580 = vmatmul.msk.f32.gmra.mxu3 %vm674_vm8, %v2846_v63  ;;  %v4581_v45 = vld [vmem:[%s3187_s19 + $0x458] sm:$0xff] }
 0x3ab   : > { %1524 = vmatpush.msra.mxu2 %v2847_v7  ;;  %1556 = vmatpush.msra.mxu3 %v3955_v54  ;;  %v5294_v54 = vld [vmem:[#allocation28_spill] sm:$0xff] }
 0x3ad   : > { %1525 = vmatpush.msra.mxu2 %v2848_v16  ;;  %1557 = vmatpush.msra.mxu3 %v3971_v47  ;;  %v5295_v47 = vld [vmem:[#allocation15_spill] sm:$0xff] }
 0x3ae   : > { %v4591_v16 = vld [vmem:[%s3187_s19 + $0x440] sm:$0xff] }
 0x3af   : > { %1526 = vmatpush.msra.mxu2 %v3932_v39  ;;  %1558 = vmatpush.msra.mxu3 %v3986_v38  ;;  %v5296_v39 = vld [vmem:[#allocation32_spill] sm:$0xff] }
 0x3b0   : > { %2576 = vmatmul.msk.f32.gmra.mxu2 %vm674_vm8, %v2846_v63  ;;  %v5297_v38 = vld [vmem:[#allocation16_spill] sm:$0xff]  ;;  %v4584_v63 = vld [vmem:[%s3187_s19 + $0x558] sm:$0xff] }
 0x3b1   : > { %1527 = vmatpush.msra.mxu2 %v3950_v53  ;;  %1559 = vmatpush.msra.mxu3 %v5292_v11  ;;  %v5298_v53 = vld [vmem:[#allocation36_spill] sm:$0xff]  ;;  %5303 = vst [vmem:[#allocation38_spill] sm:$0xff] %v4584_v63  ;;  %v4594_v11 = vld [vmem:[%s3187_s19 + $0x540] sm:$0xff] }
 0x3b2   : > { %2581 = vmatmul.msk.f32.gmra.mxu3 %vm674_vm8, %v2849_v3  ;;  %5305 = vst [vmem:[#allocation14_spill] sm:$0xff] %v4594_v11 }
 0x3b3   : > { %1528 = vmatpush.msra.mxu2 %v5293_v48  ;;  %1560 = vmatpush.msra.mxu3 %v5294_v54  ;;  %v4599_v48 = vld [vmem:[%s3187_s19 + $0x448] sm:$0xff] }
 0x3b4   : > { %5306 = vst [vmem:[#allocation28_spill] sm:$0xff] %v4599_v48  ;;  %v4602_v54 = vld [vmem:[%s3187_s19 + $0x548] sm:$0xff] }
 0x3b5   : > { %1529 = vmatpush.msra.mxu2 %v5295_v47  ;;  %1561 = vmatpush.msra.mxu3 %v5296_v39  ;;  %5307 = vst [vmem:[#allocation15_spill] sm:$0xff] %v4602_v54  ;;  %v4608_v39 = vld [vmem:[%s3187_s19 + $0x430] sm:$0xff] }
 0x3b7   : > { %1530 = vmatpush.msra.mxu2 %v5297_v38  ;;  %1562 = vmatpush.msra.mxu3 %v5298_v53  ;;  %v4611_v38 = vld [vmem:[%s3187_s19 + $0x530] sm:$0xff] }
 0x3b8   : > { %2577 = vmatmul.msk.f32.gmra.mxu2 %vm674_vm8, %v2849_v3  ;;  %5308 = vst [vmem:[#allocation32_spill] sm:$0xff] %v4611_v38 }
 0x3b9   : > { %1531 = vmatpush.msra.mxu2 %v5299_v5  ;;  %1563 = vmatpush.msra.mxu3 %v4081_v50  ;;  %v4425_v50 = vld [vmem:[%s3187_s19 + $0x5f8] sm:$0xff] }
 0x3ba   : > { %5300 = vst [vmem:[#allocation27_spill] sm:$0xff] %v4425_v50  ;;  %v4616_v5 = vld [vmem:[%s3187_s19 + $0x438] sm:$0xff] }
 0x3bb   : > { %1532 = vmatpush.msra.mxu2 %v5256_v10  ;;  %1801 = vmatpush.msrb.mxu3 %v4425_v50  ;;  %v4433_v10 = vld [vmem:[%s3187_s19 + $0x5e0] sm:$0xff]  ;;  %5309 = vst [vmem:[#allocation16_spill] sm:$0xff] %v4616_v5 }
 0x3bc   : > { %1762 = vmatpush.msrb.mxu1 %v4433_v10 }
 0x3bd   : > { %1533 = vmatpush.msra.mxu2 %v5260_v0  ;;  %v4430_v0 = vld [vmem:[%s3187_s19 + $0x4e0] sm:$0xff]  ;;  %1802 = vmatpush.msrb.mxu3 %v4441_v56 }
 0x3be   : > { %1742 = vmatpush.msrb.mxu0 %v4430_v0  ;;  %1763 = vmatpush.msrb.mxu1 %v4449_v26 }
 0x3bf   : > { %1534 = vmatpush.msra.mxu2 %v4078_v9  ;;  %v4436_v9 = vld [vmem:[%s3187_s19 + $0x4e8] sm:$0xff]  ;;  %1803 = vmatpush.msrb.mxu3 %v4457_v36 }
 0x3c0   : > { %1743 = vmatpush.msrb.mxu0 %v4446_v21  ;;  %1764 = vmatpush.msrb.mxu1 %v4463_v4 }
 0x3c1   : > { %1781 = vmatpush.msrb.mxu2 %v4420_v6  ;;  %1804 = vmatpush.msrb.mxu3 %v4471_v17 }
 0x3c2   : > { %1744 = vmatpush.msrb.mxu0 %v4460_v15  ;;  %1765 = vmatpush.msrb.mxu1 %v4479_v23 }
 0x3c3   : > { %1782 = vmatpush.msrb.mxu2 %v4436_v9  ;;  %1805 = vmatpush.msrb.mxu3 %v4485_v60 }
 0x3c4   : > { %1745 = vmatpush.msrb.mxu0 %v4474_v19  ;;  %1766 = vmatpush.msrb.mxu1 %v4495_v18 }
 0x3c5   : > { %1783 = vmatpush.msrb.mxu2 %v4452_v44  ;;  %1806 = vmatpush.msrb.mxu3 %v4503_v61 }
 0x3c6   : > { %1746 = vmatpush.msrb.mxu0 %v4492_v28  ;;  %1767 = vmatpush.msrb.mxu1 %v4513_v52 }
 0x3c7   : > { %1784 = vmatpush.msrb.mxu2 %v4468_v24  ;;  %1807 = vmatpush.msrb.mxu3 %v4521_v59 }
 0x3c8   : > { %1747 = vmatpush.msrb.mxu0 %v4510_v35  ;;  %1768 = vmatpush.msrb.mxu1 %v4527_v62 }
 0x3c9   : > { %1785 = vmatpush.msrb.mxu2 %v4482_v20  ;;  %1808 = vmatpush.msrb.mxu3 %v4535_v34 }
 0x3ca   : > { %1748 = vmatpush.msrb.mxu0 %v4524_v32  ;;  %1769 = vmatpush.msrb.mxu1 %v4543_v51 }
 0x3cb   : > { %1786 = vmatpush.msrb.mxu2 %v4498_v37  ;;  %1809 = vmatpush.msrb.mxu3 %v4549_v57 }
 0x3cc   : > { %1749 = vmatpush.msrb.mxu0 %v4538_v40  ;;  %1770 = vmatpush.msrb.mxu1 %v4560_v41 }
 0x3cd   : > { %1787 = vmatpush.msrb.mxu2 %v4516_v22  ;;  %1810 = vmatpush.msrb.mxu3 %v4568_v30 }
 0x3ce   : > { %1750 = vmatpush.msrb.mxu0 %v4557_v58  ;;  %1771 = vmatpush.msrb.mxu1 %v4574_v27 }
 0x3cf   : > { %1788 = vmatpush.msrb.mxu2 %v4532_v12  ;;  %1811 = vmatpush.msrb.mxu3 %v4584_v63 }
 0x3d0   : > { %1751 = vmatpush.msrb.mxu0 %v4571_v31  ;;  %1772 = vmatpush.msrb.mxu1 %v4594_v11  ;;  %v4677_v11 = vld [vmem:[%s3187_s19 + $0x508] sm:$0xff] }
 0x3d1   : > { %1789 = vmatpush.msrb.mxu2 %v4546_v43  ;;  %1812 = vmatpush.msrb.mxu3 %v4602_v54 }
 0x3d2   : > { %1752 = vmatpush.msrb.mxu0 %v4591_v16  ;;  %1773 = vmatpush.msrb.mxu1 %v4611_v38  ;;  %v4660_v38 = vld [vmem:[%s3187_s19 + $0x518] sm:$0xff] }
 0x3d3   : > { %1790 = vmatpush.msrb.mxu2 %v4563_v1  ;;  %5319 = vst [vmem:[#allocation51_spill] sm:$0xff] %v4660_v38 }
 0x3d4   : > { %1753 = vmatpush.msrb.mxu0 %v4608_v39  ;;  %1774 = vmatpush.msrb.mxu1 %v4630_v46  ;;  %v4669_v46 = vld [vmem:[%s3187_s19 + $0x500] sm:$0xff] }
 0x3d5   : > { %1791 = vmatpush.msrb.mxu2 %v4581_v45 }
 0x3d7   : > { %1792 = vmatpush.msrb.mxu2 %v4599_v48 }
 0x3d9   : > { %1793 = vmatpush.msrb.mxu2 %v4616_v5 }
 0x41d   : > { %v1425_v42 = vpop.f32.mrf.mxu3 }
 0x41e   : > { %v1426_v25 = vadd.f32 %v1425_v42, %v4260_v49  ;;  %v4619_v42 = vld [vmem:[%s3187_s19 + $0x538] sm:$0xff] }
 0x41f   : > { %5310 = vst [vmem:[#allocation36_spill] sm:$0xff] %v4619_v42  ;;  %1813 = vmatpush.msrb.mxu3 %v4619_v42 }
 0x420   : > { %vm1438_vm12 = vcmp.ge.f32.partialorder %v1426_v25, 0.0  ;;  %v1446_v14 = vmul.f32 0.01, %v1426_v25 }
 0x421   : > { %1814 = vmatpush.msrb.mxu3 %v4642_v13 }
 0x422   : > { %v4586_v7 = vsel %vm1438_vm12, %v1426_v25, %v1446_v14  ;;  %v5311_v25 = vld [vmem:[#allocation34_spill] sm:$0xff] }
 0x423   : > { %5304 = vst [vmem:[#allocation23_spill] sm:$0xff] %v4586_v7  ;;  %v1396_v3 = vpop.f32.mrf.mxu2  ;;  %1506 = vmatmul.f32.vlgmr.msra.gmra.mxu1 %v4586_v7  ;;  %1564 = vmatmul.f32.vlgmr.msra.gmra.mxu3 %v4586_v7 }
 0x424   : > { %v1397_v47 = vadd.f32 %v1396_v3, %v4260_v49  ;;  %v4627_v3 = vld [vmem:[%s3187_s19 + $0x420] sm:$0xff]  ;;  %1815 = vmatpush.msrb.mxu3 %v4660_v38 }
 0x425   : > { %v1428_v53 = vpop.f32.mrf.mxu3  ;;  %1754 = vmatpush.msrb.mxu0 %v4627_v3 }
 0x426   : > { %vm1437_vm13 = vcmp.ge.f32.partialorder %v1397_v47, 0.0  ;;  %v1445_v49 = vmul.f32 0.01, %v1397_v47  ;;  %v1429_v14 = vadd.f32 %v1428_v53, %v5311_v25  ;;  %v4639_v53 = vld [vmem:[%s3187_s19 + $0x428] sm:$0xff]  ;;  %1816 = vmatpush.msrb.mxu3 %v4677_v11 }
 0x427   : > { %5314 = vst [vmem:[#allocation46_spill] sm:$0xff] %v4639_v53  ;;  %1794 = vmatpush.msrb.mxu2 %v4639_v53 }
 0x428   : > { %v1448_v55 = vmul.f32 0.01, %v1429_v14  ;;  %v4632_v8 = vsel %vm1437_vm13, %v1397_v47, %v1445_v49  ;;  %vm1440_vm14 = vcmp.ge.f32.partialorder %v1429_v14, 0.0  ;;  %v4649_v47 = vld [vmem:[%s3187_s19 + $0x410] sm:$0xff]  ;;  %2018 = vmatpush.msra.mxu3 %v4425_v50 }
 0x429   : > { %5313 = vst [vmem:[#allocation34_spill] sm:$0xff] %v4632_v8  ;;  %1477 = vmatmul.f32.vlgmr.msra.gmra.mxu0 %v4632_v8  ;;  %1535 = vmatmul.f32.vlgmr.msra.gmra.mxu2 %v4632_v8  ;;  %v4652_v49 = vld [vmem:[%s3187_s19 + $0x510] sm:$0xff]  ;;  %v4657_v8 = vld [vmem:[%s3187_s19 + $0x418] sm:$0xff] }
 0x42a   : > { %v4644_v7 = vsel %vm1440_vm14, %v1429_v14, %v1448_v55  ;;  %5317 = vst [vmem:[#allocation49_spill] sm:$0xff] %v4649_v47  ;;  %v4666_v14 = vld [vmem:[%s3187_s19 + $0x400] sm:$0xff]  ;;  %1755 = vmatpush.msrb.mxu0 %v4649_v47  ;;  %1775 = vmatpush.msrb.mxu1 %v4652_v49 }
 0x42b   : > { %5316 = vst [vmem:[#allocation48_spill] sm:$0xff] %v4644_v7  ;;  %v1399_v42 = vpop.f32.mrf.mxu2  ;;  %1509 = vmatmul.f32.gmra.mxu1 %v4644_v7  ;;  %1567 = vmatmul.f32.gmra.mxu3 %v4644_v7  ;;  %v4674_v7 = vld [vmem:[%s3187_s19 + $0x408] sm:$0xff] }
 0x42c   : > { %5318 = vst [vmem:[#allocation50_spill] sm:$0xff] %v4657_v8  ;;  %v1400_v55 = vadd.f32 %v1399_v42, %v5311_v25  ;;  %v5320_v42 = vld [vmem:[#allocation20_spill] sm:$0xff]  ;;  %1795 = vmatpush.msrb.mxu2 %v4657_v8  ;;  %1756 = vmatpush.msrb.mxu0 %v4666_v14 }
 0x42d   : > { %v1431_v54 = vpop.f32.mrf.mxu3  ;;  %1776 = vmatpush.msrb.mxu1 %v4669_v46  ;;  %2019 = vmatpush.msra.mxu3 %v4441_v56 }
 0x42e   : > { %vm1439_vm15 = vcmp.ge.f32.partialorder %v1400_v55, 0.0  ;;  %v1447_v63 = vmul.f32 0.01, %v1400_v55  ;;  %v1432_v25 = vadd.f32 %v1431_v54, %v5320_v42  ;;  %1796 = vmatpush.msrb.mxu2 %v4674_v7  ;;  %1931 = vmatpush.msra.mxu0 %v4414_v2 }
 0x42f   : > { %1960 = vmatpush.msra.mxu1 %v4417_v29  ;;  %2020 = vmatpush.msra.mxu3 %v4457_v36 }
 0x430   : > { %v1450_v13 = vmul.f32 0.01, %v1432_v25  ;;  %v4684_v47 = vsel %vm1439_vm15, %v1400_v55, %v1447_v63  ;;  %vm1442_vm0 = vcmp.ge.f32.partialorder %v1432_v25, 0.0  ;;  %1989 = vmatpush.msra.mxu2 %v4420_v6  ;;  %1932 = vmatpush.msra.mxu0 %v4430_v0 }
 0x431   : > { %1480 = vmatmul.f32.gmra.mxu0 %v4684_v47  ;;  %1538 = vmatmul.f32.gmra.mxu2 %v4684_v47 }
 0x432   : > { %v4690_v54 = vsel %vm1442_vm0, %v1432_v25, %v1450_v13  ;;  %1990 = vmatpush.msra.mxu2 %v4436_v9  ;;  %1933 = vmatpush.msra.mxu0 %v4446_v21 }
 0x433   : > { %v1402_v38 = vpop.f32.mrf.mxu2  ;;  %1512 = vmatmul.f32.gmra.mxu1 %v4690_v54  ;;  %1570 = vmatmul.f32.gmra.mxu3 %v4690_v54 }
 0x434   : > { %v1403_v63 = vadd.f32 %v1402_v38, %v5320_v42  ;;  %1991 = vmatpush.msra.mxu2 %v4452_v44  ;;  %1961 = vmatpush.msra.mxu1 %v4433_v10 }
 0x435   : > { %v1434_v55 = vpop.f32.mrf.mxu3  ;;  %1934 = vmatpush.msra.mxu0 %v4460_v15  ;;  %2021 = vmatpush.msra.mxu3 %v4471_v17 }
 0x436   : > { %vm1441_vm1 = vcmp.ge.f32.partialorder %v1403_v63, 0.0  ;;  %v1449_v13 = vmul.f32 0.01, %v1403_v63  ;;  %v1435_v25 = vadd.f32 %v1434_v55, %v4226_v33  ;;  %1992 = vmatpush.msra.mxu2 %v4468_v24  ;;  %1962 = vmatpush.msra.mxu1 %v4449_v26 }
 0x437   : > { %1935 = vmatpush.msra.mxu0 %v4474_v19  ;;  %2022 = vmatpush.msra.mxu3 %v4485_v60 }
 0x438   : > { %vm1444_vm2 = vcmp.ge.f32.partialorder %v1435_v25, 0.0  ;;  %v1452_v38 = vmul.f32 0.01, %v1435_v25  ;;  %v4706_v42 = vsel %vm1441_vm1, %v1403_v63, %v1449_v13  ;;  %1993 = vmatpush.msra.mxu2 %v4482_v20  ;;  %v2647_v63 = vld [vmem:[%s3197_s6 + $0x4] sm:$0x3]  ;;  %1963 = vmatpush.msra.mxu1 %v4463_v4 }
 0x439   : > { %1483 = vmatmul.f32.gmra.mxu0 %v4706_v42  ;;  %1541 = vmatmul.f32.gmra.mxu2 %v4706_v42 }
 0x43a   : > { %v4712_v55 = vsel %vm1444_vm2, %v1435_v25, %v1452_v38  ;;  %1936 = vmatpush.msra.mxu0 %v4492_v28  ;;  %1994 = vmatpush.msra.mxu2 %v4498_v37  ;;  %v4726_v38 = vperm.slane %v2647_v63, 1 }
 0x43b   : > { %v1405_v50 = vpop.f32.mrf.mxu2  ;;  %1515 = vmatmul.f32.gmra.mxu1 %v4712_v55  ;;  %1573 = vmatmul.f32.gmra.mxu3 %v4712_v55 }
 0x43c   : > { %v1406_v13 = vadd.f32 %v1405_v50, %v4226_v33  ;;  %1937 = vmatpush.msra.mxu0 %v4510_v35  ;;  %1995 = vmatpush.msra.mxu2 %v4516_v22  ;;  %v4742_v50 = vperm.slane %v2647_v63, 0  ;;  %v5321_v63 = vld [vmem:[#allocation38_spill] sm:$0xff] }
 0x43d   : > { %1964 = vmatpush.msra.mxu1 %v4479_v23  ;;  %2023 = vmatpush.msra.mxu3 %v4503_v61 }
 0x43e   : > { %v1451_v25 = vmul.f32 0.01, %v1406_v13  ;;  %vm1443_vm4 = vcmp.ge.f32.partialorder %v1406_v13, 0.0  ;;  %1938 = vmatpush.msra.mxu0 %v4524_v32  ;;  %1996 = vmatpush.msra.mxu2 %v4532_v12 }
 0x43f   : > { %1965 = vmatpush.msra.mxu1 %v4495_v18  ;;  %2024 = vmatpush.msra.mxu3 %v4521_v59 }
 0x440   : > { %v4730_v33 = vsel %vm1443_vm4, %v1406_v13, %v1451_v25  ;;  %1939 = vmatpush.msra.mxu0 %v4538_v40  ;;  %1997 = vmatpush.msra.mxu2 %v4546_v43  ;;  %v5322_v13 = vld [vmem:[#allocation49_spill] sm:$0xff]  ;;  %v5323_v25 = vld [vmem:[#allocation14_spill] sm:$0xff] }
 0x441   : > { %1486 = vmatmul.f32.gmra.mxu0 %v4730_v33  ;;  %1544 = vmatmul.f32.gmra.mxu2 %v4730_v33 }
 0x442   : > { %1940 = vmatpush.msra.mxu0 %v4557_v58  ;;  %1966 = vmatpush.msra.mxu1 %v4513_v52 }
 0x443   : > { %1777 = vmatmul.f32.vlgmr.msrb.gmra.mxu1 %v4726_v38  ;;  %1817 = vmatmul.f32.vlgmr.msrb.gmra.mxu3 %v4726_v38 }
 0x444   : > { %1998 = vmatpush.msra.mxu2 %v4563_v1  ;;  %1941 = vmatpush.msra.mxu0 %v4571_v31 }
 0x445   : > { %1967 = vmatpush.msra.mxu1 %v4527_v62  ;;  %2025 = vmatpush.msra.mxu3 %v4535_v34 }
 0x446   : > { %1999 = vmatpush.msra.mxu2 %v4581_v45  ;;  %1942 = vmatpush.msra.mxu0 %v4591_v16 }
 0x447   : > { %1968 = vmatpush.msra.mxu1 %v4543_v51  ;;  %2026 = vmatpush.msra.mxu3 %v4549_v57  ;;  %v5327_v57 = vld [vmem:[#allocation21_spill] sm:$0xff] }
 0x448   : > { %2000 = vmatpush.msra.mxu2 %v4599_v48  ;;  %1943 = vmatpush.msra.mxu0 %v4608_v39  ;;  %v5324_v48 = vld [vmem:[#allocation15_spill] sm:$0xff] }
 0x449   : > { %1757 = vmatmul.f32.vlgmr.msrb.gmra.mxu0 %v4742_v50  ;;  %1797 = vmatmul.f32.vlgmr.msrb.gmra.mxu2 %v4742_v50 }
 0x44a   : > { %1969 = vmatpush.msra.mxu1 %v4560_v41  ;;  %2001 = vmatpush.msra.mxu2 %v4616_v5  ;;  %v5325_v5 = vld [vmem:[#allocation32_spill] sm:$0xff] }
 0x44b   : > { %2027 = vmatpush.msra.mxu3 %v4568_v30  ;;  %1944 = vmatpush.msra.mxu0 %v4627_v3  ;;  %v5326_v30 = vld [vmem:[#allocation36_spill] sm:$0xff] }
 0x44c   : > { %1970 = vmatpush.msra.mxu1 %v4574_v27  ;;  %2002 = vmatpush.msra.mxu2 %v4639_v53  ;;  %v5328_v53 = vld [vmem:[#allocation47_spill] sm:$0xff] }
 0x44d   : > { %2028 = vmatpush.msra.mxu3 %v5321_v63  ;;  %1945 = vmatpush.msra.mxu0 %v5322_v13 }
 0x44e   : > { %1971 = vmatpush.msra.mxu1 %v5323_v25  ;;  %2003 = vmatpush.msra.mxu2 %v4657_v8  ;;  %v5329_v8 = vld [vmem:[#allocation51_spill] sm:$0xff] }
 0x44f   : > { %2029 = vmatpush.msra.mxu3 %v5324_v48  ;;  %1946 = vmatpush.msra.mxu0 %v4666_v14 }
 0x450   : > { %1972 = vmatpush.msra.mxu1 %v5325_v5  ;;  %2004 = vmatpush.msra.mxu2 %v4674_v7 }
 0x451   : > { %2030 = vmatpush.msra.mxu3 %v5326_v30 }
 0x452   : > { %1973 = vmatpush.msra.mxu1 %v5327_v57  ;;  %2153 = vmatpush.msrb.mxu2 %v4414_v2  ;;  %v1579_v2 = vpop.permute.xlu2 %1578 }
 0x453   : > { %2031 = vmatpush.msra.mxu3 %v5328_v53 }
 0x454   : > { %1974 = vmatpush.msra.mxu1 %v4652_v49  ;;  %2154 = vmatpush.msrb.mxu2 %v4430_v0 }
 0x455   : > { %2032 = vmatpush.msra.mxu3 %v5329_v8 }
 0x456   : > { %1975 = vmatpush.msra.mxu1 %v4669_v46  ;;  %2155 = vmatpush.msrb.mxu2 %v4446_v21  ;;  %v1587_v21 = vpop.permute.xlu1 %1586 }
 0x457   : > { %2033 = vmatpush.msra.mxu3 %v4677_v11 }
 0x458   : > { %2156 = vmatpush.msrb.mxu2 %v4460_v15 }
 0x459   : > { %2182 = vmatpush.msrb.mxu3 %v4417_v29 }
 0x45a   : > { %2157 = vmatpush.msrb.mxu2 %v4474_v19  ;;  %v1591_v29 = vpop.permute.xlu2 %1590 }
 0x45b   : > { %2183 = vmatpush.msrb.mxu3 %v4433_v10 }
 0x45c   : > { %2158 = vmatpush.msrb.mxu2 %v4492_v28 }
 0x45d   : > { %2184 = vmatpush.msrb.mxu3 %v4449_v26 }
 0x45e   : > { %2159 = vmatpush.msrb.mxu2 %v4510_v35  ;;  %v1603_v28 = vpop.permute.xlu1 %1602 }
 0x45f   : > { %2185 = vmatpush.msrb.mxu3 %v4463_v4 }
 0x460   : > { %2160 = vmatpush.msrb.mxu2 %v4524_v32 }
 0x461   : > { %2186 = vmatpush.msrb.mxu3 %v4479_v23 }
 0x462   : > { %2161 = vmatpush.msrb.mxu2 %v4538_v40  ;;  %v1607_v10 = vpop.permute.xlu2 %1606  ;;  %v1583_v40 = vpop.permute.xlu0 %1582 }
 0x463   : > { %2187 = vmatpush.msrb.mxu3 %v4495_v18 }
 0x464   : > { %2162 = vmatpush.msrb.mxu2 %v4557_v58 }
 0x465   : > { %2188 = vmatpush.msrb.mxu3 %v4513_v52 }
 0x466   : > { %2163 = vmatpush.msrb.mxu2 %v4571_v31 }
 0x467   : > { %2189 = vmatpush.msrb.mxu3 %v4527_v62 }
 0x468   : > { %2164 = vmatpush.msrb.mxu2 %v4591_v16 }
 0x469   : > { %2190 = vmatpush.msrb.mxu3 %v4543_v51  ;;  %v5330_v51 = vld [vmem:[#allocation34_spill] sm:$0xff] }
 0x46a   : > { %2165 = vmatpush.msrb.mxu2 %v4608_v39  ;;  %v4814_v19 = vpop.permute.xlu2 %2274 }
 0x46b   : > { %2191 = vmatpush.msrb.mxu3 %v4560_v41 }
 0x46c   : > { %2166 = vmatpush.msrb.mxu2 %v4627_v3 }
 0x46d   : > { %2192 = vmatpush.msrb.mxu3 %v4574_v27 }
 0x46e   : > { %2167 = vmatpush.msrb.mxu2 %v5322_v13 }
 0x46f   : > { %2193 = vmatpush.msrb.mxu3 %v5323_v25  ;;  %v5331_v25 = vld [vmem:[#allocation23_spill] sm:$0xff] }
 0x470   : > { %2168 = vmatpush.msrb.mxu2 %v4666_v14 }
 0x471   : > { %2194 = vmatpush.msrb.mxu3 %v5325_v5 }
 0x472   : > { %v4818_v5 = vpop.permute.xlu2 %2298 }
 0x473   : > { %2195 = vmatpush.msrb.mxu3 %v5327_v57  ;;  %v1595_v57 = vmul.f32 %v1583_v40, %v4684_v47  ;;  %v1597_v47 = vmul.f32 %v1587_v21, %v4706_v42 }
 0x475   : > { %2196 = vmatpush.msrb.mxu3 %v4652_v49 }
 0x477   : > { %2197 = vmatpush.msrb.mxu3 %v4669_v46  ;;  %v1593_v46 = vmul.f32 %v1579_v2, %v5330_v51 }
 0x4a0   : > { %v1507_v0 = vpop.f32.mrf.mxu1 }
 0x4a6   : > { %v1478_v26 = vpop.f32.mrf.mxu0  ;;  %v1565_v15 = vpop.f32.mrf.mxu3 }
 0x4a7   : > { %v1508_v23 = vadd.f32 %v1507_v0, %v1478_v26  ;;  %v1594_v0 = vmul.f32 %v1579_v2, %v5331_v25  ;;  %v5332_v26 = vld [vmem:[#allocation48_spill] sm:$0xff]  ;;  %v1598_v2 = vmul.f32 %v1587_v21, %v4690_v54 }
 0x4a8   : > { %v1510_v4 = vpop.f32.mrf.mxu1 }
 0x4a9   : > { %v1617_v32 = vmul.f32 %v1603_v28, %v1508_v23 }
 0x4ab   : > { %v1625_v27 = vadd.f32 %v1617_v32, %v1593_v46  ;;  %v5333_v32 = vld [vmem:[#allocation45_spill] sm:$0xff] }
 0x4ac   : > { %v1536_v18 = vpop.f32.mrf.mxu2 }
 0x4ad   : > { %v1566_v58 = vadd.f32 %v1565_v15, %v1536_v18 }
 0x4ae   : > { %v1481_v35 = vpop.f32.mrf.mxu0  ;;  %v1568_v52 = vpop.f32.mrf.mxu3 }
 0x4af   : > { %v1511_v62 = vadd.f32 %v1510_v4, %v1481_v35  ;;  %v1618_v3 = vmul.f32 %v1603_v28, %v1566_v58  ;;  %v1596_v4 = vmul.f32 %v1583_v40, %v5332_v26 }
 0x4b0   : > { %v1513_v31 = vpop.f32.mrf.mxu1 }
 0x4b1   : > { %v1619_v41 = vmul.f32 %v1607_v10, %v1511_v62  ;;  %v1626_v15 = vadd.f32 %v1618_v3, %v1594_v0 }
 0x4b3   : > { %v1627_v16 = vadd.f32 %v1619_v41, %v1595_v57 }
 0x4b4   : > { %v1539_v39 = vpop.f32.mrf.mxu2 }
 0x4b5   : > { %v1633_v49 = vadd.f32 %v1627_v16, %v1625_v27  ;;  %v1569_v14 = vadd.f32 %v1568_v52, %v1539_v39  ;;  %v1615_v16 = vpop.permute.xlu2 %1614 }
 0x4b6   : > { %v1484_v13 = vpop.f32.mrf.mxu0  ;;  %v1571_v51 = vpop.f32.mrf.mxu3 }
 0x4b7   : > { %v1620_v23 = vmul.f32 %v1607_v10, %v1569_v14  ;;  %v1514_v35 = vadd.f32 %v1513_v31, %v1484_v13  ;;  %v1599_v31 = vmul.f32 %v1591_v29, %v4730_v33  ;;  %v5334_v33 = vld [vmem:[#allocation17_spill] sm:$0xff] }
 0x4b8   : > { %v1516_v41 = vpop.f32.mrf.mxu1 }
 0x4b9   : > { %v1628_v18 = vadd.f32 %v1620_v23, %v1596_v4  ;;  %v1621_v62 = vmul.f32 %v5333_v32, %v1514_v35  ;;  %v1600_v23 = vmul.f32 %v1591_v29, %v4712_v55  ;;  %v5337_v29 = vld [vmem:[#allocation30_spill] sm:$0xff] }
 0x4bb   : > { %v1642_v46 = vadd.f32 %v1628_v18, %v1626_v15  ;;  %v1629_v57 = vadd.f32 %v1621_v62, %v1597_v47 }
 0x4bc   : > { %v1542_v28 = vpop.f32.mrf.mxu2 }
 0x4bd   : > { %v1634_v58 = vadd.f32 %v1633_v49, %v1629_v57  ;;  %v1572_v52 = vadd.f32 %v1571_v51, %v1542_v28 }
 0x4be   : > { %v1487_v27 = vpop.f32.mrf.mxu0  ;;  %v1574_v3 = vpop.f32.mrf.mxu3 }
 0x4bf   : > { %v1622_v10 = vmul.f32 %v5333_v32, %v1572_v52  ;;  %v1517_v40 = vadd.f32 %v1516_v41, %v1487_v27  ;;  %v1841_v32 = vmul.f32 %v5334_v33, %v4742_v50  ;;  %v5336_v41 = vld [vmem:[#allocation33_spill] sm:$0xff] }
 0x4c0   : > { %v1778_v0 = vpop.f32.mrf.mxu1 }
 0x4c1   : > { %v1630_v42 = vadd.f32 %v1622_v10, %v1598_v2  ;;  %v1623_v39 = vmul.f32 %v1615_v16, %v1517_v40  ;;  %v4834_v10 = vpop.permute.xlu0 %2278 }
 0x4c3   : > { %v1643_v14 = vadd.f32 %v1642_v46, %v1630_v42  ;;  %v1631_v13 = vadd.f32 %v1623_v39, %v1599_v31  ;;  %v5335_v46 = vld [vmem:[#allocation18_spill] sm:$0xff]  ;;  %v5338_v42 = vld [vmem:[#allocation31_spill] sm:$0xff] }
 0x4c4   : > { %v1545_v25 = vpop.f32.mrf.mxu2 }
 0x4c5   : > { %v1635_v26 = vadd.f32 %v1634_v58, %v1631_v13  ;;  %v1575_v4 = vadd.f32 %v1574_v3, %v1545_v25  ;;  %v1842_v13 = vmul.f32 %v5334_v33, %v4726_v38 }
 0x4c6   : > { %v1758_v49 = vpop.f32.mrf.mxu0  ;;  %v1818_v18 = vpop.f32.mrf.mxu3 }
 0x4c7   : > { %v1636_v35 = vrot.slane %v1635_v26, 4  ;;  %v1624_v51 = vmul.f32 %v1615_v16, %v1575_v4  ;;  %v1779_v54 = vadd.f32 %v1778_v0, %v1758_v49  ;;  %v1843_v16 = vmul.f32 %v5337_v29, %v4742_v50 }
 0x4c8   : > { %v1844_v49 = vmul.f32 %v5337_v29, %v4726_v38 }
 0x4c9   : > { %v1632_v21 = vadd.f32 %v1624_v51, %v1600_v23  ;;  %v1865_v47 = vperm.slane %v1779_v54, 0  ;;  %v1637_v15 = vadd.f32 %v1636_v35, %v1635_v26  ;;  %v5339_v23 = vld [vmem:[#allocation26_spill] sm:$0xff] }
 0x4ca   : > { %v1845_v35 = vmul.f32 %v5339_v23, %v4742_v50  ;;  %v5340_v51 = vld [vmem:[#allocation22_spill] sm:$0xff] }
 0x4cb   : > { %v1644_v62 = vadd.f32 %v1643_v14, %v1632_v21  ;;  %v1867_v57 = vmul.f32 %v1865_v47, %v5335_v46  ;;  %v1869_v28 = vmul.f32 %v1865_v47, %v5336_v41  ;;  %v1638_v52 = vrot.slane %v1637_v15, 2 }
 0x4cc   : > { %v1798_v58 = vpop.f32.mrf.mxu2  ;;  %v1871_v54 = vmul.f32 %v1865_v47, %v5340_v51 }
 0x4cd   : > { %v1819_v27 = vadd.f32 %v1818_v18, %v1798_v58  ;;  %v1645_v2 = vrot.slane %v1644_v62, 4  ;;  %v1875_v55 = vadd.f32 %v1867_v57, %v1841_v32  ;;  %v1639_v3 = vadd.f32 %v1638_v52, %v1637_v15  ;;  %v5341_v32 = vld [vmem:[#allocation19_spill] sm:$0xff] }
 0x4ce   : > { %v1877_v14 = vadd.f32 %v1869_v28, %v1843_v16  ;;  %v1846_v28 = vmul.f32 %v5339_v23, %v4726_v38  ;;  %v1653_v16 = vpop.permute.xlu0 %1652 }
 0x4cf   : > { %v4836_v40 = vperm.slane %v1819_v27, 0  ;;  %v1646_v31 = vadd.f32 %v1645_v2, %v1644_v62  ;;  %v1899_v39 = vadd.f32 %v5338_v42, %v1875_v55  ;;  %v1640_v15 = vrot.slane %v1639_v3, 1 }
 0x4d0   : > { %v1901_v62 = vadd.f32 %v5341_v32, %v1877_v14  ;;  %v1879_v55 = vadd.f32 %v1871_v54, %v1845_v35  ;;  %v5343_v14 = vld [vmem:[#allocation24_spill] sm:$0xff] }
 0x4d1   : > { %v1868_v25 = vmul.f32 %v4836_v40, %v5335_v46  ;;  %v1870_v0 = vmul.f32 %v4836_v40, %v5336_v41  ;;  %v1647_v26 = vrot.slane %v1646_v31, 2  ;;  %vm1907_vm6 = vcmp.ge.f32.partialorder %v1899_v39, 0.0 }
 0x4d2   : > { %v1915_v4 = vmul.f32 0.01, %v1899_v39  ;;  %v1641_v52 = vadd.f32 %v1640_v15, %v1639_v3  ;;  %v1917_v2 = vmul.f32 0.01, %v1901_v62  ;;  %v1872_v29 = vmul.f32 %v4836_v40, %v5340_v51 }
 0x4d3   : > { %v1876_v21 = vadd.f32 %v1868_v25, %v1842_v13  ;;  %v1648_v18 = vadd.f32 %v1647_v26, %v1646_v31  ;;  %v1878_v57 = vadd.f32 %v1870_v0, %v1844_v49  ;;  %vm1909_vm9 = vcmp.ge.f32.partialorder %v1901_v62, 0.0  ;;  %v5344_v13 = vld [vmem:[#allocation27_spill] sm:$0xff] }
 0x4d4   : > { %v4850_v33 = vsel %vm1907_vm6, %v1899_v39, %v1915_v4  ;;  %v5342_v39 = vld [vmem:[#allocation39_spill] sm:$0xff]  ;;  %v1655_v25 = vadd.f32 %v1653_v16, %v1641_v52  ;;  %v4872_v26 = vsel %vm1909_vm9, %v1901_v62, %v1917_v2  ;;  %v1880_v35 = vadd.f32 %v1872_v29, %v1846_v28  ;;  %v5350_v29 = vld [vmem:[#allocation25_spill] sm:$0xff] }
 0x4d5   : > { %1947 = vmatmul.f32.vlgmr.msra.gmra.mxu0 %v4850_v33  ;;  %2005 = vmatmul.f32.vlgmr.msra.gmra.mxu2 %v4850_v33  ;;  %v1900_v46 = vadd.f32 %v5338_v42, %v1876_v21  ;;  %v1649_v41 = vrot.slane %v1648_v18, 1  ;;  %v1847_v3 = vmul.f32 %v5342_v39, %v4742_v50  ;;  %v5345_v4 = vld [vmem:[#allocation35_spill] sm:$0xff]  ;;  %v1848_v51 = vmul.f32 %v5342_v39, %v4726_v38 }
 0x4d6   : > { %2672 = vmatpush.msra.mxu2 %v4420_v6  ;;  %v1902_v6 = vadd.f32 %v5341_v32, %v1878_v57  ;;  %v1903_v49 = vadd.f32 %v5345_v4, %v1879_v55  ;;  %v1874_v15 = vmul.f32 %v4836_v40, %v5343_v14  ;;  %v5347_v32 = vld [vmem:[#allocation41_spill] sm:$0xff]  ;;  %v5349_v55 = vld [vmem:[#allocation28_spill] sm:$0xff] }
 0x4d7   : > { %vm1908_vm7 = vcmp.ge.f32.partialorder %v1900_v46, 0.0  ;;  %v1916_v58 = vmul.f32 0.01, %v1900_v46  ;;  %v1650_v27 = vadd.f32 %v1649_v41, %v1648_v18 }
 0x4d8   : > { %2673 = vmatpush.msra.mxu2 %v4436_v9  ;;  %v1873_v9 = vmul.f32 %v1865_v47, %v5343_v14  ;;  %v1918_v23 = vmul.f32 0.01, %v1902_v6  ;;  %vm1910_vm10 = vcmp.ge.f32.partialorder %v1902_v6, 0.0  ;;  %v1919_v54 = vmul.f32 0.01, %v1903_v49 }
 0x4d9   : > { %v4862_v31 = vsel %vm1908_vm7, %v1900_v46, %v1916_v58  ;;  %v1656_v42 = vadd.f32 %v1653_v16, %v1650_v27  ;;  %vm1911_vm11 = vcmp.ge.f32.partialorder %v1903_v49, 0.0  ;;  %v1882_v46 = vadd.f32 %v1874_v15, %v1848_v51  ;;  %v5348_v27 = vld [vmem:[#allocation29_spill] sm:$0xff]  ;;  %v5351_v16 = vld [vmem:[#allocation16_spill] sm:$0xff] }
 0x4da   : > { %1976 = vmatmul.f32.vlgmr.msra.gmra.mxu1 %v4862_v31  ;;  %2034 = vmatmul.f32.vlgmr.msra.gmra.mxu3 %v4862_v31  ;;  %v1881_v21 = vadd.f32 %v1873_v9, %v1847_v3  ;;  %v4889_v18 = vsel %vm1910_vm10, %v1902_v6, %v1918_v23  ;;  %v4896_v38 = vsel %vm1911_vm11, %v1903_v49, %v1919_v54  ;;  %v5352_v6 = vld [vmem:[#allocation46_spill] sm:$0xff] }
 0x4db   : > { %2674 = vmatpush.msra.mxu2 %v4452_v44  ;;  %2688 = vmatpush.msra.mxu3 %v5344_v13  ;;  %v1659_v0 = vrot.slane %v1656_v42, 7  ;;  %v1906_v28 = vadd.f32 %v5347_v32, %v1882_v46  ;;  %v5353_v42 = vld [vmem:[#allocation50_spill] sm:$0xff] }
 0x4dc   : > { %v1905_v62 = vadd.f32 %v5347_v32, %v1881_v21 }
 0x4dd   : > { %1950 = vmatmul.f32.gmra.mxu0 %v4872_v26  ;;  %2008 = vmatmul.f32.gmra.mxu2 %v4872_v26  ;;  %v1660_v50 = vsel %vm964_vm3, %v1655_v25, %v1659_v0  ;;  %v1922_v52 = vmul.f32 0.01, %v1906_v28  ;;  %vm1914_vm14 = vcmp.ge.f32.partialorder %v1906_v28, 0.0 }
 0x4de   : > { %2675 = vmatpush.msra.mxu2 %v4468_v24  ;;  %2689 = vmatpush.msra.mxu3 %v4441_v56  ;;  %2582 = vst.msk [vmem:[%s4348_s30 + $0x2] sm:$0x3] %vm4333_vm5, %v1660_v50  ;;  %v1904_v56 = vadd.f32 %v5345_v4, %v1880_v35  ;;  %v1921_v57 = vmul.f32 0.01, %v1905_v62  ;;  %vm1913_vm13 = vcmp.ge.f32.partialorder %v1905_v62, 0.0 }
 0x4df   : > { %v1930_v2 = vsel %vm1914_vm14, %v1906_v28, %v1922_v52 }
 0x4e0   : > { %2676 = vmatpush.msra.mxu2 %v4482_v20  ;;  %2690 = vmatpush.msra.mxu3 %v4457_v36  ;;  %v1920_v40 = vmul.f32 0.01, %v1904_v56  ;;  %vm1912_vm12 = vcmp.ge.f32.partialorder %v1904_v56, 0.0  ;;  %v1929_v58 = vsel %vm1913_vm13, %v1905_v62, %v1921_v57 }
 0x4e2   : > { %1979 = vmatmul.f32.gmra.mxu1 %v4889_v18  ;;  %2037 = vmatmul.f32.gmra.mxu3 %v4889_v18  ;;  %v4905_v41 = vsel %vm1912_vm12, %v1904_v56, %v1920_v40 }
 0x4e3   : > { %2677 = vmatpush.msra.mxu2 %v4498_v37  ;;  %2691 = vmatpush.msra.mxu3 %v4471_v17 }
 0x4e5   : > { %1953 = vmatmul.f32.gmra.mxu0 %v4896_v38  ;;  %2011 = vmatmul.f32.gmra.mxu2 %v4896_v38 }
 0x4e6   : > { %2678 = vmatpush.msra.mxu2 %v4516_v22  ;;  %2692 = vmatpush.msra.mxu3 %v4485_v60 }
 0x4e8   : > { %2679 = vmatpush.msra.mxu2 %v4532_v12  ;;  %2693 = vmatpush.msra.mxu3 %v4503_v61 }
 0x4ea   : > { %1982 = vmatmul.f32.gmra.mxu1 %v4905_v41  ;;  %2040 = vmatmul.f32.gmra.mxu3 %v4905_v41 }
 0x4eb   : > { %2680 = vmatpush.msra.mxu2 %v4546_v43  ;;  %2694 = vmatpush.msra.mxu3 %v4521_v59 }
 0x4ed   : > { %1956 = vmatmul.f32.gmra.mxu0 %v1929_v58  ;;  %2014 = vmatmul.f32.gmra.mxu2 %v1929_v58 }
 0x4ee   : > { %2681 = vmatpush.msra.mxu2 %v4563_v1  ;;  %2695 = vmatpush.msra.mxu3 %v4535_v34 }
 0x4f0   : > { %2682 = vmatpush.msra.mxu2 %v4581_v45  ;;  %2696 = vmatpush.msra.mxu3 %v5348_v27 }
 0x4f2   : > { %1985 = vmatmul.f32.gmra.mxu1 %v1930_v2  ;;  %2043 = vmatmul.f32.gmra.mxu3 %v1930_v2 }
 0x4f3   : > { %2683 = vmatpush.msra.mxu2 %v5349_v55  ;;  %2697 = vmatpush.msra.mxu3 %v5350_v29 }
 0x4f5   : > { %2684 = vmatpush.msra.mxu2 %v5351_v16  ;;  %2698 = vmatpush.msra.mxu3 %v5321_v63 }
 0x4f7   : > { %2685 = vmatpush.msra.mxu2 %v5352_v6  ;;  %2699 = vmatpush.msra.mxu3 %v5324_v48 }
 0x4f9   : > { %2686 = vmatpush.msra.mxu2 %v5353_v42  ;;  %2700 = vmatpush.msra.mxu3 %v5326_v30 }
 0x4fb   : > { %2687 = vmatpush.msra.mxu2 %v4674_v7  ;;  %2701 = vmatpush.msra.mxu3 %v5328_v53 }
 0x4fd   : > { %2702 = vmatpush.msra.mxu3 %v5329_v8 }
 0x4ff   : > { %2703 = vmatpush.msra.mxu3 %v4677_v11 }
 0x552   : > { %v1948_v39 = vpop.f32.mrf.mxu0 }
 0x557   : > { %v1977_v3 = vpop.f32.mrf.mxu1 }
 0x558   : > { %v2006_v14 = vpop.f32.mrf.mxu2  ;;  %v1978_v40 = vadd.f32 %v1977_v3, %v1948_v39  ;;  %v2850_v39 = vld [vmem:[%s3362_s1 + $0x40] sm:$0xff] }
 0x55a   : > { %v1951_v9 = vpop.f32.mrf.mxu0 }
 0x55d   : > { %v2035_v13 = vpop.f32.mrf.mxu3 }
 0x55e   : > { %v2036_v52 = vadd.f32 %v2035_v13, %v2006_v14 }
 0x55f   : > { %v1980_v25 = vpop.f32.mrf.mxu1 }
 0x560   : > { %v2009_v0 = vpop.f32.mrf.mxu2  ;;  %v1981_v56 = vadd.f32 %v1980_v25, %v1951_v9 }
 0x562   : > { %v1954_v4 = vpop.f32.mrf.mxu0 }
 0x565   : > { %v2038_v49 = vpop.f32.mrf.mxu3 }
 0x566   : > { %v2039_v28 = vadd.f32 %v2038_v49, %v2009_v0  ;;  %v2271_v49 = vpop.permute.xlu1 %2270 }
 0x567   : > { %v1983_v23 = vpop.f32.mrf.mxu1 }
 0x568   : > { %v2012_v35 = vpop.f32.mrf.mxu2  ;;  %v1984_v15 = vadd.f32 %v1983_v23, %v1954_v4 }
 0x56a   : > { %v1957_v51 = vpop.f32.mrf.mxu0 }
 0x56d   : > { %v2041_v50 = vpop.f32.mrf.mxu3 }
 0x56e   : > { %v2042_v57 = vadd.f32 %v2041_v50, %v2012_v35 }
 0x56f   : > { %v1986_v54 = vpop.f32.mrf.mxu1 }
 0x570   : > { %v1987_v21 = vadd.f32 %v1986_v54, %v1957_v51  ;;  %v2015_v32 = vpop.f32.mrf.mxu2 }
 0x572   : > { %2079 = vmatpush.msrb.mxu0 %v1987_v21  ;;  %v2295_v21 = vpop.permute.xlu1 %2294 }
 0x574   : > { %2080 = vmatpush.msrb.mxu0 %v1984_v15 }
 0x575   : > { %v2044_v62 = vpop.f32.mrf.mxu3 }
 0x576   : > { %v2045_v46 = vadd.f32 %v2044_v62, %v2015_v32  ;;  %2081 = vmatpush.msrb.mxu0 %v1981_v56 }
 0x578   : > { %2082 = vmatpush.msrb.mxu0 %v1978_v40  ;;  %2108 = vmatpush.msrb.mxu1 %v2045_v46 }
 0x57a   : > { %2083 = vmatpush.msrb.mxu0 %v1929_v58  ;;  %2109 = vmatpush.msrb.mxu1 %v2042_v57  ;;  %v2851_v58 = vld [vmem:[%s3187_s19 + $0x4f8] sm:$0xff] }
 0x57c   : > { %2084 = vmatpush.msrb.mxu0 %v4896_v38  ;;  %2110 = vmatpush.msrb.mxu1 %v2039_v28  ;;  %v2852_v38 = vld [vmem:[%s3187_s19 + $0x4e8] sm:$0xff] }
 0x57e   : > { %2085 = vmatpush.msrb.mxu0 %v4872_v26  ;;  %2111 = vmatpush.msrb.mxu1 %v2036_v52  ;;  %v2854_v26 = vld [vmem:[%s3362_s1 + $0x48] sm:$0xff] }
 0x580   : > { %2086 = vmatpush.msrb.mxu0 %v4850_v33  ;;  %2112 = vmatpush.msrb.mxu1 %v1930_v2  ;;  %v2853_v33 = vld [vmem:[%s3187_s19 + $0x5f8] sm:$0xff] }
 0x581   : > { %2652 = vmatmul.msk.f32.vlgmr.msrb.gmra.mxu0 %vm674_vm8, %v2850_v39 }
 0x582   : > { %2113 = vmatpush.msrb.mxu1 %v4905_v41  ;;  %2211 = vmatpush.msra.mxu0 %v2851_v58  ;;  %v2855_v41 = vld [vmem:[%s3187_s19 + $0x5e8] sm:$0xff] }
 0x584   : > { %2114 = vmatpush.msrb.mxu1 %v4889_v18  ;;  %2212 = vmatpush.msra.mxu0 %v2852_v38 }
 0x586   : > { %2115 = vmatpush.msrb.mxu1 %v4862_v31  ;;  %2213 = vmatpush.msra.mxu0 %v4452_v44  ;;  %v2856_v44 = vld [vmem:[%s3362_s1 + $0x50] sm:$0xff] }
 0x587   : > { %2656 = vmatmul.msk.f32.vlgmr.msrb.gmra.mxu1 %vm674_vm8, %v2850_v39 }
 0x588   : > { %2240 = vmatpush.msra.mxu1 %v2853_v33  ;;  %2214 = vmatpush.msra.mxu0 %v4468_v24 }
 0x589   : > { %2653 = vmatmul.msk.f32.gmra.mxu0 %vm674_vm8, %v2854_v26 }
 0x58a   : > { %2241 = vmatpush.msra.mxu1 %v2855_v41  ;;  %2215 = vmatpush.msra.mxu0 %v4482_v20 }
 0x58c   : > { %2242 = vmatpush.msra.mxu1 %v4457_v36  ;;  %2216 = vmatpush.msra.mxu0 %v4498_v37  ;;  %v2857_v36 = vld [vmem:[%s3362_s1 + $0x58] sm:$0xff] }
 0x58e   : > { %2243 = vmatpush.msra.mxu1 %v4471_v17  ;;  %2217 = vmatpush.msra.mxu0 %v4516_v22  ;;  %v5354_v17 = vld [vmem:[#allocation42_spill] sm:$0xff] }
 0x58f   : > { %2657 = vmatmul.msk.f32.gmra.mxu1 %vm674_vm8, %v2854_v26 }
 0x590   : > { %2244 = vmatpush.msra.mxu1 %v4485_v60  ;;  %2218 = vmatpush.msra.mxu0 %v4532_v12 }
 0x591   : > { %2654 = vmatmul.msk.f32.gmra.mxu0 %vm674_vm8, %v2856_v44 }
 0x592   : > { %2245 = vmatpush.msra.mxu1 %v4503_v61  ;;  %2219 = vmatpush.msra.mxu0 %v4546_v43 }
 0x594   : > { %2246 = vmatpush.msra.mxu1 %v4521_v59  ;;  %2220 = vmatpush.msra.mxu0 %v4563_v1 }
 0x596   : > { %2247 = vmatpush.msra.mxu1 %v4535_v34  ;;  %2221 = vmatpush.msra.mxu0 %v4581_v45 }
 0x597   : > { %2658 = vmatmul.msk.f32.gmra.mxu1 %vm674_vm8, %v2856_v44 }
 0x598   : > { %2248 = vmatpush.msra.mxu1 %v5348_v27  ;;  %2222 = vmatpush.msra.mxu0 %v5349_v55 }
 0x599   : > { %2655 = vmatmul.msk.f32.gmra.mxu0 %vm674_vm8, %v2857_v36 }
 0x59a   : > { %2249 = vmatpush.msra.mxu1 %v5350_v29  ;;  %2223 = vmatpush.msra.mxu0 %v5351_v16 }
 0x59c   : > { %2250 = vmatpush.msra.mxu1 %v5321_v63  ;;  %2224 = vmatpush.msra.mxu0 %v5352_v6  ;;  %v5357_v6 = vld [vmem:[#allocation43_spill] sm:$0xff] }
 0x59e   : > { %2251 = vmatpush.msra.mxu1 %v5324_v48  ;;  %2225 = vmatpush.msra.mxu0 %v5353_v42 }
 0x59f   : > { %2659 = vmatmul.msk.f32.gmra.mxu1 %vm674_vm8, %v2857_v36 }
 0x5a0   : > { %2252 = vmatpush.msra.mxu1 %v5326_v30  ;;  %2226 = vmatpush.msra.mxu0 %v4674_v7 }
 0x5a2   : > { %2253 = vmatpush.msra.mxu1 %v5328_v53  ;;  %v5356_v53 = vld [vmem:[#allocation44_spill] sm:$0xff] }
 0x5a4   : > { %2254 = vmatpush.msra.mxu1 %v5329_v8  ;;  %v5355_v8 = vld [vmem:[#allocation40_spill] sm:$0xff] }
 0x5a6   : > { %2255 = vmatpush.msra.mxu1 %v4677_v11 }
 0x5fe   : > { %v2088_v24 = vpop.f32.mrf.mxu0 }
 0x5ff   : > { %v2089_v20 = vadd.f32 %v2088_v24, %v5354_v17 }
 0x601   : > { %vm2129_vm15 = vcmp.ge.f32.partialorder %v2089_v20, 0.0  ;;  %v2137_v60 = vmul.f32 0.01, %v2089_v20 }
 0x603   : > { %v4979_v37 = vsel %vm2129_vm15, %v2089_v20, %v2137_v60  ;;  %v2303_v20 = vpop.permute.xlu1 %2302 }
 0x604   : > { %v2117_v61 = vpop.f32.mrf.mxu1  ;;  %2169 = vmatmul.f32.vlgmr.msrb.gmra.mxu2 %v4979_v37  ;;  %2227 = vmatmul.f32.vlgmr.msra.gmra.mxu0 %v4979_v37  ;;  %v2285_v36 = vmul.f32 %v2271_v49, %v4979_v37 }
 0x605   : > { %v2118_v22 = vadd.f32 %v2117_v61, %v5354_v17 }
 0x606   : > { %v2091_v59 = vpop.f32.mrf.mxu0 }
 0x607   : > { %vm2130_vm8 = vcmp.ge.f32.partialorder %v2118_v22, 0.0  ;;  %v2138_v12 = vmul.f32 0.01, %v2118_v22  ;;  %v2092_v34 = vadd.f32 %v2091_v59, %v5355_v8 }
 0x609   : > { %v2139_v43 = vmul.f32 0.01, %v2092_v34  ;;  %v2146_v1 = vsel %vm2130_vm8, %v2118_v22, %v2138_v12  ;;  %vm2131_vm0 = vcmp.ge.f32.partialorder %v2092_v34, 0.0 }
 0x60a   : > { %2198 = vmatmul.f32.vlgmr.msrb.gmra.mxu3 %v2146_v1  ;;  %2256 = vmatmul.f32.vlgmr.msra.gmra.mxu1 %v2146_v1  ;;  %v2286_v46 = vmul.f32 %v2271_v49, %v2146_v1 }
 0x60b   : > { %v2147_v30 = vsel %vm2131_vm0, %v2092_v34, %v2139_v43 }
 0x60c   : > { %v2120_v45 = vpop.f32.mrf.mxu1  ;;  %2172 = vmatmul.f32.gmra.mxu2 %v2147_v30  ;;  %2230 = vmatmul.f32.gmra.mxu0 %v2147_v30  ;;  %v2287_v24 = vmul.f32 %v4814_v19, %v2147_v30 }
 0x60d   : > { %v2121_v7 = vadd.f32 %v2120_v45, %v5355_v8  ;;  %v2283_v45 = vpop.permute.xlu1 %2282 }
 0x60e   : > { %v2094_v11 = vpop.f32.mrf.mxu0 }
 0x60f   : > { %v2140_v48 = vmul.f32 0.01, %v2121_v7  ;;  %v2095_v63 = vadd.f32 %v2094_v11, %v5356_v53  ;;  %vm2132_vm1 = vcmp.ge.f32.partialorder %v2121_v7, 0.0 }
 0x611   : > { %v2141_v31 = vmul.f32 0.01, %v2095_v63  ;;  %v2148_v18 = vsel %vm2132_vm1, %v2121_v7, %v2140_v48  ;;  %vm2133_vm2 = vcmp.ge.f32.partialorder %v2095_v63, 0.0  ;;  %v2307_v48 = vpop.permute.xlu2 %2306 }
 0x612   : > { %2201 = vmatmul.f32.gmra.mxu3 %v2148_v18  ;;  %2259 = vmatmul.f32.gmra.mxu1 %v2148_v18  ;;  %v2288_v57 = vmul.f32 %v4814_v19, %v2148_v18 }
 0x613   : > { %v2149_v27 = vsel %vm2133_vm2, %v2095_v63, %v2141_v31 }
 0x614   : > { %v2123_v2 = vpop.f32.mrf.mxu1  ;;  %2175 = vmatmul.f32.gmra.mxu2 %v2149_v27  ;;  %v2289_v8 = vmul.f32 %v4834_v10, %v2149_v27 }
 0x615   : > { %v2124_v55 = vadd.f32 %v2123_v2, %v5356_v53 }
 0x616   : > { %v2097_v29 = vpop.f32.mrf.mxu0 }
 0x617   : > { %v2142_v16 = vmul.f32 0.01, %v2124_v55  ;;  %v2098_v42 = vadd.f32 %v2097_v29, %v5357_v6  ;;  %vm2134_vm4 = vcmp.ge.f32.partialorder %v2124_v55, 0.0 }
 0x619   : > { %v2143_v3 = vmul.f32 0.01, %v2098_v42  ;;  %v4989_v14 = vsel %vm2134_vm4, %v2124_v55, %v2142_v16  ;;  %vm2135_vm6 = vcmp.ge.f32.partialorder %v2098_v42, 0.0 }
 0x61a   : > { %2204 = vmatmul.f32.gmra.mxu3 %v4989_v14  ;;  %v2290_v2 = vmul.f32 %v4834_v10, %v4989_v14 }
 0x61b   : > { %v2151_v9 = vsel %vm2135_vm6, %v2098_v42, %v2143_v3 }
 0x61c   : > { %v2126_v13 = vpop.f32.mrf.mxu1  ;;  %2178 = vmatmul.f32.gmra.mxu2 %v2151_v9  ;;  %v2291_v53 = vmul.f32 %v2283_v45, %v2151_v9 }
 0x61d   : > { %v2127_v25 = vadd.f32 %v2126_v13, %v5357_v6 }
 0x61f   : > { %vm2136_vm7 = vcmp.ge.f32.partialorder %v2127_v25, 0.0  ;;  %v2144_v0 = vmul.f32 0.01, %v2127_v25 }
 0x621   : > { %v2152_v4 = vsel %vm2136_vm7, %v2127_v25, %v2144_v0 }
 0x622   : > { %2207 = vmatmul.f32.gmra.mxu3 %v2152_v4  ;;  %v2292_v13 = vmul.f32 %v2283_v45, %v2152_v4 }
 0x624   : > { %2233 = vmatmul.f32.vlgmr.msra.gmra.mxu2 %v2149_v27 }
 0x62a   : > { %2262 = vmatmul.f32.vlgmr.msra.gmra.mxu3 %v4989_v14 }
 0x62c   : > { %2236 = vmatmul.f32.gmra.mxu2 %v2151_v9 }
 0x632   : > { %2265 = vmatmul.f32.gmra.mxu3 %v2152_v4 }
 0x681   : > { %v2228_v23 = vpop.f32.mrf.mxu0 }
 0x687   : > { %v2170_v35 = vpop.f32.mrf.mxu2  ;;  %v2257_v50 = vpop.f32.mrf.mxu1 }
 0x688   : > { %v2258_v51 = vadd.f32 %v2257_v50, %v2228_v23 }
 0x689   : > { %v2231_v15 = vpop.f32.mrf.mxu0 }
 0x68a   : > { %v2310_v62 = vmul.f32 %v2295_v21, %v2258_v51 }
 0x68c   : > { %v2318_v39 = vadd.f32 %v2310_v62, %v2286_v46 }
 0x68d   : > { %v2199_v54 = vpop.f32.mrf.mxu3 }
 0x68e   : > { %v2200_v28 = vadd.f32 %v2199_v54, %v2170_v35 }
 0x68f   : > { %v2173_v56 = vpop.f32.mrf.mxu2  ;;  %v2260_v32 = vpop.f32.mrf.mxu1 }
 0x690   : > { %v2261_v40 = vadd.f32 %v2260_v32, %v2231_v15  ;;  %v2309_v33 = vmul.f32 %v2295_v21, %v2200_v28 }
 0x692   : > { %v2312_v52 = vmul.f32 %v4818_v5, %v2261_v40  ;;  %v2317_v60 = vadd.f32 %v2309_v33, %v2285_v36 }
 0x694   : > { %v2320_v58 = vadd.f32 %v2312_v52, %v2288_v57 }
 0x695   : > { %v2202_v38 = vpop.f32.mrf.mxu3 }
 0x696   : > { %v2334_v26 = vadd.f32 %v2320_v58, %v2318_v39  ;;  %v2203_v41 = vadd.f32 %v2202_v38, %v2173_v56  ;;  %v2345_v56 = vpop.permute.xlu1 %2344 }
 0x697   : > { %v2176_v44 = vpop.f32.mrf.mxu2 }
 0x698   : > { %v2311_v17 = vmul.f32 %v4818_v5, %v2203_v41 }
 0x69a   : > { %v2319_v61 = vadd.f32 %v2311_v17, %v2287_v24 }
 0x69c   : > { %v2325_v22 = vadd.f32 %v2319_v61, %v2317_v60 }
 0x69d   : > { %v2205_v59 = vpop.f32.mrf.mxu3 }
 0x69e   : > { %v2206_v12 = vadd.f32 %v2205_v59, %v2176_v44 }
 0x69f   : > { %v2179_v43 = vpop.f32.mrf.mxu2 }
 0x6a0   : > { %v2313_v34 = vmul.f32 %v2303_v20, %v2206_v12 }
 0x6a2   : > { %v2321_v1 = vadd.f32 %v2313_v34, %v2289_v8 }
 0x6a4   : > { %v2326_v7 = vadd.f32 %v2325_v22, %v2321_v1 }
 0x6a5   : > { %v2208_v11 = vpop.f32.mrf.mxu3 }
 0x6a6   : > { %v2209_v37 = vadd.f32 %v2208_v11, %v2179_v43 }
 0x6a7   : > { %v2234_v5 = vpop.f32.mrf.mxu2 }
 0x6a8   : > { %v2315_v19 = vmul.f32 %v2307_v48, %v2209_v37 }
 0x6aa   : > { %v2323_v30 = vadd.f32 %v2315_v19, %v2291_v53 }
 0x6ac   : > { %v2327_v63 = vadd.f32 %v2326_v7, %v2323_v30 }
 0x6ad   : > { %v2263_v31 = vpop.f32.mrf.mxu3 }
 0x6ae   : > { %v2264_v18 = vadd.f32 %v2263_v31, %v2234_v5  ;;  %v2328_v29 = vrot.slane %v2327_v63, 4 }
 0x6af   : > { %v2237_v6 = vpop.f32.mrf.mxu2 }
 0x6b0   : > { %v2314_v55 = vmul.f32 %v2303_v20, %v2264_v18  ;;  %v2329_v25 = vadd.f32 %v2328_v29, %v2327_v63 }
 0x6b2   : > { %v2322_v27 = vadd.f32 %v2314_v55, %v2290_v2  ;;  %v2330_v23 = vrot.slane %v2329_v25, 2 }
 0x6b4   : > { %v2335_v16 = vadd.f32 %v2334_v26, %v2322_v27  ;;  %v2331_v50 = vadd.f32 %v2330_v23, %v2329_v25 }
 0x6b5   : > { %v2266_v42 = vpop.f32.mrf.mxu3 }
 0x6b6   : > { %v2267_v3 = vadd.f32 %v2266_v42, %v2237_v6  ;;  %v2332_v10 = vrot.slane %v2331_v50, 1 }
 0x6b8   : > { %v2316_v9 = vmul.f32 %v2307_v48, %v2267_v3  ;;  %v2333_v4 = vadd.f32 %v2332_v10, %v2331_v50 }
 0x6ba   : > { %v2324_v0 = vadd.f32 %v2316_v9, %v2292_v13  ;;  %v2347_v62 = vadd.f32 %v2345_v56, %v2333_v4 }
 0x6bc   : > { %v2336_v49 = vadd.f32 %v2335_v16, %v2324_v0 }
 0x6be   : > { %v2337_v35 = vrot.slane %v2336_v49, 4 }
 0x6c0   : > { %v2338_v51 = vadd.f32 %v2337_v35, %v2336_v49 }
 0x6c2   : > { %v2339_v54 = vrot.slane %v2338_v51, 2 }
 0x6c4   : > { %v2340_v14 = vadd.f32 %v2339_v54, %v2338_v51 }
 0x6c6   : > { %v2341_v21 = vrot.slane %v2340_v14, 1 }
 0x6c8   : > { %v2342_v15 = vadd.f32 %v2341_v21, %v2340_v14 }
 0x6ca   : > { %v2348_v32 = vadd.f32 %v2345_v56, %v2342_v15 }
 0x6cc   : > { %v2351_v40 = vrot.slane %v2348_v32, 7 }
 0x6ce   : > { %v2352_v46 = vsel %vm964_vm3, %v2347_v62, %v2351_v40 }
 0x6cf   : > { %2660 = vst.msk [vmem:[%s4348_s30 + $0x4] sm:$0x3] %vm4333_vm5, %v2352_v46 }
 0x6d0   : > { %2975 = shalt.err (!%p2972_p5)
}
 0x6d1   : > { %s3033_s25 = smov 32   ;;  %s3034_s21 = smov 2  }
 0x6d2   : > { %2716 = dma.vmem_to_hbm [thread:$0]  (%p3101_p11), %s2370_s20, 96, %s2372_s28, %s2357_s16, %s3033_s25, %s3033_s25, %s3034_s21  }
 0x6d3 PF: > { %s2386_s26 = sand.u32 1, %s3006_s12   ;;  %p2729_p7 = pnand %p2490_p9, %p3105_p12 }
 0x6d4   : > { %s2387_s9 = scalar_lea.sflag [#allocation4], %s2386_s26 }
 0x6d5   : > { %p2730_p8 = pneg %p2729_p7 }
 0x6d7   : > { %3001 = dma.done.wait (%p2730_p8), %s2387_s9, 96  }
 0x6d8   : > { %3003 = vsyncadd (%p2730_p8), %s2387_s9, 4294967200  ;;  %s5358_s6 = sld [smem:[#allocation12_spill]]  ;;  %p19_p10 = scmp.ge.s32.totalorder %s3080_s18, 4  }
 0x6d9   : > { %s5359_s14 = sld [smem:[#allocation13_spill]]  ;;  %s5360_s12 = smov %s3010_s13 }
 0x6da   : > { %s5362_s15 = smov %s3080_s18  ;;  %21 = sbr.rel (!%p19_p10) target bundleno = 9 (0x9), region = 109 }
 0x6de   : > { %s5361_s13 = smov %s5358_s6 }
 0x6df   :  { %2393 = vsyncpa [#allocation3], 1 }
 0x6e0   :  { %2395 = vsyncpa [#allocation3 + $0x1], 1 }
 0x6e1   :  { %2396 = vsyncpa [#allocation6], 1 }
 0x6e2   :  { %2398 = vsyncpa [#allocation6 + $0x1], 1 }
 0x6e3   :  { %2399 = vsyncpa [#allocation4], 1 }
 0x6e4   :  { %2401 = vsyncpa [#allocation4 + $0x1], 1 }

</bundles_post_ra>
